<compile_context>
chip_gen: v5e
topology: v5e:2x2
jax: 0.10.0
libtpu: 0.0.40
codegen_flags: <defaults>
</compile_context>

<pallas_src>
import functools

import jax
import jax.numpy as jnp
from jax.experimental import pallas as pl
from jax.experimental.pallas import tpu as pltpu

EPS = 1e-5


def _round_up(x, m):
    return (x + m - 1) // m * m


# ----------------------------- kernels --------------------------------------
def mm_stats_kernel(x_ref, w_ref, y_ref, st_ref):
    """1x1 conv tile: y = x @ w (bf16 operands, f32 acc) + packed partial BN stats."""
    y = jnp.dot(x_ref[...], w_ref[...], preferred_element_type=jnp.float32)
    y_ref[...] = y.astype(y_ref.dtype)
    st_ref[...] = jnp.concatenate(
        [jnp.sum(y, axis=0, keepdims=True),
         jnp.sum(y * y, axis=0, keepdims=True)], axis=-1)[None]


def affine_relu_mm_stats_kernel(y_in_ref, sc_ref, sh_ref, w_ref, y_ref, st_ref,
                                *, rows_valid, tile_m, need_mask):
    """Fused bn-affine + ReLU epilogue of the previous conv, then 1x1 conv tile
    (bf16 MXU matmul, f32 acc) + packed partial BN stats for the next BN."""
    h = jnp.maximum(y_in_ref[...].astype(jnp.float32) * sc_ref[...] + sh_ref[...], 0.0)
    if need_mask:  # select away padded / uninitialized tail rows (NaN-safe select)
        row = (jax.lax.broadcasted_iota(jnp.int32, (h.shape[0], 1), 0)
               + pl.program_id(0) * tile_m)
        h = jnp.where(row < rows_valid, h, 0.0)
    y = jnp.dot(h.astype(jnp.bfloat16), w_ref[...], preferred_element_type=jnp.float32)
    y_ref[...] = y.astype(y_ref.dtype)
    st_ref[...] = jnp.concatenate(
        [jnp.sum(y, axis=0, keepdims=True),
         jnp.sum(y * y, axis=0, keepdims=True)], axis=-1)[None]


def conv3x3_fused_kernel(y1_ref, sc_ref, sh_ref, w_ref, y2_ref, st_ref, *, W):
    """Per-image fused: bn1 affine + ReLU -> 3x3 conv (padding=1) as three K=3*Pp
    MXU matmuls using roll-based shifted windows -> single store + BN2 partials."""
    HW, Pp = y1_ref.shape
    f32, bf16 = jnp.float32, jnp.bfloat16

    h = jnp.maximum(y1_ref[...].astype(f32) * sc_ref[...] + sh_ref[...], 0.0)  # (HW,Pp)

    # Column (x) shifts via sublane roll (+1 / -1) + image-edge masks; flat idx = y*W + x.
    idx = jax.lax.broadcasted_iota(jnp.int32, (HW, 1), 0)
    xpos = (idx & (W - 1)) if (W & (W - 1)) == 0 else jax.lax.rem(idx, W)
    h_xm1 = jnp.where(xpos == 0, 0.0, pltpu.roll(h, shift=1, axis=0))          # in(y, x-1)
    h_xp1 = jnp.where(xpos == W - 1, 0.0, pltpu.roll(h, shift=HW - 1, axis=0))  # in(y, x+1)

    # K-concatenated activation, ordered to match w2.reshape(3, 3*Pp, Pp).
    hcat = jnp.concatenate([h_xm1, h, h_xp1], axis=-1)                          # (HW, 3*Pp)

    # 3 matmuls with K = 3*Pp; local f32 accumulator, single store of y2.
    acc = jnp.dot(hcat.astype(bf16), w_ref[1], preferred_element_type=f32)      # dy = 0
    top = jnp.where(idx < W, 0.0, pltpu.roll(hcat, shift=W, axis=0))            # in(y-1, .)
    acc = acc + jnp.dot(top.astype(bf16), w_ref[0], preferred_element_type=f32)
    bot = jnp.where(idx >= HW - W, 0.0, pltpu.roll(hcat, shift=HW - W, axis=0))  # in(y+1, .)
    acc = acc + jnp.dot(bot.astype(bf16), w_ref[2], preferred_element_type=f32)

    y2_ref[...] = acc.astype(y2_ref.dtype)
    st_ref[...] = jnp.concatenate(
        [jnp.sum(acc, axis=0, keepdims=True),
         jnp.sum(acc * acc, axis=0, keepdims=True)], axis=-1)[None]


def affine_add_relu_kernel(y_ref, sc_ref, sh_ref, res_ref, o_ref):
    """bn3 affine + residual add + ReLU (emits network dtype)."""
    o = (y_ref[...].astype(jnp.float32) * sc_ref[...] + sh_ref[...]
         + res_ref[...].astype(jnp.float32))
    o_ref[...] = jnp.maximum(o, 0.0).astype(o_ref.dtype)


# ----------------------------- wrapper ---------------------------------------
def _bn_scale_shift(partial_stats, gamma, beta, count):
    """Reduce per-tile packed (sum | sumsq) partials into per-channel scale/shift.

    NOTE: var = E[y^2] - E[y]^2 from f32 partials; adequate at these magnitudes
    (activations are zero-ish mean).  Use shifted/two-pass stats if |mean| >> std.
    """
    tot = jnp.sum(partial_stats, axis=(0, 1))            # (2*C,)
    C = gamma.shape[0]
    mean = tot[:C] / count
    var = jnp.maximum(tot[C:] / count - mean * mean, 0.0)
    scale = gamma * jax.lax.rsqrt(var + EPS)
    shift = beta - mean * scale
    return scale.reshape(1, -1), shift.reshape(1, -1)


def bottleneck_forward(x_nchw, params, *, tile_m=1024):
    N, Cin, H, W = x_nchw.shape
    planes = params["w1"].shape[1]
    Cout = params["w3"].shape[1]
    if Cout != Cin:
        # TODO(synk): downsample path (needed when Cout != Cin) not implemented.
        raise NotImplementedError("identity residual requires inplanes == planes*4")
    HW = H * W
    M = N * HW
    if HW % 16 != 0:
        # TODO(synk): halo/ragged row handling for arbitrary H*W not implemented.
        raise NotImplementedError("H*W must be a multiple of 16")

    # lane-dense channel padding (multiples of 128)
    Cp = _round_up(Cin, 128)        # padded Cin == padded Cout (identity residual)
    Pp = _round_up(planes, 128)
    bf16 = jnp.bfloat16

    # ---- layout glue: NCHW -> NHWC -> (M, C); bf16 rows, zero-padded ----
    x2d = jnp.transpose(x_nchw, (0, 2, 3, 1)).reshape(M, Cin)
    TM = _round_up(min(tile_m, _round_up(M, 16)), 16)
    Mp = _round_up(M, TM)
    n_tiles = Mp // TM
    x_p = jnp.pad(x2d, ((0, Mp - M), (0, Cp - Cin))).astype(bf16)

    # ---- params: pad to lane-dense shapes; conv weights in bf16 for the MXU ----
    w1 = jnp.pad(params["w1"], ((0, Cp - Cin), (0, Pp - planes))).astype(bf16)
    # w2 packed for the K-concatenated 3-matmul conv: (ky, kx*Cin, Cout)
    w2 = jnp.pad(params["w2"], ((0, 0), (0, 0),
                                (0, Pp - planes), (0, Pp - planes))
                 ).reshape(3, 3 * Pp, Pp).astype(bf16)
    w3 = jnp.pad(params["w3"], ((0, Pp - planes), (0, Cp - Cout))).astype(bf16)
    g1 = jnp.pad(params["g1"], (0, Pp - planes)); b1 = jnp.pad(params["b1"], (0, Pp - planes))
    g2 = jnp.pad(params["g2"], (0, Pp - planes)); b2 = jnp.pad(params["b2"], (0, Pp - planes))
    g3 = jnp.pad(params["g3"], (0, Cp - Cout));   b3 = jnp.pad(params["b3"], (0, Cp - Cout))

    cp = pltpu.CompilerParams(dimension_semantics=("parallel",),
                              vmem_limit_bytes=48 * 1024 * 1024)

    # ---- 1) conv1 (1x1): M-tiled bf16 matmul + packed partial BN1 stats ----
    ce1 = pl.CostEstimate(flops=2 * Mp * Cp * Pp, transcendentals=0,
                          bytes_accessed=2 * (Mp * Cp + Cp * Pp + Mp * Pp)
                          + 4 * n_tiles * 2 * Pp)
    y1, st1 = pl.pallas_call(
        mm_stats_kernel,
        grid=(n_tiles,),
        in_specs=[pl.BlockSpec((TM, Cp), lambda i: (i, 0)),
                  pl.BlockSpec((Cp, Pp), lambda i: (0, 0))],
        out_specs=(pl.BlockSpec((TM, Pp), lambda i: (i, 0)),
                   pl.BlockSpec((1, 1, 2 * Pp), lambda i: (i, 0, 0))),
        out_shape=(jax.ShapeDtypeStruct((Mp, Pp), bf16),
                   jax.ShapeDtypeStruct((n_tiles, 1, 2 * Pp), jnp.float32)),
        compiler_params=cp, cost_estimate=ce1,
    )(x_p, w1)
    sc1, sh1 = _bn_scale_shift(st1, g1, b1, M)

    # ---- 2) fused bn1+relu -> 3x3 conv (per image, 3 K=3*Pp matmuls) + BN2 partials ----
    ce2 = pl.CostEstimate(flops=2 * M * 9 * Pp * Pp, transcendentals=0,
                          bytes_accessed=2 * (2 * M * Pp + 9 * Pp * Pp) + 4 * N * 2 * Pp)
    y2, st2 = pl.pallas_call(
        functools.partial(conv3x3_fused_kernel, W=W),
        grid=(N,),
        in_specs=[pl.BlockSpec((HW, Pp), lambda n: (n, 0)),
                  pl.BlockSpec((1, Pp), lambda n: (0, 0)),
                  pl.BlockSpec((1, Pp), lambda n: (0, 0)),
                  pl.BlockSpec((3, 3 * Pp, Pp), lambda n: (0, 0, 0))],
        out_specs=(pl.BlockSpec((HW, Pp), lambda n: (n, 0)),
                   pl.BlockSpec((1, 1, 2 * Pp), lambda n: (n, 0, 0))),
        # y2 allocated at (Mp, Pp) directly: tail rows (if any) are never written and
        # are selected away by need_mask in call 3 before the matmul / stats.
        out_shape=(jax.ShapeDtypeStruct((Mp, Pp), bf16),
                   jax.ShapeDtypeStruct((N, 1, 2 * Pp), jnp.float32)),
        compiler_params=cp, cost_estimate=ce2,
    )(y1, sc1, sh1, w2)
    sc2, sh2 = _bn_scale_shift(st2, g2, b2, M)

    # ---- 3) fused bn2+relu -> conv3 (1x1) + packed partial BN3 stats ----
    ce3 = pl.CostEstimate(flops=2 * Mp * Pp * Cp, transcendentals=0,
                          bytes_accessed=2 * (Mp * Pp + Pp * Cp + Mp * Cp)
                          + 4 * n_tiles * 2 * Cp)
    y3, st3 = pl.pallas_call(
        functools.partial(affine_relu_mm_stats_kernel,
                          rows_valid=M, tile_m=TM, need_mask=(Mp != M)),
        grid=(n_tiles,),
        in_specs=[pl.BlockSpec((TM, Pp), lambda i: (i, 0)),
                  pl.BlockSpec((1, Pp), lambda i: (0, 0)),
                  pl.BlockSpec((1, Pp), lambda i: (0, 0)),
                  pl.BlockSpec((Pp, Cp), lambda i: (0, 0))],
        out_specs=(pl.BlockSpec((TM, Cp), lambda i: (i, 0)),
                   pl.BlockSpec((1, 1, 2 * Cp), lambda i: (i, 0, 0))),
        out_shape=(jax.ShapeDtypeStruct((Mp, Cp), bf16),
                   jax.ShapeDtypeStruct((n_tiles, 1, 2 * Cp), jnp.float32)),
        compiler_params=cp, cost_estimate=ce3,
    )(y2, sc2, sh2, w3)
    sc3, sh3 = _bn_scale_shift(st3, g3, b3, M)

    # ---- 4) bn3 affine + residual add + relu (output in network dtype) ----
    out_dt = x_nchw.dtype
    ce4 = pl.CostEstimate(flops=4 * Mp * Cp, transcendentals=0,
                          bytes_accessed=Mp * Cp * (2 + 2 + jnp.dtype(out_dt).itemsize))
    out2d = pl.pallas_call(
        affine_add_relu_kernel,
        grid=(n_tiles,),
        in_specs=[pl.BlockSpec((TM, Cp), lambda i: (i, 0)),
                  pl.BlockSpec((1, Cp), lambda i: (0, 0)),
                  pl.BlockSpec((1, Cp), lambda i: (0, 0)),
                  pl.BlockSpec((TM, Cp), lambda i: (i, 0))],
        out_specs=pl.BlockSpec((TM, Cp), lambda i: (i, 0)),
        out_shape=jax.ShapeDtypeStruct((Mp, Cp), out_dt),
        compiler_params=cp, cost_estimate=ce4,
    )(y3, sc3, sh3, x_p)

    out = out2d[:M, :Cout].reshape(N, H, W, Cout).transpose(0, 3, 1, 2)
    return out


# ----------------------------- reference & init ------------------------------
def reference_forward(x_nchw, params):
    """Pure-JAX f32 reference of the PyTorch Bottleneck forward (training-mode BN)."""
    hi = jax.lax.Precision.HIGHEST
    x = jnp.transpose(x_nchw, (0, 2, 3, 1)).astype(jnp.float32)

    def bn(y, g, b):
        m = jnp.mean(y, axis=(0, 1, 2), keepdims=True)
        v = jnp.mean((y - m) ** 2, axis=(0, 1, 2), keepdims=True)
        return (y - m) * jax.lax.rsqrt(v + EPS) * g + b

    h = jnp.maximum(bn(jnp.einsum("nhwc,cd->nhwd", x, params["w1"], precision=hi),
                       params["g1"], params["b1"]), 0.0)
    h = jax.lax.conv_general_dilated(h, params["w2"], (1, 1), "SAME",
                                     dimension_numbers=("NHWC", "HWIO", "NHWC"),
                                     precision=hi)
    h = jnp.maximum(bn(h, params["g2"], params["b2"]), 0.0)
    h = bn(jnp.einsum("nhwc,cd->nhwd", h, params["w3"], precision=hi),
           params["g3"], params["b3"])
    return jnp.transpose(jnp.maximum(h + x, 0.0), (0, 3, 1, 2))


def init_params(key, inplanes, planes):
    k1, k2, k3 = jax.random.split(key, 3)
    f32 = jnp.float32
    return {
        # conv weights stored channel-last: (Cin, Cout) / (kh, kw, Cin, Cout)
        "w1": 0.1 * jax.random.normal(k1, (inplanes, planes), f32),
        "w2": 0.1 * jax.random.normal(k2, (3, 3, planes, planes), f32),
        "w3": 0.1 * jax.random.normal(k3, (planes, planes * 4), f32),
        # BatchNorm affine params: PyTorch default init (weight=1, bias=0)
        "g1": jnp.ones((planes,), f32), "b1": jnp.zeros((planes,), f32),
        "g2": jnp.ones((planes,), f32), "b2": jnp.zeros((planes,), f32),
        "g3": jnp.ones((planes * 4,), f32), "b3": jnp.zeros((planes * 4,), f32),
    }


if __name__ == "__main__":
    # inplanes must equal planes*4 so the identity residual add is valid
    # (downsample=None default).
    N, planes, H, W = 2, 4, 16, 16
    inplanes = planes * 4  # 16

    key = jax.random.PRNGKey(0)
    kx, kp = jax.random.split(key)
    x = jax.random.normal(kx, (N, inplanes, H, W), jnp.float32)  # NCHW input
    params = init_params(kp, inplanes, planes)

    fwd = jax.jit(functools.partial(bottleneck_forward, tile_m=1024))
    out = fwd(x, params)
    jax.block_until_ready(out)

    assert out.shape == (N, planes * 4, H, W), out.shape
    assert bool(jnp.all(jnp.isfinite(out)))
    assert bool(jnp.all(out >= 0.0))  # final ReLU

    # sanity check vs pure-JAX f32 reference (kernel uses bf16 MXU operands / intermediates)
    ref = reference_forward(x, params)
    err = float(jnp.max(jnp.abs(out - ref)))
    assert err < 0.5, f"max abs err vs reference: {err}"

    print("KERNEL_OK")
</pallas_src>

<mosaic_0001>
module attributes {stable_mosaic.version = 11 : i64} {
  func.func @conv3x3_fused_kernel(%arg0: i32, %arg1: memref<256x128xbf16, #tpu.memory_space<vmem>>, %arg2: memref<1x128xf32, #tpu.memory_space<vmem>>, %arg3: memref<1x128xf32, #tpu.memory_space<vmem>>, %arg4: memref<3x384x128xbf16, #tpu.memory_space<vmem>>, %arg5: memref<256x128xbf16, #tpu.memory_space<vmem>>, %arg6: memref<1x1x256xf32, #tpu.memory_space<vmem>>) attributes {dimension_semantics = [#tpu.dimension_semantics<parallel>], iteration_bounds = array<i64: 2>, scalar_prefetch = 0 : i64, scratch_operands = 0 : i64, tpu.core_type = #tpu.core_type<tc>, window_params = [{transform_indices = @transform_0, window_bounds = array<i64: 256, 128>}, {pipeline_mode = #tpu.pipeline_mode<synchronous>, transform_indices = @transform_1, window_bounds = array<i64: 1, 128>}, {pipeline_mode = #tpu.pipeline_mode<synchronous>, transform_indices = @transform_2, window_bounds = array<i64: 1, 128>}, {pipeline_mode = #tpu.pipeline_mode<synchronous>, transform_indices = @transform_3, window_bounds = array<i64: 3, 384, 128>}, {transform_indices = @transform_4, window_bounds = array<i64: 256, 128>}, {transform_indices = @transform_5, window_bounds = array<i64: 1, 1, 256>}]} {
    %c0 = arith.constant 0 : index
    %c0_0 = arith.constant 0 : index
    %0 = vector.load %arg1[%c0, %c0_0] : memref<256x128xbf16, #tpu.memory_space<vmem>>, vector<256x128xbf16>
    %1 = arith.extf %0 : vector<256x128xbf16> to vector<256x128xf32>
    %c0_1 = arith.constant 0 : index
    %c0_2 = arith.constant 0 : index
    %2 = vector.load %arg2[%c0_1, %c0_2] : memref<1x128xf32, #tpu.memory_space<vmem>>, vector<1x128xf32>
    %3 = vector.broadcast %2 : vector<1x128xf32> to vector<256x128xf32>
    %4 = arith.mulf %1, %3 : vector<256x128xf32>
    %c0_3 = arith.constant 0 : index
    %c0_4 = arith.constant 0 : index
    %5 = vector.load %arg3[%c0_3, %c0_4] : memref<1x128xf32, #tpu.memory_space<vmem>>, vector<1x128xf32>
    %6 = vector.broadcast %5 : vector<1x128xf32> to vector<256x128xf32>
    %7 = arith.addf %4, %6 : vector<256x128xf32>
    %cst = arith.constant 0.000000e+00 : f32
    %8 = vector.broadcast %cst : f32 to vector<256x128xf32>
    %9 = arith.maximumf %7, %8 : vector<256x128xf32>
    %10 = tpu.iota {dimensions = array<i32: 0>} : vector<256x1xi32>
    %c15_i32 = arith.constant 15 : i32
    %11 = vector.broadcast %c15_i32 : i32 to vector<256x1xi32>
    %12 = arith.andi %10, %11 : vector<256x1xi32>
    %c0_i32 = arith.constant 0 : i32
    %13 = vector.broadcast %c0_i32 : i32 to vector<256x1xi32>
    %14 = arith.cmpi eq, %12, %13 : vector<256x1xi32>
    %c1_i32 = arith.constant 1 : i32
    %15 = tpu.dynamic_rotate %9 by %c1_i32 dim 0 : vector<256x128xf32>, i32 -> vector<256x128xf32>
    %cst_5 = arith.constant 0.000000e+00 : f32
    %16 = vector.shape_cast %14 : vector<256x1xi1> to vector<256x1xi1>
    %17 = vector.broadcast %16 : vector<256x1xi1> to vector<256x128xi1>
    %18 = vector.broadcast %cst_5 : f32 to vector<256x128xf32>
    %19 = arith.select %17, %18, %15 : vector<256x128xi1>, vector<256x128xf32>
    %c15_i32_6 = arith.constant 15 : i32
    %20 = vector.broadcast %c15_i32_6 : i32 to vector<256x1xi32>
    %21 = arith.cmpi eq, %12, %20 : vector<256x1xi32>
    %c255_i32 = arith.constant 255 : i32
    %22 = tpu.dynamic_rotate %9 by %c255_i32 dim 0 : vector<256x128xf32>, i32 -> vector<256x128xf32>
    %cst_7 = arith.constant 0.000000e+00 : f32
    %23 = vector.shape_cast %21 : vector<256x1xi1> to vector<256x1xi1>
    %24 = vector.broadcast %23 : vector<256x1xi1> to vector<256x128xi1>
    %25 = vector.broadcast %cst_7 : f32 to vector<256x128xf32>
    %26 = arith.select %24, %25, %22 : vector<256x128xi1>, vector<256x128xf32>
    %27 = tpu.concatenate %19, %9, %26 in 1 : vector<256x128xf32>, vector<256x128xf32>, vector<256x128xf32> -> vector<256x384xf32>
    %28 = arith.truncf %27 : vector<256x384xf32> to vector<256x384xbf16>
    %c1 = arith.constant 1 : index
    %c0_8 = arith.constant 0 : index
    %c0_9 = arith.constant 0 : index
    %29 = vector.load %arg4[%c1, %c0_8, %c0_9] : memref<3x384x128xbf16, #tpu.memory_space<vmem>>, vector<1x384x128xbf16>
    %30 = vector.shape_cast %29 : vector<1x384x128xbf16> to vector<384x128xbf16>
    %cst_10 = arith.constant dense<0.000000e+00> : vector<256x128xf32>
    %31 = tpu.matmul %28, %30, %cst_10 {dimension_numbers = #tpu.dot_dimension_numbers<[1], [0], [0], [1], [0, 0, 1, 1], [], []>} : vector<256x384xbf16>, vector<384x128xbf16>, vector<256x128xf32> -> vector<256x128xf32>
    %c16_i32 = arith.constant 16 : i32
    %32 = vector.broadcast %c16_i32 : i32 to vector<256x1xi32>
    %33 = arith.cmpi slt, %10, %32 : vector<256x1xi32>
    %c16_i32_11 = arith.constant 16 : i32
    %34 = tpu.dynamic_rotate %27 by %c16_i32_11 dim 0 : vector<256x384xf32>, i32 -> vector<256x384xf32>
    %cst_12 = arith.constant 0.000000e+00 : f32
    %35 = vector.shape_cast %33 : vector<256x1xi1> to vector<256x1xi1>
    %36 = vector.broadcast %35 : vector<256x1xi1> to vector<256x384xi1>
    %37 = vector.broadcast %cst_12 : f32 to vector<256x384xf32>
    %38 = arith.select %36, %37, %34 : vector<256x384xi1>, vector<256x384xf32>
    %39 = arith.truncf %38 : vector<256x384xf32> to vector<256x384xbf16>
    %c0_13 = arith.constant 0 : index
    %c0_14 = arith.constant 0 : index
    %c0_15 = arith.constant 0 : index
    %40 = vector.load %arg4[%c0_13, %c0_14, %c0_15] : memref<3x384x128xbf16, #tpu.memory_space<vmem>>, vector<1x384x128xbf16>
    %41 = vector.shape_cast %40 : vector<1x384x128xbf16> to vector<384x128xbf16>
    %cst_16 = arith.constant dense<0.000000e+00> : vector<256x128xf32>
    %42 = tpu.matmul %39, %41, %cst_16 {dimension_numbers = #tpu.dot_dimension_numbers<[1], [0], [0], [1], [0, 0, 1, 1], [], []>} : vector<256x384xbf16>, vector<384x128xbf16>, vector<256x128xf32> -> vector<256x128xf32>
    %43 = arith.addf %31, %42 : vector<256x128xf32>
    %c240_i32 = arith.constant 240 : i32
    %44 = vector.broadcast %c240_i32 : i32 to vector<256x1xi32>
    %45 = arith.cmpi sge, %10, %44 : vector<256x1xi32>
    %c240_i32_17 = arith.constant 240 : i32
    %46 = tpu.dynamic_rotate %27 by %c240_i32_17 dim 0 : vector<256x384xf32>, i32 -> vector<256x384xf32>
    %cst_18 = arith.constant 0.000000e+00 : f32
    %47 = vector.shape_cast %45 : vector<256x1xi1> to vector<256x1xi1>
    %48 = vector.broadcast %47 : vector<256x1xi1> to vector<256x384xi1>
    %49 = vector.broadcast %cst_18 : f32 to vector<256x384xf32>
    %50 = arith.select %48, %49, %46 : vector<256x384xi1>, vector<256x384xf32>
    %51 = arith.truncf %50 : vector<256x384xf32> to vector<256x384xbf16>
    %c2 = arith.constant 2 : index
    %c0_19 = arith.constant 0 : index
    %c0_20 = arith.constant 0 : index
    %52 = vector.load %arg4[%c2, %c0_19, %c0_20] : memref<3x384x128xbf16, #tpu.memory_space<vmem>>, vector<1x384x128xbf16>
    %53 = vector.shape_cast %52 : vector<1x384x128xbf16> to vector<384x128xbf16>
    %cst_21 = arith.constant dense<0.000000e+00> : vector<256x128xf32>
    %54 = tpu.matmul %51, %53, %cst_21 {dimension_numbers = #tpu.dot_dimension_numbers<[1], [0], [0], [1], [0, 0, 1, 1], [], []>} : vector<256x384xbf16>, vector<384x128xbf16>, vector<256x128xf32> -> vector<256x128xf32>
    %55 = arith.addf %43, %54 : vector<256x128xf32>
    %56 = arith.truncf %55 : vector<256x128xf32> to vector<256x128xbf16>
    %c0_22 = arith.constant 0 : index
    %c0_23 = arith.constant 0 : index
    %57 = vector.load %arg5[%c0_22, %c0_23] : memref<256x128xbf16, #tpu.memory_space<vmem>>, vector<256x128xbf16>
    tpu.vector_store %arg5[%c0_22, %c0_23], %56 {strides = array<i32>} : memref<256x128xbf16, #tpu.memory_space<vmem>>, vector<256x128xbf16>,
    %cst_24 = arith.constant dense<0.000000e+00> : vector<128xf32>
    %58 = vector.multi_reduction <add>, %55, %cst_24 [0] : vector<256x128xf32> to vector<128xf32>
    %59 = vector.shape_cast %58 : vector<128xf32> to vector<1x128xf32>
    %60 = arith.mulf %55, %55 : vector<256x128xf32>
    %cst_25 = arith.constant dense<0.000000e+00> : vector<128xf32>
    %61 = vector.multi_reduction <add>, %60, %cst_25 [0] : vector<256x128xf32> to vector<128xf32>
    %62 = vector.shape_cast %61 : vector<128xf32> to vector<1x128xf32>
    %63 = tpu.concatenate %59, %62 in 1 : vector<1x128xf32>, vector<1x128xf32> -> vector<1x256xf32>
    %64 = vector.shape_cast %63 : vector<1x256xf32> to vector<1x1x256xf32>
    %c0_26 = arith.constant 0 : index
    %c0_27 = arith.constant 0 : index
    %c0_28 = arith.constant 0 : index
    %65 = vector.load %arg6[%c0_26, %c0_27, %c0_28] : memref<1x1x256xf32, #tpu.memory_space<vmem>>, vector<1x1x256xf32>
    tpu.vector_store %arg6[%c0_26, %c0_27, %c0_28], %64 {strides = array<i32>} : memref<1x1x256xf32, #tpu.memory_space<vmem>>, vector<1x1x256xf32>,
    return
  }
  func.func @transform_0(%arg0: i32) -> (i32, i32) {
    %c0_i32 = arith.constant 0 : i32
    %c0_i32_0 = arith.constant 0 : i32
    return %arg0, %c0_i32 : i32, i32
  }
  func.func @transform_1(%arg0: i32) -> (i32, i32) {
    %c0_i32 = arith.constant 0 : i32
    %c0_i32_0 = arith.constant 0 : i32
    %c0_i32_1 = arith.constant 0 : i32
    return %c0_i32, %c0_i32_0 : i32, i32
  }
  func.func @transform_2(%arg0: i32) -> (i32, i32) {
    %c0_i32 = arith.constant 0 : i32
    %c0_i32_0 = arith.constant 0 : i32
    %c0_i32_1 = arith.constant 0 : i32
    return %c0_i32, %c0_i32_0 : i32, i32
  }
  func.func @transform_3(%arg0: i32) -> (i32, i32, i32) {
    %c0_i32 = arith.constant 0 : i32
    %c0_i32_0 = arith.constant 0 : i32
    %c0_i32_1 = arith.constant 0 : i32
    %c0_i32_2 = arith.constant 0 : i32
    return %c0_i32, %c0_i32_0, %c0_i32_1 : i32, i32, i32
  }
  func.func @transform_4(%arg0: i32) -> (i32, i32) {
    %c0_i32 = arith.constant 0 : i32
    %c0_i32_0 = arith.constant 0 : i32
    return %arg0, %c0_i32 : i32, i32
  }
  func.func @transform_5(%arg0: i32) -> (i32, i32, i32) {
    %c0_i32 = arith.constant 0 : i32
    %c0_i32_0 = arith.constant 0 : i32
    %c0_i32_1 = arith.constant 0 : i32
    return %arg0, %c0_i32, %c0_i32_0 : i32, i32, i32
  }
}

module attributes {stable_mosaic.version = 11 : i64} {
  func.func @mm_stats_kernel(%arg0: i32, %arg1: memref<512x128xbf16, #tpu.memory_space<vmem>>, %arg2: memref<128x128xbf16, #tpu.memory_space<vmem>>, %arg3: memref<512x128xbf16, #tpu.memory_space<vmem>>, %arg4: memref<1x1x256xf32, #tpu.memory_space<vmem>>) attributes {dimension_semantics = [#tpu.dimension_semantics<parallel>], iteration_bounds = array<i64: 1>, scalar_prefetch = 0 : i64, scratch_operands = 0 : i64, tpu.core_type = #tpu.core_type<tc>, window_params = [{transform_indices = @transform_0, window_bounds = array<i64: 512, 128>}, {pipeline_mode = #tpu.pipeline_mode<synchronous>, transform_indices = @transform_1, window_bounds = array<i64: 128, 128>}, {transform_indices = @transform_2, window_bounds = array<i64: 512, 128>}, {transform_indices = @transform_3, window_bounds = array<i64: 1, 1, 256>}]} {
    %c0 = arith.constant 0 : index
    %c0_0 = arith.constant 0 : index
    %0 = vector.load %arg1[%c0, %c0_0] : memref<512x128xbf16, #tpu.memory_space<vmem>>, vector<512x128xbf16>
    %c0_1 = arith.constant 0 : index
    %c0_2 = arith.constant 0 : index
    %1 = vector.load %arg2[%c0_1, %c0_2] : memref<128x128xbf16, #tpu.memory_space<vmem>>, vector<128x128xbf16>
    %cst = arith.constant dense<0.000000e+00> : vector<512x128xf32>
    %2 = tpu.matmul %0, %1, %cst {dimension_numbers = #tpu.dot_dimension_numbers<[1], [0], [0], [1], [0, 0, 1, 1], [], []>} : vector<512x128xbf16>, vector<128x128xbf16>, vector<512x128xf32> -> vector<512x128xf32>
    %3 = arith.truncf %2 : vector<512x128xf32> to vector<512x128xbf16>
    %c0_3 = arith.constant 0 : index
    %c0_4 = arith.constant 0 : index
    %4 = vector.load %arg3[%c0_3, %c0_4] : memref<512x128xbf16, #tpu.memory_space<vmem>>, vector<512x128xbf16>
    tpu.vector_store %arg3[%c0_3, %c0_4], %3 {strides = array<i32>} : memref<512x128xbf16, #tpu.memory_space<vmem>>, vector<512x128xbf16>,
    %cst_5 = arith.constant dense<0.000000e+00> : vector<128xf32>
    %5 = vector.multi_reduction <add>, %2, %cst_5 [0] : vector<512x128xf32> to vector<128xf32>
    %6 = vector.shape_cast %5 : vector<128xf32> to vector<1x128xf32>
    %7 = arith.mulf %2, %2 : vector<512x128xf32>
    %cst_6 = arith.constant dense<0.000000e+00> : vector<128xf32>
    %8 = vector.multi_reduction <add>, %7, %cst_6 [0] : vector<512x128xf32> to vector<128xf32>
    %9 = vector.shape_cast %8 : vector<128xf32> to vector<1x128xf32>
    %10 = tpu.concatenate %6, %9 in 1 : vector<1x128xf32>, vector<1x128xf32> -> vector<1x256xf32>
    %11 = vector.shape_cast %10 : vector<1x256xf32> to vector<1x1x256xf32>
    %c0_7 = arith.constant 0 : index
    %c0_8 = arith.constant 0 : index
    %c0_9 = arith.constant 0 : index
    %12 = vector.load %arg4[%c0_7, %c0_8, %c0_9] : memref<1x1x256xf32, #tpu.memory_space<vmem>>, vector<1x1x256xf32>
    tpu.vector_store %arg4[%c0_7, %c0_8, %c0_9], %11 {strides = array<i32>} : memref<1x1x256xf32, #tpu.memory_space<vmem>>, vector<1x1x256xf32>,
    return
  }
  func.func @transform_0(%arg0: i32) -> (i32, i32) {
    %c0_i32 = arith.constant 0 : i32
    %c0_i32_0 = arith.constant 0 : i32
    return %arg0, %c0_i32 : i32, i32
  }
  func.func @transform_1(%arg0: i32) -> (i32, i32) {
    %c0_i32 = arith.constant 0 : i32
    %c0_i32_0 = arith.constant 0 : i32
    %c0_i32_1 = arith.constant 0 : i32
    return %c0_i32, %c0_i32_0 : i32, i32
  }
  func.func @transform_2(%arg0: i32) -> (i32, i32) {
    %c0_i32 = arith.constant 0 : i32
    %c0_i32_0 = arith.constant 0 : i32
    return %arg0, %c0_i32 : i32, i32
  }
  func.func @transform_3(%arg0: i32) -> (i32, i32, i32) {
    %c0_i32 = arith.constant 0 : i32
    %c0_i32_0 = arith.constant 0 : i32
    %c0_i32_1 = arith.constant 0 : i32
    return %arg0, %c0_i32, %c0_i32_0 : i32, i32, i32
  }
}

module attributes {stable_mosaic.version = 11 : i64} {
  func.func @affine_relu_mm_stats_kernel(%arg0: i32, %arg1: memref<512x128xbf16, #tpu.memory_space<vmem>>, %arg2: memref<1x128xf32, #tpu.memory_space<vmem>>, %arg3: memref<1x128xf32, #tpu.memory_space<vmem>>, %arg4: memref<128x128xbf16, #tpu.memory_space<vmem>>, %arg5: memref<512x128xbf16, #tpu.memory_space<vmem>>, %arg6: memref<1x1x256xf32, #tpu.memory_space<vmem>>) attributes {dimension_semantics = [#tpu.dimension_semantics<parallel>], iteration_bounds = array<i64: 1>, scalar_prefetch = 0 : i64, scratch_operands = 0 : i64, tpu.core_type = #tpu.core_type<tc>, window_params = [{transform_indices = @transform_0, window_bounds = array<i64: 512, 128>}, {pipeline_mode = #tpu.pipeline_mode<synchronous>, transform_indices = @transform_1, window_bounds = array<i64: 1, 128>}, {pipeline_mode = #tpu.pipeline_mode<synchronous>, transform_indices = @transform_2, window_bounds = array<i64: 1, 128>}, {pipeline_mode = #tpu.pipeline_mode<synchronous>, transform_indices = @transform_3, window_bounds = array<i64: 128, 128>}, {transform_indices = @transform_4, window_bounds = array<i64: 512, 128>}, {transform_indices = @transform_5, window_bounds = array<i64: 1, 1, 256>}]} {
    %c0 = arith.constant 0 : index
    %c0_0 = arith.constant 0 : index
    %0 = vector.load %arg1[%c0, %c0_0] : memref<512x128xbf16, #tpu.memory_space<vmem>>, vector<512x128xbf16>
    %1 = arith.extf %0 : vector<512x128xbf16> to vector<512x128xf32>
    %c0_1 = arith.constant 0 : index
    %c0_2 = arith.constant 0 : index
    %2 = vector.load %arg2[%c0_1, %c0_2] : memref<1x128xf32, #tpu.memory_space<vmem>>, vector<1x128xf32>
    %3 = vector.broadcast %2 : vector<1x128xf32> to vector<512x128xf32>
    %4 = arith.mulf %1, %3 : vector<512x128xf32>
    %c0_3 = arith.constant 0 : index
    %c0_4 = arith.constant 0 : index
    %5 = vector.load %arg3[%c0_3, %c0_4] : memref<1x128xf32, #tpu.memory_space<vmem>>, vector<1x128xf32>
    %6 = vector.broadcast %5 : vector<1x128xf32> to vector<512x128xf32>
    %7 = arith.addf %4, %6 : vector<512x128xf32>
    %cst = arith.constant 0.000000e+00 : f32
    %8 = vector.broadcast %cst : f32 to vector<512x128xf32>
    %9 = arith.maximumf %7, %8 : vector<512x128xf32>
    %10 = arith.truncf %9 : vector<512x128xf32> to vector<512x128xbf16>
    %c0_5 = arith.constant 0 : index
    %c0_6 = arith.constant 0 : index
    %11 = vector.load %arg4[%c0_5, %c0_6] : memref<128x128xbf16, #tpu.memory_space<vmem>>, vector<128x128xbf16>
    %cst_7 = arith.constant dense<0.000000e+00> : vector<512x128xf32>
    %12 = tpu.matmul %10, %11, %cst_7 {dimension_numbers = #tpu.dot_dimension_numbers<[1], [0], [0], [1], [0, 0, 1, 1], [], []>} : vector<512x128xbf16>, vector<128x128xbf16>, vector<512x128xf32> -> vector<512x128xf32>
    %13 = arith.truncf %12 : vector<512x128xf32> to vector<512x128xbf16>
    %c0_8 = arith.constant 0 : index
    %c0_9 = arith.constant 0 : index
    %14 = vector.load %arg5[%c0_8, %c0_9] : memref<512x128xbf16, #tpu.memory_space<vmem>>, vector<512x128xbf16>
    tpu.vector_store %arg5[%c0_8, %c0_9], %13 {strides = array<i32>} : memref<512x128xbf16, #tpu.memory_space<vmem>>, vector<512x128xbf16>,
    %cst_10 = arith.constant dense<0.000000e+00> : vector<128xf32>
    %15 = vector.multi_reduction <add>, %12, %cst_10 [0] : vector<512x128xf32> to vector<128xf32>
    %16 = vector.shape_cast %15 : vector<128xf32> to vector<1x128xf32>
    %17 = arith.mulf %12, %12 : vector<512x128xf32>
    %cst_11 = arith.constant dense<0.000000e+00> : vector<128xf32>
    %18 = vector.multi_reduction <add>, %17, %cst_11 [0] : vector<512x128xf32> to vector<128xf32>
    %19 = vector.shape_cast %18 : vector<128xf32> to vector<1x128xf32>
    %20 = tpu.concatenate %16, %19 in 1 : vector<1x128xf32>, vector<1x128xf32> -> vector<1x256xf32>
    %21 = vector.shape_cast %20 : vector<1x256xf32> to vector<1x1x256xf32>
    %c0_12 = arith.constant 0 : index
    %c0_13 = arith.constant 0 : index
    %c0_14 = arith.constant 0 : index
    %22 = vector.load %arg6[%c0_12, %c0_13, %c0_14] : memref<1x1x256xf32, #tpu.memory_space<vmem>>, vector<1x1x256xf32>
    tpu.vector_store %arg6[%c0_12, %c0_13, %c0_14], %21 {strides = array<i32>} : memref<1x1x256xf32, #tpu.memory_space<vmem>>, vector<1x1x256xf32>,
    return
  }
  func.func @transform_0(%arg0: i32) -> (i32, i32) {
    %c0_i32 = arith.constant 0 : i32
    %c0_i32_0 = arith.constant 0 : i32
    return %arg0, %c0_i32 : i32, i32
  }
  func.func @transform_1(%arg0: i32) -> (i32, i32) {
    %c0_i32 = arith.constant 0 : i32
    %c0_i32_0 = arith.constant 0 : i32
    %c0_i32_1 = arith.constant 0 : i32
    return %c0_i32, %c0_i32_0 : i32, i32
  }
  func.func @transform_2(%arg0: i32) -> (i32, i32) {
    %c0_i32 = arith.constant 0 : i32
    %c0_i32_0 = arith.constant 0 : i32
    %c0_i32_1 = arith.constant 0 : i32
    return %c0_i32, %c0_i32_0 : i32, i32
  }
  func.func @transform_3(%arg0: i32) -> (i32, i32) {
    %c0_i32 = arith.constant 0 : i32
    %c0_i32_0 = arith.constant 0 : i32
    %c0_i32_1 = arith.constant 0 : i32
    return %c0_i32, %c0_i32_0 : i32, i32
  }
  func.func @transform_4(%arg0: i32) -> (i32, i32) {
    %c0_i32 = arith.constant 0 : i32
    %c0_i32_0 = arith.constant 0 : i32
    return %arg0, %c0_i32 : i32, i32
  }
  func.func @transform_5(%arg0: i32) -> (i32, i32, i32) {
    %c0_i32 = arith.constant 0 : i32
    %c0_i32_0 = arith.constant 0 : i32
    %c0_i32_1 = arith.constant 0 : i32
    return %arg0, %c0_i32, %c0_i32_0 : i32, i32, i32
  }
}

module attributes {stable_mosaic.version = 11 : i64} {
  func.func @affine_add_relu_kernel(%arg0: i32, %arg1: memref<512x128xbf16, #tpu.memory_space<vmem>>, %arg2: memref<1x128xf32, #tpu.memory_space<vmem>>, %arg3: memref<1x128xf32, #tpu.memory_space<vmem>>, %arg4: memref<512x128xbf16, #tpu.memory_space<vmem>>, %arg5: memref<512x128xf32, #tpu.memory_space<vmem>>) attributes {dimension_semantics = [#tpu.dimension_semantics<parallel>], iteration_bounds = array<i64: 1>, scalar_prefetch = 0 : i64, scratch_operands = 0 : i64, tpu.core_type = #tpu.core_type<tc>, window_params = [{transform_indices = @transform_0, window_bounds = array<i64: 512, 128>}, {pipeline_mode = #tpu.pipeline_mode<synchronous>, transform_indices = @transform_1, window_bounds = array<i64: 1, 128>}, {pipeline_mode = #tpu.pipeline_mode<synchronous>, transform_indices = @transform_2, window_bounds = array<i64: 1, 128>}, {transform_indices = @transform_3, window_bounds = array<i64: 512, 128>}, {transform_indices = @transform_4, window_bounds = array<i64: 512, 128>}]} {
    %c0 = arith.constant 0 : index
    %c0_0 = arith.constant 0 : index
    %0 = vector.load %arg1[%c0, %c0_0] : memref<512x128xbf16, #tpu.memory_space<vmem>>, vector<512x128xbf16>
    %1 = arith.extf %0 : vector<512x128xbf16> to vector<512x128xf32>
    %c0_1 = arith.constant 0 : index
    %c0_2 = arith.constant 0 : index
    %2 = vector.load %arg2[%c0_1, %c0_2] : memref<1x128xf32, #tpu.memory_space<vmem>>, vector<1x128xf32>
    %3 = vector.broadcast %2 : vector<1x128xf32> to vector<512x128xf32>
    %4 = arith.mulf %1, %3 : vector<512x128xf32>
    %c0_3 = arith.constant 0 : index
    %c0_4 = arith.constant 0 : index
    %5 = vector.load %arg3[%c0_3, %c0_4] : memref<1x128xf32, #tpu.memory_space<vmem>>, vector<1x128xf32>
    %6 = vector.broadcast %5 : vector<1x128xf32> to vector<512x128xf32>
    %7 = arith.addf %4, %6 : vector<512x128xf32>
    %c0_5 = arith.constant 0 : index
    %c0_6 = arith.constant 0 : index
    %8 = vector.load %arg4[%c0_5, %c0_6] : memref<512x128xbf16, #tpu.memory_space<vmem>>, vector<512x128xbf16>
    %9 = arith.extf %8 : vector<512x128xbf16> to vector<512x128xf32>
    %10 = arith.addf %7, %9 : vector<512x128xf32>
    %cst = arith.constant 0.000000e+00 : f32
    %11 = vector.broadcast %cst : f32 to vector<512x128xf32>
    %12 = arith.maximumf %10, %11 : vector<512x128xf32>
    %c0_7 = arith.constant 0 : index
    %c0_8 = arith.constant 0 : index
    %13 = vector.load %arg5[%c0_7, %c0_8] : memref<512x128xf32, #tpu.memory_space<vmem>>, vector<512x128xf32>
    tpu.vector_store %arg5[%c0_7, %c0_8], %12 {strides = array<i32>} : memref<512x128xf32, #tpu.memory_space<vmem>>, vector<512x128xf32>,
    return
  }
  func.func @transform_0(%arg0: i32) -> (i32, i32) {
    %c0_i32 = arith.constant 0 : i32
    %c0_i32_0 = arith.constant 0 : i32
    return %arg0, %c0_i32 : i32, i32
  }
  func.func @transform_1(%arg0: i32) -> (i32, i32) {
    %c0_i32 = arith.constant 0 : i32
    %c0_i32_0 = arith.constant 0 : i32
    %c0_i32_1 = arith.constant 0 : i32
    return %c0_i32, %c0_i32_0 : i32, i32
  }
  func.func @transform_2(%arg0: i32) -> (i32, i32) {
    %c0_i32 = arith.constant 0 : i32
    %c0_i32_0 = arith.constant 0 : i32
    %c0_i32_1 = arith.constant 0 : i32
    return %c0_i32, %c0_i32_0 : i32, i32
  }
  func.func @transform_3(%arg0: i32) -> (i32, i32) {
    %c0_i32 = arith.constant 0 : i32
    %c0_i32_0 = arith.constant 0 : i32
    return %arg0, %c0_i32 : i32, i32
  }
  func.func @transform_4(%arg0: i32) -> (i32, i32) {
    %c0_i32 = arith.constant 0 : i32
    %c0_i32_0 = arith.constant 0 : i32
    return %arg0, %c0_i32 : i32, i32
  }
}

</mosaic_0001>

<bundles_post_ra>
// kernel: bottleneck_forward.7
= control target key start
LH: loop header
LB: loop body
LE: loop exit
PB: predicated region body
PF: predicated region fallthrough
CT: control target
= control target key end

     0   :  { %s1472_s0 = inlined_call_operand.vmem [shape: bf16[512,128], index: 0, kind: input, shape index: {}]   ;;  %s1473_s1 = inlined_call_operand.vmem [shape: f32[1,128], index: 1, kind: input, shape index: {}]   ;;  %s1474_s2 = inlined_call_operand.vmem [shape: f32[1,128], index: 2, kind: input, shape index: {}]   ;;  %s1475_s3 = inlined_call_operand.vmem [shape: bf16[512,128], index: 3, kind: input, shape index: {}]   ;;  %s1476_s4 = inlined_call_operand.vmem [shape: f32[512,128], index: 4, kind: output, shape index: {}]  }
   0x1   :  { %v606_v0 = vld [vmem:[%s1472_s0] sm:$0xff]   ;;  %v861_v8 = vld [vmem:[%s1472_s0 + $0x8] sm:$0xff]   ;;  %v862_v10 = vld [vmem:[%s1472_s0 + $0x10] sm:$0xff]  }
   0x2   :  { %v956_v1 = vld [vmem:[%s1473_s1] ss:$0 sm:$0xff]  ;;  %v607_v2 = vunpack.c.l.bf16 %v606_v0  ;;  %v608_v5 = vunpack.c.h.bf16 %v606_v0  ;;  %v892_v9 = vld [vmem:[%s1475_s3 + $0x8] sm:$0xff]   ;;  %v611_v13 = vunpack.c.l.bf16 %v861_v8  ;;  %v893_v15 = vld [vmem:[%s1475_s3 + $0x10] sm:$0xff]   ;;  %v612_v17 = vunpack.c.h.bf16 %v861_v8 }
   0x3   :  { %v961_v3 = vld [vmem:[%s1474_s2] ss:$0 sm:$0xff]  ;;  %v739_v14 = vunpack.c.l.bf16 %v892_v9  ;;  %v863_v16 = vld [vmem:[%s1472_s0 + $0x18] sm:$0xff]   ;;  %v740_v18 = vunpack.c.h.bf16 %v892_v9  ;;  %v615_v19 = vunpack.c.l.bf16 %v862_v10  ;;  %v743_v20 = vunpack.c.l.bf16 %v893_v15  ;;  %v865_v52 = vld [vmem:[%s1472_s0 + $0x28] sm:$0xff]  }
   0x4   :  { %v734_v4 = vld [vmem:[%s1475_s3] sm:$0xff]   ;;  %v149_v11 = vmul.f32 %v956_v1, %v607_v2  ;;  %v150_v12 = vmul.f32 %v956_v1, %v608_v5  ;;  %v151_v23 = vmul.f32 %v956_v1, %v611_v13  ;;  %v616_v24 = vunpack.c.h.bf16 %v862_v10  ;;  %v894_v25 = vld [vmem:[%s1475_s3 + $0x18] sm:$0xff]   ;;  %v896_v57 = vld [vmem:[%s1475_s3 + $0x28] sm:$0xff]  }
   0x5   :  { %v735_v6 = vunpack.c.l.bf16 %v734_v4  ;;  %v736_v7 = vunpack.c.h.bf16 %v734_v4  ;;  %v152_v26 = vmul.f32 %v956_v1, %v612_v17  ;;  %v153_v27 = vmul.f32 %v956_v1, %v615_v19  ;;  %v864_v38 = vld [vmem:[%s1472_s0 + $0x20] sm:$0xff]   ;;  %v866_v62 = vld [vmem:[%s1472_s0 + $0x30] sm:$0xff]  }
   0x6   :  { %v217_v21 = vadd.f32 %v961_v3, %v149_v11  ;;  %v218_v22 = vadd.f32 %v961_v3, %v150_v12  ;;  %v744_v28 = vunpack.c.h.bf16 %v893_v15  ;;  %v619_v29 = vunpack.c.l.bf16 %v863_v16  ;;  %v895_v47 = vld [vmem:[%s1475_s3 + $0x20] sm:$0xff]   ;;  %v897_v5 = vld [vmem:[%s1475_s3 + $0x30] sm:$0xff]  }
   0x7   :  { %v219_v32 = vadd.f32 %v961_v3, %v151_v23  ;;  %v154_v33 = vmul.f32 %v956_v1, %v616_v24  ;;  %v220_v34 = vadd.f32 %v961_v3, %v152_v26  ;;  %v221_v35 = vadd.f32 %v961_v3, %v153_v27  ;;  %v898_v23 = vld [vmem:[%s1475_s3 + $0x38] sm:$0xff]  }
   0x8   :  { %v409_v30 = vadd.f32 %v735_v6, %v217_v21  ;;  %v410_v31 = vadd.f32 %v736_v7, %v218_v22  ;;  %v155_v36 = vmul.f32 %v956_v1, %v619_v29  ;;  %v747_v37 = vunpack.c.l.bf16 %v894_v25 }
   0x9   :  { %v411_v41 = vadd.f32 %v739_v14, %v219_v32  ;;  %v222_v42 = vadd.f32 %v961_v3, %v154_v33  ;;  %v412_v43 = vadd.f32 %v740_v18, %v220_v34  ;;  %v413_v44 = vadd.f32 %v743_v20, %v221_v35  ;;  %v867_v18 = vld [vmem:[%s1472_s0 + $0x38] sm:$0xff]   ;;  %v868_v32 = vld [vmem:[%s1472_s0 + $0x40] sm:$0xff]  }
   0xa   :  { %v473_v39 = vmax.f32 %v409_v30, 0.0  ;;  %v474_v40 = vmax.f32 %v410_v31, 0.0  ;;  %v223_v45 = vadd.f32 %v961_v3, %v155_v36  ;;  %v620_v46 = vunpack.c.h.bf16 %v863_v16 }
   0xb   :  { %v475_v48 = vmax.f32 %v411_v41, 0.0  ;;  %v414_v49 = vadd.f32 %v744_v28, %v222_v42  ;;  %v748_v50 = vunpack.c.h.bf16 %v894_v25  ;;  %v623_v51 = vunpack.c.l.bf16 %v864_v38 }
   0xc   :  { %537 = vst [vmem:[%s1476_s4] sm:$0xff] %v473_v39  ;;  %v476_v53 = vmax.f32 %v412_v43, 0.0  ;;  %v477_v54 = vmax.f32 %v413_v44, 0.0  ;;  %v415_v55 = vadd.f32 %v747_v37, %v223_v45  ;;  %v156_v56 = vmul.f32 %v956_v1, %v620_v46  ;;  %v899_v37 = vld [vmem:[%s1475_s3 + $0x40] sm:$0xff]   ;;  %v869_v46 = vld [vmem:[%s1472_s0 + $0x48] sm:$0xff]  }
   0xd   :  { %538 = vst [vmem:[%s1476_s4 + $0x8] sm:$0xff] %v474_v40  ;;  %v478_v58 = vmax.f32 %v414_v49, 0.0  ;;  %v157_v59 = vmul.f32 %v956_v1, %v623_v51  ;;  %v751_v60 = vunpack.c.l.bf16 %v895_v47  ;;  %v624_v61 = vunpack.c.h.bf16 %v864_v38 }
   0xe   :  { %539 = vst [vmem:[%s1476_s4 + $0x10] sm:$0xff] %v475_v48  ;;  %v479_v63 = vmax.f32 %v415_v55, 0.0  ;;  %v224_v0 = vadd.f32 %v961_v3, %v156_v56  ;;  %v752_v2 = vunpack.c.h.bf16 %v895_v47  ;;  %v627_v4 = vunpack.c.l.bf16 %v865_v52  ;;  %v900_v47 = vld [vmem:[%s1475_s3 + $0x48] sm:$0xff]   ;;  %v870_v56 = vld [vmem:[%s1472_s0 + $0x50] sm:$0xff]  }
   0xf   :  { %540 = vst [vmem:[%s1476_s4 + $0x18] sm:$0xff] %v476_v53  ;;  %v225_v6 = vadd.f32 %v961_v3, %v157_v59  ;;  %v158_v7 = vmul.f32 %v956_v1, %v624_v61  ;;  %v755_v8 = vunpack.c.l.bf16 %v896_v57  ;;  %v628_v9 = vunpack.c.h.bf16 %v865_v52 }
  0x10   :  { %541 = vst [vmem:[%s1476_s4 + $0x20] sm:$0xff] %v477_v54  ;;  %v416_v10 = vadd.f32 %v748_v50, %v224_v0  ;;  %v159_v11 = vmul.f32 %v956_v1, %v627_v4  ;;  %v756_v12 = vunpack.c.h.bf16 %v896_v57  ;;  %v631_v13 = vunpack.c.l.bf16 %v866_v62 }
  0x11   :  { %542 = vst [vmem:[%s1476_s4 + $0x28] sm:$0xff] %v478_v58  ;;  %v417_v14 = vadd.f32 %v751_v60, %v225_v6  ;;  %v226_v15 = vadd.f32 %v961_v3, %v158_v7  ;;  %v160_v16 = vmul.f32 %v956_v1, %v628_v9  ;;  %v759_v17 = vunpack.c.l.bf16 %v897_v5 }
  0x12   :  { %543 = vst [vmem:[%s1476_s4 + $0x30] sm:$0xff] %v479_v63  ;;  %v480_v19 = vmax.f32 %v416_v10, 0.0  ;;  %v227_v20 = vadd.f32 %v961_v3, %v159_v11  ;;  %v161_v21 = vmul.f32 %v956_v1, %v631_v13  ;;  %v632_v22 = vunpack.c.h.bf16 %v866_v62 }
  0x13   :  { %v481_v24 = vmax.f32 %v417_v14, 0.0  ;;  %v418_v25 = vadd.f32 %v752_v2, %v226_v15  ;;  %v228_v26 = vadd.f32 %v961_v3, %v160_v16  ;;  %v760_v27 = vunpack.c.h.bf16 %v897_v5  ;;  %v901_v2 = vld [vmem:[%s1475_s3 + $0x50] sm:$0xff]  }
  0x14   :  { %544 = vst [vmem:[%s1476_s4 + $0x38] sm:$0xff] %v480_v19  ;;  %v419_v28 = vadd.f32 %v755_v8, %v227_v20  ;;  %v229_v29 = vadd.f32 %v961_v3, %v161_v21  ;;  %v162_v30 = vmul.f32 %v956_v1, %v632_v22  ;;  %v635_v31 = vunpack.c.l.bf16 %v867_v18 }
  0x15   :  { %545 = vst [vmem:[%s1476_s4 + $0x40] sm:$0xff] %v481_v24  ;;  %v482_v33 = vmax.f32 %v418_v25, 0.0  ;;  %v420_v34 = vadd.f32 %v756_v12, %v228_v26  ;;  %v763_v35 = vunpack.c.l.bf16 %v898_v23  ;;  %v636_v36 = vunpack.c.h.bf16 %v867_v18  ;;  %v871_v12 = vld [vmem:[%s1472_s0 + $0x58] sm:$0xff]   ;;  %v872_v26 = vld [vmem:[%s1472_s0 + $0x60] sm:$0xff]  }
  0x16   :  { %v483_v38 = vmax.f32 %v419_v28, 0.0  ;;  %v421_v39 = vadd.f32 %v759_v17, %v229_v29  ;;  %v230_v40 = vadd.f32 %v961_v3, %v162_v30  ;;  %v163_v41 = vmul.f32 %v956_v1, %v635_v31  ;;  %v902_v17 = vld [vmem:[%s1475_s3 + $0x58] sm:$0xff]   ;;  %v903_v31 = vld [vmem:[%s1475_s3 + $0x60] sm:$0xff]  }
  0x17   :  { %546 = vst [vmem:[%s1476_s4 + $0x48] sm:$0xff] %v482_v33  ;;  %v484_v42 = vmax.f32 %v420_v34, 0.0  ;;  %v164_v43 = vmul.f32 %v956_v1, %v636_v36  ;;  %v764_v44 = vunpack.c.h.bf16 %v898_v23  ;;  %v639_v45 = vunpack.c.l.bf16 %v868_v32 }
  0x18   :  { %547 = vst [vmem:[%s1476_s4 + $0x50] sm:$0xff] %v483_v38  ;;  %v485_v48 = vmax.f32 %v421_v39, 0.0  ;;  %v422_v49 = vadd.f32 %v760_v27, %v230_v40  ;;  %v231_v50 = vadd.f32 %v961_v3, %v163_v41  ;;  %v767_v51 = vunpack.c.l.bf16 %v899_v37  ;;  %v873_v40 = vld [vmem:[%s1472_s0 + $0x68] sm:$0xff]  }
  0x19   :  { %548 = vst [vmem:[%s1476_s4 + $0x58] sm:$0xff] %v484_v42  ;;  %v232_v52 = vadd.f32 %v961_v3, %v164_v43  ;;  %v165_v53 = vmul.f32 %v956_v1, %v639_v45  ;;  %v640_v54 = vunpack.c.h.bf16 %v868_v32  ;;  %v768_v55 = vunpack.c.h.bf16 %v899_v37  ;;  %v904_v41 = vld [vmem:[%s1475_s3 + $0x68] sm:$0xff]  }
  0x1a   :  { %549 = vst [vmem:[%s1476_s4 + $0x60] sm:$0xff] %v485_v48  ;;  %v486_v57 = vmax.f32 %v422_v49, 0.0  ;;  %v423_v58 = vadd.f32 %v763_v35, %v231_v50  ;;  %v643_v59 = vunpack.c.l.bf16 %v869_v46  ;;  %v771_v60 = vunpack.c.l.bf16 %v900_v47  ;;  %v874_v50 = vld [vmem:[%s1472_s0 + $0x70] sm:$0xff]  }
  0x1b   :  { %v424_v61 = vadd.f32 %v764_v44, %v232_v52  ;;  %v233_v62 = vadd.f32 %v961_v3, %v165_v53  ;;  %v166_v63 = vmul.f32 %v956_v1, %v640_v54  ;;  %v644_v0 = vunpack.c.h.bf16 %v869_v46 }
  0x1c   :  { %550 = vst [vmem:[%s1476_s4 + $0x68] sm:$0xff] %v486_v57  ;;  %v487_v4 = vmax.f32 %v423_v58, 0.0  ;;  %v167_v5 = vmul.f32 %v956_v1, %v643_v59  ;;  %v772_v6 = vunpack.c.h.bf16 %v900_v47  ;;  %v647_v7 = vunpack.c.l.bf16 %v870_v56  ;;  %v905_v59 = vld [vmem:[%s1475_s3 + $0x70] sm:$0xff]  }
  0x1d   :  { %v488_v8 = vmax.f32 %v424_v61, 0.0  ;;  %v425_v9 = vadd.f32 %v767_v51, %v233_v62  ;;  %v234_v10 = vadd.f32 %v961_v3, %v166_v63  ;;  %v168_v11 = vmul.f32 %v956_v1, %v644_v0 }
  0x1e   :  { %551 = vst [vmem:[%s1476_s4 + $0x70] sm:$0xff] %v487_v4  ;;  %v235_v13 = vadd.f32 %v961_v3, %v167_v5  ;;  %v169_v14 = vmul.f32 %v956_v1, %v647_v7  ;;  %v775_v15 = vunpack.c.l.bf16 %v901_v2  ;;  %v648_v16 = vunpack.c.h.bf16 %v870_v56 }
  0x1f   :  { %552 = vst [vmem:[%s1476_s4 + $0x78] sm:$0xff] %v488_v8  ;;  %v489_v18 = vmax.f32 %v425_v9, 0.0  ;;  %v426_v19 = vadd.f32 %v768_v55, %v234_v10  ;;  %v236_v20 = vadd.f32 %v961_v3, %v168_v11  ;;  %v776_v21 = vunpack.c.h.bf16 %v901_v2  ;;  %v906_v11 = vld [vmem:[%s1475_s3 + $0x78] sm:$0xff]  }
  0x20   :  { %v427_v22 = vadd.f32 %v771_v60, %v235_v13  ;;  %v237_v23 = vadd.f32 %v961_v3, %v169_v14  ;;  %v170_v24 = vmul.f32 %v956_v1, %v648_v16  ;;  %v651_v25 = vunpack.c.l.bf16 %v871_v12 }
  0x21   :  { %553 = vst [vmem:[%s1476_s4 + $0x80] sm:$0xff] %v489_v18  ;;  %v490_v27 = vmax.f32 %v426_v19, 0.0  ;;  %v428_v28 = vadd.f32 %v772_v6, %v236_v20  ;;  %v779_v29 = vunpack.c.l.bf16 %v902_v17  ;;  %v652_v30 = vunpack.c.h.bf16 %v871_v12  ;;  %v875_v6 = vld [vmem:[%s1472_s0 + $0x78] sm:$0xff]   ;;  %v876_v20 = vld [vmem:[%s1472_s0 + $0x80] sm:$0xff]  }
  0x22   :  { %v491_v32 = vmax.f32 %v427_v22, 0.0  ;;  %v429_v33 = vadd.f32 %v775_v15, %v237_v23  ;;  %v238_v34 = vadd.f32 %v961_v3, %v170_v24  ;;  %v171_v35 = vmul.f32 %v956_v1, %v651_v25  ;;  %v907_v25 = vld [vmem:[%s1475_s3 + $0x80] sm:$0xff]  }
  0x23   :  { %554 = vst [vmem:[%s1476_s4 + $0x88] sm:$0xff] %v490_v27  ;;  %v492_v36 = vmax.f32 %v428_v28, 0.0  ;;  %v172_v37 = vmul.f32 %v956_v1, %v652_v30  ;;  %v780_v38 = vunpack.c.h.bf16 %v902_v17  ;;  %v655_v39 = vunpack.c.l.bf16 %v872_v26 }
  0x24   :  { %555 = vst [vmem:[%s1476_s4 + $0x90] sm:$0xff] %v491_v32  ;;  %v493_v42 = vmax.f32 %v429_v33, 0.0  ;;  %v430_v43 = vadd.f32 %v776_v21, %v238_v34  ;;  %v239_v44 = vadd.f32 %v961_v3, %v171_v35  ;;  %v783_v45 = vunpack.c.l.bf16 %v903_v31  ;;  %v877_v34 = vld [vmem:[%s1472_s0 + $0x88] sm:$0xff]  }
  0x25   :  { %556 = vst [vmem:[%s1476_s4 + $0x98] sm:$0xff] %v492_v36  ;;  %v240_v46 = vadd.f32 %v961_v3, %v172_v37  ;;  %v173_v47 = vmul.f32 %v956_v1, %v655_v39  ;;  %v656_v48 = vunpack.c.h.bf16 %v872_v26  ;;  %v784_v49 = vunpack.c.h.bf16 %v903_v31  ;;  %v908_v35 = vld [vmem:[%s1475_s3 + $0x88] sm:$0xff]  }
  0x26   :  { %557 = vst [vmem:[%s1476_s4 + $0xa0] sm:$0xff] %v493_v42  ;;  %v494_v51 = vmax.f32 %v430_v43, 0.0  ;;  %v431_v52 = vadd.f32 %v779_v29, %v239_v44  ;;  %v659_v53 = vunpack.c.l.bf16 %v873_v40  ;;  %v787_v54 = vunpack.c.l.bf16 %v904_v41  ;;  %v878_v44 = vld [vmem:[%s1472_s0 + $0x90] sm:$0xff]  }
  0x27   :  { %v432_v55 = vadd.f32 %v780_v38, %v240_v46  ;;  %v241_v56 = vadd.f32 %v961_v3, %v173_v47  ;;  %v174_v57 = vmul.f32 %v956_v1, %v656_v48  ;;  %v660_v58 = vunpack.c.h.bf16 %v873_v40 }
  0x28   :  { %558 = vst [vmem:[%s1476_s4 + $0xa8] sm:$0xff] %v494_v51  ;;  %v495_v60 = vmax.f32 %v431_v52, 0.0  ;;  %v175_v61 = vmul.f32 %v956_v1, %v659_v53  ;;  %v788_v62 = vunpack.c.h.bf16 %v904_v41  ;;  %v663_v63 = vunpack.c.l.bf16 %v874_v50  ;;  %v909_v53 = vld [vmem:[%s1475_s3 + $0x90] sm:$0xff]  }
  0x29   :  { %v496_v0 = vmax.f32 %v432_v55, 0.0  ;;  %v433_v2 = vadd.f32 %v783_v45, %v241_v56  ;;  %v242_v4 = vadd.f32 %v961_v3, %v174_v57  ;;  %v176_v5 = vmul.f32 %v956_v1, %v660_v58 }
  0x2a   :  { %559 = vst [vmem:[%s1476_s4 + $0xb0] sm:$0xff] %v495_v60  ;;  %v243_v7 = vadd.f32 %v961_v3, %v175_v61  ;;  %v177_v8 = vmul.f32 %v956_v1, %v663_v63  ;;  %v791_v9 = vunpack.c.l.bf16 %v905_v59  ;;  %v664_v10 = vunpack.c.h.bf16 %v874_v50 }
  0x2b   :  { %560 = vst [vmem:[%s1476_s4 + $0xb8] sm:$0xff] %v496_v0  ;;  %v497_v12 = vmax.f32 %v433_v2, 0.0  ;;  %v434_v13 = vadd.f32 %v784_v49, %v242_v4  ;;  %v244_v14 = vadd.f32 %v961_v3, %v176_v5  ;;  %v792_v15 = vunpack.c.h.bf16 %v905_v59  ;;  %v910_v5 = vld [vmem:[%s1475_s3 + $0x98] sm:$0xff]  }
  0x2c   :  { %v435_v16 = vadd.f32 %v787_v54, %v243_v7  ;;  %v245_v17 = vadd.f32 %v961_v3, %v177_v8  ;;  %v178_v18 = vmul.f32 %v956_v1, %v664_v10  ;;  %v667_v19 = vunpack.c.l.bf16 %v875_v6 }
  0x2d   :  { %561 = vst [vmem:[%s1476_s4 + $0xc0] sm:$0xff] %v497_v12  ;;  %v498_v21 = vmax.f32 %v434_v13, 0.0  ;;  %v436_v22 = vadd.f32 %v788_v62, %v244_v14  ;;  %v795_v23 = vunpack.c.l.bf16 %v906_v11  ;;  %v668_v24 = vunpack.c.h.bf16 %v875_v6  ;;  %v879_v62 = vld [vmem:[%s1472_s0 + $0x98] sm:$0xff]   ;;  %v880_v14 = vld [vmem:[%s1472_s0 + $0xa0] sm:$0xff]  }
  0x2e   :  { %v499_v26 = vmax.f32 %v435_v16, 0.0  ;;  %v437_v27 = vadd.f32 %v791_v9, %v245_v17  ;;  %v246_v28 = vadd.f32 %v961_v3, %v178_v18  ;;  %v179_v29 = vmul.f32 %v956_v1, %v667_v19  ;;  %v911_v19 = vld [vmem:[%s1475_s3 + $0xa0] sm:$0xff]  }
  0x2f   :  { %562 = vst [vmem:[%s1476_s4 + $0xc8] sm:$0xff] %v498_v21  ;;  %v500_v30 = vmax.f32 %v436_v22, 0.0  ;;  %v180_v31 = vmul.f32 %v956_v1, %v668_v24  ;;  %v796_v32 = vunpack.c.h.bf16 %v906_v11  ;;  %v671_v33 = vunpack.c.l.bf16 %v876_v20 }
  0x30   :  { %563 = vst [vmem:[%s1476_s4 + $0xd0] sm:$0xff] %v499_v26  ;;  %v501_v36 = vmax.f32 %v437_v27, 0.0  ;;  %v438_v37 = vadd.f32 %v792_v15, %v246_v28  ;;  %v247_v38 = vadd.f32 %v961_v3, %v179_v29  ;;  %v799_v39 = vunpack.c.l.bf16 %v907_v25  ;;  %v881_v28 = vld [vmem:[%s1472_s0 + $0xa8] sm:$0xff]  }
  0x31   :  { %564 = vst [vmem:[%s1476_s4 + $0xd8] sm:$0xff] %v500_v30  ;;  %v248_v40 = vadd.f32 %v961_v3, %v180_v31  ;;  %v181_v41 = vmul.f32 %v956_v1, %v671_v33  ;;  %v672_v42 = vunpack.c.h.bf16 %v876_v20  ;;  %v800_v43 = vunpack.c.h.bf16 %v907_v25  ;;  %v912_v29 = vld [vmem:[%s1475_s3 + $0xa8] sm:$0xff]  }
  0x32   :  { %565 = vst [vmem:[%s1476_s4 + $0xe0] sm:$0xff] %v501_v36  ;;  %v502_v45 = vmax.f32 %v438_v37, 0.0  ;;  %v439_v46 = vadd.f32 %v795_v23, %v247_v38  ;;  %v675_v47 = vunpack.c.l.bf16 %v877_v34  ;;  %v803_v48 = vunpack.c.l.bf16 %v908_v35  ;;  %v882_v38 = vld [vmem:[%s1472_s0 + $0xb0] sm:$0xff]  }
  0x33   :  { %v440_v49 = vadd.f32 %v796_v32, %v248_v40  ;;  %v249_v50 = vadd.f32 %v961_v3, %v181_v41  ;;  %v182_v51 = vmul.f32 %v956_v1, %v672_v42  ;;  %v676_v52 = vunpack.c.h.bf16 %v877_v34 }
  0x34   :  { %566 = vst [vmem:[%s1476_s4 + $0xe8] sm:$0xff] %v502_v45  ;;  %v503_v54 = vmax.f32 %v439_v46, 0.0  ;;  %v183_v55 = vmul.f32 %v956_v1, %v675_v47  ;;  %v804_v56 = vunpack.c.h.bf16 %v908_v35  ;;  %v679_v57 = vunpack.c.l.bf16 %v878_v44  ;;  %v913_v47 = vld [vmem:[%s1475_s3 + $0xb0] sm:$0xff]  }
  0x35   :  { %v504_v58 = vmax.f32 %v440_v49, 0.0  ;;  %v441_v59 = vadd.f32 %v799_v39, %v249_v50  ;;  %v250_v60 = vadd.f32 %v961_v3, %v182_v51  ;;  %v184_v61 = vmul.f32 %v956_v1, %v676_v52 }
  0x36   :  { %567 = vst [vmem:[%s1476_s4 + $0xf0] sm:$0xff] %v503_v54  ;;  %v251_v63 = vadd.f32 %v961_v3, %v183_v55  ;;  %v185_v0 = vmul.f32 %v956_v1, %v679_v57  ;;  %v807_v2 = vunpack.c.l.bf16 %v909_v53  ;;  %v680_v4 = vunpack.c.h.bf16 %v878_v44 }
  0x37   :  { %568 = vst [vmem:[%s1476_s4 + $0xf8] sm:$0xff] %v504_v58  ;;  %v505_v6 = vmax.f32 %v441_v59, 0.0  ;;  %v442_v7 = vadd.f32 %v800_v43, %v250_v60  ;;  %v252_v8 = vadd.f32 %v961_v3, %v184_v61  ;;  %v808_v9 = vunpack.c.h.bf16 %v909_v53  ;;  %v914_v61 = vld [vmem:[%s1475_s3 + $0xb8] sm:$0xff]  }
  0x38   :  { %v443_v10 = vadd.f32 %v803_v48, %v251_v63  ;;  %v253_v11 = vadd.f32 %v961_v3, %v185_v0  ;;  %v186_v12 = vmul.f32 %v956_v1, %v680_v4  ;;  %v683_v13 = vunpack.c.l.bf16 %v879_v62 }
  0x39   :  { %569 = vst [vmem:[%s1476_s4 + $0x100] sm:$0xff] %v505_v6  ;;  %v506_v15 = vmax.f32 %v442_v7, 0.0  ;;  %v444_v16 = vadd.f32 %v804_v56, %v252_v8  ;;  %v811_v17 = vunpack.c.l.bf16 %v910_v5  ;;  %v684_v18 = vunpack.c.h.bf16 %v879_v62  ;;  %v883_v56 = vld [vmem:[%s1472_s0 + $0xb8] sm:$0xff]   ;;  %v884_v8 = vld [vmem:[%s1472_s0 + $0xc0] sm:$0xff]  }
  0x3a   :  { %v507_v20 = vmax.f32 %v443_v10, 0.0  ;;  %v445_v21 = vadd.f32 %v807_v2, %v253_v11  ;;  %v254_v22 = vadd.f32 %v961_v3, %v186_v12  ;;  %v187_v23 = vmul.f32 %v956_v1, %v683_v13  ;;  %v915_v13 = vld [vmem:[%s1475_s3 + $0xc0] sm:$0xff]  }
  0x3b   :  { %570 = vst [vmem:[%s1476_s4 + $0x108] sm:$0xff] %v506_v15  ;;  %v508_v24 = vmax.f32 %v444_v16, 0.0  ;;  %v188_v25 = vmul.f32 %v956_v1, %v684_v18  ;;  %v812_v26 = vunpack.c.h.bf16 %v910_v5  ;;  %v687_v27 = vunpack.c.l.bf16 %v880_v14 }
  0x3c   :  { %571 = vst [vmem:[%s1476_s4 + $0x110] sm:$0xff] %v507_v20  ;;  %v509_v30 = vmax.f32 %v445_v21, 0.0  ;;  %v446_v31 = vadd.f32 %v808_v9, %v254_v22  ;;  %v255_v32 = vadd.f32 %v961_v3, %v187_v23  ;;  %v815_v33 = vunpack.c.l.bf16 %v911_v19  ;;  %v885_v22 = vld [vmem:[%s1472_s0 + $0xc8] sm:$0xff]  }
  0x3d   :  { %572 = vst [vmem:[%s1476_s4 + $0x118] sm:$0xff] %v508_v24  ;;  %v256_v34 = vadd.f32 %v961_v3, %v188_v25  ;;  %v189_v35 = vmul.f32 %v956_v1, %v687_v27  ;;  %v688_v36 = vunpack.c.h.bf16 %v880_v14  ;;  %v816_v37 = vunpack.c.h.bf16 %v911_v19  ;;  %v916_v23 = vld [vmem:[%s1475_s3 + $0xc8] sm:$0xff]  }
  0x3e   :  { %573 = vst [vmem:[%s1476_s4 + $0x120] sm:$0xff] %v509_v30  ;;  %v510_v39 = vmax.f32 %v446_v31, 0.0  ;;  %v447_v40 = vadd.f32 %v811_v17, %v255_v32  ;;  %v691_v41 = vunpack.c.l.bf16 %v881_v28  ;;  %v819_v42 = vunpack.c.l.bf16 %v912_v29  ;;  %v886_v32 = vld [vmem:[%s1472_s0 + $0xd0] sm:$0xff]  }
  0x3f   :  { %v448_v43 = vadd.f32 %v812_v26, %v256_v34  ;;  %v257_v44 = vadd.f32 %v961_v3, %v189_v35  ;;  %v190_v45 = vmul.f32 %v956_v1, %v688_v36  ;;  %v692_v46 = vunpack.c.h.bf16 %v881_v28 }
  0x40   :  { %574 = vst [vmem:[%s1476_s4 + $0x128] sm:$0xff] %v510_v39  ;;  %v511_v48 = vmax.f32 %v447_v40, 0.0  ;;  %v191_v49 = vmul.f32 %v956_v1, %v691_v41  ;;  %v820_v50 = vunpack.c.h.bf16 %v912_v29  ;;  %v695_v51 = vunpack.c.l.bf16 %v882_v38  ;;  %v917_v41 = vld [vmem:[%s1475_s3 + $0xd0] sm:$0xff]  }
  0x41   :  { %v512_v52 = vmax.f32 %v448_v43, 0.0  ;;  %v449_v53 = vadd.f32 %v815_v33, %v257_v44  ;;  %v258_v54 = vadd.f32 %v961_v3, %v190_v45  ;;  %v192_v55 = vmul.f32 %v956_v1, %v692_v46 }
  0x42   :  { %575 = vst [vmem:[%s1476_s4 + $0x130] sm:$0xff] %v511_v48  ;;  %v259_v57 = vadd.f32 %v961_v3, %v191_v49  ;;  %v193_v58 = vmul.f32 %v956_v1, %v695_v51  ;;  %v823_v59 = vunpack.c.l.bf16 %v913_v47  ;;  %v696_v60 = vunpack.c.h.bf16 %v882_v38 }
  0x43   :  { %576 = vst [vmem:[%s1476_s4 + $0x138] sm:$0xff] %v512_v52  ;;  %v513_v62 = vmax.f32 %v449_v53, 0.0  ;;  %v450_v63 = vadd.f32 %v816_v37, %v258_v54  ;;  %v260_v0 = vadd.f32 %v961_v3, %v192_v55  ;;  %v824_v2 = vunpack.c.h.bf16 %v913_v47  ;;  %v918_v55 = vld [vmem:[%s1475_s3 + $0xd8] sm:$0xff]  }
  0x44   :  { %v451_v4 = vadd.f32 %v819_v42, %v259_v57  ;;  %v261_v5 = vadd.f32 %v961_v3, %v193_v58  ;;  %v194_v6 = vmul.f32 %v956_v1, %v696_v60  ;;  %v699_v7 = vunpack.c.l.bf16 %v883_v56 }
  0x45   :  { %577 = vst [vmem:[%s1476_s4 + $0x140] sm:$0xff] %v513_v62  ;;  %v514_v9 = vmax.f32 %v450_v63, 0.0  ;;  %v452_v10 = vadd.f32 %v820_v50, %v260_v0  ;;  %v827_v11 = vunpack.c.l.bf16 %v914_v61  ;;  %v700_v12 = vunpack.c.h.bf16 %v883_v56  ;;  %v887_v50 = vld [vmem:[%s1472_s0 + $0xd8] sm:$0xff]   ;;  %v888_v0 = vld [vmem:[%s1472_s0 + $0xe0] sm:$0xff]  }
  0x46   :  { %v515_v14 = vmax.f32 %v451_v4, 0.0  ;;  %v453_v15 = vadd.f32 %v823_v59, %v261_v5  ;;  %v262_v16 = vadd.f32 %v961_v3, %v194_v6  ;;  %v195_v17 = vmul.f32 %v956_v1, %v699_v7  ;;  %v919_v7 = vld [vmem:[%s1475_s3 + $0xe0] sm:$0xff]  }
  0x47   :  { %578 = vst [vmem:[%s1476_s4 + $0x148] sm:$0xff] %v514_v9  ;;  %v516_v18 = vmax.f32 %v452_v10, 0.0  ;;  %v196_v19 = vmul.f32 %v956_v1, %v700_v12  ;;  %v828_v20 = vunpack.c.h.bf16 %v914_v61  ;;  %v703_v21 = vunpack.c.l.bf16 %v884_v8 }
  0x48   :  { %579 = vst [vmem:[%s1476_s4 + $0x150] sm:$0xff] %v515_v14  ;;  %v517_v24 = vmax.f32 %v453_v15, 0.0  ;;  %v454_v25 = vadd.f32 %v824_v2, %v262_v16  ;;  %v263_v26 = vadd.f32 %v961_v3, %v195_v17  ;;  %v831_v27 = vunpack.c.l.bf16 %v915_v13  ;;  %v889_v16 = vld [vmem:[%s1472_s0 + $0xe8] sm:$0xff]  }
  0x49   :  { %580 = vst [vmem:[%s1476_s4 + $0x158] sm:$0xff] %v516_v18  ;;  %v264_v28 = vadd.f32 %v961_v3, %v196_v19  ;;  %v197_v29 = vmul.f32 %v956_v1, %v703_v21  ;;  %v704_v30 = vunpack.c.h.bf16 %v884_v8  ;;  %v832_v31 = vunpack.c.h.bf16 %v915_v13  ;;  %v920_v17 = vld [vmem:[%s1475_s3 + $0xe8] sm:$0xff]  }
  0x4a   :  { %581 = vst [vmem:[%s1476_s4 + $0x160] sm:$0xff] %v517_v24  ;;  %v518_v33 = vmax.f32 %v454_v25, 0.0  ;;  %v455_v34 = vadd.f32 %v827_v11, %v263_v26  ;;  %v707_v35 = vunpack.c.l.bf16 %v885_v22  ;;  %v835_v36 = vunpack.c.l.bf16 %v916_v23  ;;  %v890_v26 = vld [vmem:[%s1472_s0 + $0xf0] sm:$0xff]  }
  0x4b   :  { %v456_v37 = vadd.f32 %v828_v20, %v264_v28  ;;  %v265_v38 = vadd.f32 %v961_v3, %v197_v29  ;;  %v198_v39 = vmul.f32 %v956_v1, %v704_v30  ;;  %v708_v40 = vunpack.c.h.bf16 %v885_v22 }
  0x4c   :  { %582 = vst [vmem:[%s1476_s4 + $0x168] sm:$0xff] %v518_v33  ;;  %v519_v42 = vmax.f32 %v455_v34, 0.0  ;;  %v199_v43 = vmul.f32 %v956_v1, %v707_v35  ;;  %v836_v44 = vunpack.c.h.bf16 %v916_v23  ;;  %v711_v45 = vunpack.c.l.bf16 %v886_v32  ;;  %v921_v35 = vld [vmem:[%s1475_s3 + $0xf0] sm:$0xff]  }
  0x4d   :  { %v520_v46 = vmax.f32 %v456_v37, 0.0  ;;  %v457_v47 = vadd.f32 %v831_v27, %v265_v38  ;;  %v266_v48 = vadd.f32 %v961_v3, %v198_v39  ;;  %v200_v49 = vmul.f32 %v956_v1, %v708_v40 }
  0x4e   :  { %583 = vst [vmem:[%s1476_s4 + $0x170] sm:$0xff] %v519_v42  ;;  %v267_v51 = vadd.f32 %v961_v3, %v199_v43  ;;  %v201_v52 = vmul.f32 %v956_v1, %v711_v45  ;;  %v839_v53 = vunpack.c.l.bf16 %v917_v41  ;;  %v712_v54 = vunpack.c.h.bf16 %v886_v32 }
  0x4f   :  { %584 = vst [vmem:[%s1476_s4 + $0x178] sm:$0xff] %v520_v46  ;;  %v521_v56 = vmax.f32 %v457_v47, 0.0  ;;  %v458_v57 = vadd.f32 %v832_v31, %v266_v48  ;;  %v268_v58 = vadd.f32 %v961_v3, %v200_v49  ;;  %v840_v59 = vunpack.c.h.bf16 %v917_v41  ;;  %v922_v49 = vld [vmem:[%s1475_s3 + $0xf8] sm:$0xff]  }
  0x50   :  { %v459_v60 = vadd.f32 %v835_v36, %v267_v51  ;;  %v269_v61 = vadd.f32 %v961_v3, %v201_v52  ;;  %v202_v62 = vmul.f32 %v956_v1, %v712_v54  ;;  %v715_v63 = vunpack.c.l.bf16 %v887_v50 }
  0x51   :  { %585 = vst [vmem:[%s1476_s4 + $0x180] sm:$0xff] %v521_v56  ;;  %v522_v2 = vmax.f32 %v458_v57, 0.0  ;;  %v460_v4 = vadd.f32 %v836_v44, %v268_v58  ;;  %v843_v5 = vunpack.c.l.bf16 %v918_v55  ;;  %v716_v6 = vunpack.c.h.bf16 %v887_v50  ;;  %v891_v44 = vld [vmem:[%s1472_s0 + $0xf8] sm:$0xff]  }
  0x52   :  { %v523_v8 = vmax.f32 %v459_v60, 0.0  ;;  %v461_v9 = vadd.f32 %v839_v53, %v269_v61  ;;  %v270_v10 = vadd.f32 %v961_v3, %v202_v62  ;;  %v203_v11 = vmul.f32 %v956_v1, %v715_v63 }
  0x53   :  { %586 = vst [vmem:[%s1476_s4 + $0x188] sm:$0xff] %v522_v2  ;;  %v524_v12 = vmax.f32 %v460_v4, 0.0  ;;  %v204_v13 = vmul.f32 %v956_v1, %v716_v6  ;;  %v844_v14 = vunpack.c.h.bf16 %v918_v55  ;;  %v719_v15 = vunpack.c.l.bf16 %v888_v0 }
  0x54   :  { %587 = vst [vmem:[%s1476_s4 + $0x190] sm:$0xff] %v523_v8  ;;  %v525_v18 = vmax.f32 %v461_v9, 0.0  ;;  %v462_v19 = vadd.f32 %v840_v59, %v270_v10  ;;  %v271_v20 = vadd.f32 %v961_v3, %v203_v11  ;;  %v847_v21 = vunpack.c.l.bf16 %v919_v7 }
  0x55   :  { %588 = vst [vmem:[%s1476_s4 + $0x198] sm:$0xff] %v524_v12  ;;  %v272_v22 = vadd.f32 %v961_v3, %v204_v13  ;;  %v205_v23 = vmul.f32 %v956_v1, %v719_v15  ;;  %v720_v24 = vunpack.c.h.bf16 %v888_v0  ;;  %v848_v25 = vunpack.c.h.bf16 %v919_v7 }
  0x56   :  { %589 = vst [vmem:[%s1476_s4 + $0x1a0] sm:$0xff] %v525_v18  ;;  %v526_v27 = vmax.f32 %v462_v19, 0.0  ;;  %v463_v28 = vadd.f32 %v843_v5, %v271_v20  ;;  %v723_v29 = vunpack.c.l.bf16 %v889_v16  ;;  %v851_v30 = vunpack.c.l.bf16 %v920_v17 }
  0x57   :  { %v464_v31 = vadd.f32 %v844_v14, %v272_v22  ;;  %v273_v32 = vadd.f32 %v961_v3, %v205_v23  ;;  %v206_v33 = vmul.f32 %v956_v1, %v720_v24  ;;  %v724_v34 = vunpack.c.h.bf16 %v889_v16 }
  0x58   :  { %590 = vst [vmem:[%s1476_s4 + $0x1a8] sm:$0xff] %v526_v27  ;;  %v527_v36 = vmax.f32 %v463_v28, 0.0  ;;  %v207_v37 = vmul.f32 %v956_v1, %v723_v29  ;;  %v852_v38 = vunpack.c.h.bf16 %v920_v17  ;;  %v727_v39 = vunpack.c.l.bf16 %v890_v26 }
  0x59   :  { %v528_v40 = vmax.f32 %v464_v31, 0.0  ;;  %v465_v41 = vadd.f32 %v847_v21, %v273_v32  ;;  %v274_v42 = vadd.f32 %v961_v3, %v206_v33  ;;  %v208_v43 = vmul.f32 %v956_v1, %v724_v34 }
  0x5a   :  { %591 = vst [vmem:[%s1476_s4 + $0x1b0] sm:$0xff] %v527_v36  ;;  %v275_v45 = vadd.f32 %v961_v3, %v207_v37  ;;  %v209_v46 = vmul.f32 %v956_v1, %v727_v39  ;;  %v855_v47 = vunpack.c.l.bf16 %v921_v35  ;;  %v728_v48 = vunpack.c.h.bf16 %v890_v26 }
  0x5b   :  { %592 = vst [vmem:[%s1476_s4 + $0x1b8] sm:$0xff] %v528_v40  ;;  %v529_v50 = vmax.f32 %v465_v41, 0.0  ;;  %v466_v51 = vadd.f32 %v848_v25, %v274_v42  ;;  %v276_v52 = vadd.f32 %v961_v3, %v208_v43  ;;  %v856_v53 = vunpack.c.h.bf16 %v921_v35 }
  0x5c   :  { %v467_v54 = vadd.f32 %v851_v30, %v275_v45  ;;  %v277_v55 = vadd.f32 %v961_v3, %v209_v46  ;;  %v210_v56 = vmul.f32 %v956_v1, %v728_v48  ;;  %v731_v57 = vunpack.c.l.bf16 %v891_v44 }
  0x5d   :  { %593 = vst [vmem:[%s1476_s4 + $0x1c0] sm:$0xff] %v529_v50  ;;  %v530_v58 = vmax.f32 %v466_v51, 0.0  ;;  %v468_v59 = vadd.f32 %v852_v38, %v276_v52  ;;  %v859_v60 = vunpack.c.l.bf16 %v922_v49  ;;  %v732_v61 = vunpack.c.h.bf16 %v891_v44 }
  0x5e   :  { %v531_v62 = vmax.f32 %v467_v54, 0.0  ;;  %v469_v63 = vadd.f32 %v855_v47, %v277_v55  ;;  %v278_v0 = vadd.f32 %v961_v3, %v210_v56  ;;  %v211_v2 = vmul.f32 %v956_v1, %v731_v57 }
  0x5f   :  { %594 = vst [vmem:[%s1476_s4 + $0x1c8] sm:$0xff] %v530_v58  ;;  %v532_v4 = vmax.f32 %v468_v59, 0.0  ;;  %v212_v5 = vmul.f32 %v956_v1, %v732_v61  ;;  %v860_v6 = vunpack.c.h.bf16 %v922_v49 }
  0x60   :  { %595 = vst [vmem:[%s1476_s4 + $0x1d0] sm:$0xff] %v531_v62  ;;  %v533_v7 = vmax.f32 %v469_v63, 0.0  ;;  %v470_v8 = vadd.f32 %v856_v53, %v278_v0  ;;  %v279_v9 = vadd.f32 %v961_v3, %v211_v2 }
  0x61   :  { %596 = vst [vmem:[%s1476_s4 + $0x1d8] sm:$0xff] %v532_v4  ;;  %v280_v10 = vadd.f32 %v961_v3, %v212_v5 }
  0x62   :  { %597 = vst [vmem:[%s1476_s4 + $0x1e0] sm:$0xff] %v533_v7  ;;  %v534_v1 = vmax.f32 %v470_v8, 0.0  ;;  %v471_v11 = vadd.f32 %v859_v60, %v279_v9 }
  0x63   :  { %v472_v12 = vadd.f32 %v860_v6, %v280_v10 }
  0x64   :  { %598 = vst [vmem:[%s1476_s4 + $0x1e8] sm:$0xff] %v534_v1  ;;  %v535_v13 = vmax.f32 %v471_v11, 0.0 }
  0x65   :  { %v536_v14 = vmax.f32 %v472_v12, 0.0 }
  0x66   :  { %599 = vst [vmem:[%s1476_s4 + $0x1f0] sm:$0xff] %v535_v13 }
  0x67   :  { %600 = vst [vmem:[%s1476_s4 + $0x1f8] sm:$0xff] %v536_v14 }

// kernel: bottleneck_forward.6
= control target key start
LH: loop header
LB: loop body
LE: loop exit
PB: predicated region body
PF: predicated region fallthrough
CT: control target
= control target key end

     0   :  { %vm945_vm0 = vcmask 1040384   ;;  %s2049_s3 = inlined_call_operand.vmem [shape: bf16[128,128], index: 3, kind: input, shape index: {}]   ;;  %s2050_s1 = inlined_call_operand.vmem [shape: f32[1,128], index: 1, kind: input, shape index: {}]   ;;  %s2051_s2 = inlined_call_operand.vmem [shape: f32[1,128], index: 2, kind: input, shape index: {}]   ;;  %s2052_s0 = inlined_call_operand.vmem [shape: bf16[512,128], index: 0, kind: input, shape index: {}]   ;;  %s2053_s4 = inlined_call_operand.vmem [shape: bf16[512,128], index: 4, kind: output, shape index: {0}]   ;;  %s2054_s5 = inlined_call_operand.vmem [shape: f32[1,1,256], index: 5, kind: output, shape index: {1}]  }
   0x1   :  { %v1000_v0 = vld [vmem:[%s2049_s3 + $0x38] sm:$0xff]  ;;  %v999_v1 = vld [vmem:[%s2049_s3 + $0x30] sm:$0xff]  ;;  %v998_v2 = vld [vmem:[%s2049_s3 + $0x28] sm:$0xff] }
   0x2   :  { %443 = vmatpush.bf16.msra.mxu0 %v1000_v0  ;;  %1351 = vmatpush.bf16.msra.mxu1 %v1000_v0  ;;  %v997_v3 = vld [vmem:[%s2049_s3 + $0x20] sm:$0xff]  ;;  %v996_v8 = vld [vmem:[%s2049_s3 + $0x18] sm:$0xff]  ;;  %v995_v17 = vld [vmem:[%s2049_s3 + $0x10] sm:$0xff] }
   0x3   :  { %1352 = vmatpush.bf16.msra.mxu2 %v1000_v0  ;;  %1353 = vmatpush.bf16.msra.mxu3 %v1000_v0  ;;  %v1002_v4 = vld [vmem:[%s2052_s0] sm:$0xff]   ;;  %v994_v22 = vld [vmem:[%s2049_s3 + $0x8] sm:$0xff]  ;;  %v1290_v47 = vld [vmem:[%s2052_s0 + $0x10] sm:$0xff]  }
   0x4   :  { %v1003_v5 = vunpack.c.l.bf16 %v1002_v4  ;;  %v1004_v6 = vunpack.c.h.bf16 %v1002_v4  ;;  %v1425_v7 = vld [vmem:[%s2050_s1] ss:$0 sm:$0xff]  ;;  %v1289_v25 = vld [vmem:[%s2052_s0 + $0x8] sm:$0xff]   ;;  %v1011_v54 = vunpack.c.l.bf16 %v1290_v47  ;;  %v1012_v55 = vunpack.c.h.bf16 %v1290_v47  ;;  %v1298_v60 = vld [vmem:[%s2052_s0 + $0x50] sm:$0xff]  }
   0x5   :  { %v1296_v9 = vld [vmem:[%s2052_s0 + $0x40] sm:$0xff]   ;;  %v1007_v29 = vunpack.c.l.bf16 %v1289_v25  ;;  %v1008_v30 = vunpack.c.h.bf16 %v1289_v25  ;;  %v1297_v33 = vld [vmem:[%s2052_s0 + $0x48] sm:$0xff]   ;;  %v1043_v63 = vunpack.c.l.bf16 %v1298_v60  ;;  %v1044_v0 = vunpack.c.h.bf16 %v1298_v60 }
   0x6   :  { %444 = vmatpush.bf16.msra.mxu0 %v999_v1  ;;  %1354 = vmatpush.bf16.msra.mxu1 %v999_v1  ;;  %v1035_v10 = vunpack.c.l.bf16 %v1296_v9  ;;  %v1036_v11 = vunpack.c.h.bf16 %v1296_v9  ;;  %v151_v12 = vmul.f32 %v1425_v7, %v1003_v5  ;;  %v152_v13 = vmul.f32 %v1425_v7, %v1004_v6  ;;  %v1438_v14 = vld [vmem:[%s2051_s2] ss:$0 sm:$0xff] }
   0x7   :  { %1355 = vmatpush.bf16.msra.mxu2 %v999_v1  ;;  %1356 = vmatpush.bf16.msra.mxu3 %v999_v1  ;;  %v993_v28 = vld [vmem:[%s2049_s3] sm:$0xff]  ;;  %v1039_v34 = vunpack.c.l.bf16 %v1297_v33  ;;  %v1040_v35 = vunpack.c.h.bf16 %v1297_v33  ;;  %v153_v36 = vmul.f32 %v1425_v7, %v1007_v29  ;;  %v154_v37 = vmul.f32 %v1425_v7, %v1008_v30 }
   0x8   :  { %v167_v15 = vmul.f32 %v1425_v7, %v1035_v10  ;;  %v168_v16 = vmul.f32 %v1425_v7, %v1036_v11  ;;  %v219_v18 = vadd.f32 %v1438_v14, %v151_v12  ;;  %v220_v19 = vadd.f32 %v1438_v14, %v152_v13  ;;  %v1304_v46 = vld [vmem:[%s2052_s0 + $0x80] sm:$0xff]   ;;  %v1305_v13 = vld [vmem:[%s2052_s0 + $0x88] sm:$0xff]  }
   0x9   :  { %v169_v38 = vmul.f32 %v1425_v7, %v1039_v34  ;;  %v170_v39 = vmul.f32 %v1425_v7, %v1040_v35  ;;  %v221_v40 = vadd.f32 %v1438_v14, %v153_v36  ;;  %v222_v41 = vadd.f32 %v1438_v14, %v154_v37  ;;  %v1312_v47 = vld [vmem:[%s2052_s0 + $0xc0] sm:$0xff]  }
   0xa   :  { %445 = vmatpush.bf16.msra.mxu0 %v998_v2  ;;  %1357 = vmatpush.bf16.msra.mxu1 %v998_v2  ;;  %v235_v20 = vadd.f32 %v1438_v14, %v167_v15  ;;  %v236_v21 = vadd.f32 %v1438_v14, %v168_v16  ;;  %v283_v23 = vmax.f32 %v219_v18, 0.0  ;;  %v284_v24 = vmax.f32 %v220_v19, 0.0  ;;  %v1291_v15 = vld [vmem:[%s2052_s0 + $0x18] sm:$0xff]  }
   0xb   :  { %1358 = vmatpush.bf16.msra.mxu2 %v998_v2  ;;  %1359 = vmatpush.bf16.msra.mxu3 %v998_v2  ;;  %v237_v42 = vadd.f32 %v1438_v14, %v169_v38  ;;  %v238_v43 = vadd.f32 %v1438_v14, %v170_v39  ;;  %v285_v44 = vmax.f32 %v221_v40, 0.0  ;;  %v286_v45 = vmax.f32 %v222_v41, 0.0 }
   0xc   :  { %v299_v26 = vmax.f32 %v235_v20, 0.0  ;;  %v300_v27 = vmax.f32 %v236_v21, 0.0  ;;  %v347_v31 = vpack.c.bf16 %v284_v24, %v283_v23  ;;  %v1067_v50 = vunpack.c.l.bf16 %v1304_v46 }
   0xd   :  { %v301_v48 = vmax.f32 %v237_v42, 0.0  ;;  %v302_v49 = vmax.f32 %v238_v43, 0.0  ;;  %v1068_v51 = vunpack.c.h.bf16 %v1304_v46  ;;  %v348_v56 = vpack.c.bf16 %v286_v45, %v285_v44  ;;  %v1306_v46 = vld [vmem:[%s2052_s0 + $0x90] sm:$0xff]  }
   0xe   :  { %446 = vmatpush.bf16.msra.mxu0 %v997_v3  ;;  %1360 = vmatpush.bf16.msra.mxu1 %v997_v3  ;;  %v355_v32 = vpack.c.bf16 %v300_v27, %v299_v26  ;;  %v183_v52 = vmul.f32 %v1425_v7, %v1067_v50  ;;  %v155_v1 = vmul.f32 %v1425_v7, %v1011_v54  ;;  %v1071_v18 = vunpack.c.l.bf16 %v1305_v13 }
   0xf   :  { %1361 = vmatpush.bf16.msra.mxu2 %v997_v3  ;;  %1362 = vmatpush.bf16.msra.mxu3 %v997_v3  ;;  %v184_v53 = vmul.f32 %v1425_v7, %v1068_v51  ;;  %v356_v57 = vpack.c.bf16 %v302_v49, %v301_v48  ;;  %v156_v2 = vmul.f32 %v1425_v7, %v1012_v55  ;;  %v1072_v19 = vunpack.c.h.bf16 %v1305_v13  ;;  %v1292_v48 = vld [vmem:[%s2052_s0 + $0x20] sm:$0xff]  }
  0x10   :  { %v251_v58 = vadd.f32 %v1438_v14, %v183_v52  ;;  %v171_v4 = vmul.f32 %v1425_v7, %v1043_v63  ;;  %v172_v5 = vmul.f32 %v1425_v7, %v1044_v0  ;;  %v223_v6 = vadd.f32 %v1438_v14, %v155_v1  ;;  %v1300_v1 = vld [vmem:[%s2052_s0 + $0x60] sm:$0xff]  }
  0x11   :  { %v252_v59 = vadd.f32 %v1438_v14, %v184_v53  ;;  %v185_v20 = vmul.f32 %v1425_v7, %v1071_v18  ;;  %v186_v21 = vmul.f32 %v1425_v7, %v1072_v19  ;;  %v1016_v23 = vunpack.c.h.bf16 %v1291_v15 }
  0x12   :  { %447 = vmatpush.bf16.msra.mxu0 %v996_v8  ;;  %1363 = vmatpush.bf16.msra.mxu1 %v996_v8  ;;  %v315_v61 = vmax.f32 %v251_v58, 0.0  ;;  %v239_v9 = vadd.f32 %v1438_v14, %v171_v4  ;;  %v240_v10 = vadd.f32 %v1438_v14, %v172_v5  ;;  %v287_v11 = vmax.f32 %v223_v6, 0.0 }
  0x13   :  { %1364 = vmatpush.bf16.msra.mxu2 %v996_v8  ;;  %1365 = vmatpush.bf16.msra.mxu3 %v996_v8  ;;  %v316_v62 = vmax.f32 %v252_v59, 0.0  ;;  %v224_v8 = vadd.f32 %v1438_v14, %v156_v2  ;;  %v253_v26 = vadd.f32 %v1438_v14, %v185_v20  ;;  %v254_v27 = vadd.f32 %v1438_v14, %v186_v21 }
  0x14   :  { %v303_v16 = vmax.f32 %v239_v9, 0.0  ;;  %v158_v34 = vmul.f32 %v1425_v7, %v1016_v23  ;;  %v1075_v49 = vunpack.c.l.bf16 %v1306_v46  ;;  %v1076_v50 = vunpack.c.h.bf16 %v1306_v46 }
  0x15   :  { %v363_v3 = vpack.c.bf16 %v316_v62, %v315_v61  ;;  %v288_v12 = vmax.f32 %v224_v8, 0.0  ;;  %v317_v29 = vmax.f32 %v253_v26, 0.0  ;;  %v318_v30 = vmax.f32 %v254_v27, 0.0  ;;  %v1293_v26 = vld [vmem:[%s2052_s0 + $0x28] sm:$0xff]  }
  0x16   :  { %448 = vmatpush.bf16.msra.mxu0 %v995_v17  ;;  %1366 = vmatpush.bf16.msra.mxu1 %v995_v17  ;;  %v226_v39 = vadd.f32 %v1438_v14, %v158_v34  ;;  %v1099_v51 = vunpack.c.l.bf16 %v1312_v47  ;;  %v1100_v52 = vunpack.c.h.bf16 %v1312_v47  ;;  %v187_v53 = vmul.f32 %v1425_v7, %v1075_v49 }
  0x17   :  { %1367 = vmatpush.bf16.msra.mxu2 %v995_v17  ;;  %1368 = vmatpush.bf16.msra.mxu3 %v995_v17  ;;  %v304_v17 = vmax.f32 %v240_v10, 0.0  ;;  %v349_v24 = vpack.c.bf16 %v288_v12, %v287_v11  ;;  %v364_v35 = vpack.c.bf16 %v318_v30, %v317_v29  ;;  %v188_v54 = vmul.f32 %v1425_v7, %v1076_v50 }
  0x18   :  { %v290_v43 = vmax.f32 %v226_v39, 0.0  ;;  %v199_v55 = vmul.f32 %v1425_v7, %v1099_v51  ;;  %v1019_v58 = vunpack.c.l.bf16 %v1292_v48  ;;  %v1020_v59 = vunpack.c.h.bf16 %v1292_v48 }
  0x19   :  { %v357_v25 = vpack.c.bf16 %v304_v17, %v303_v16  ;;  %v255_v61 = vadd.f32 %v1438_v14, %v187_v53  ;;  %v256_v62 = vadd.f32 %v1438_v14, %v188_v54  ;;  %v1051_v9 = vunpack.c.l.bf16 %v1300_v1 }
  0x1a   :  { %449 = vmatpush.bf16.msra.mxu0 %v994_v22  ;;  %1369 = vmatpush.bf16.msra.mxu1 %v994_v22  ;;  %v267_v63 = vadd.f32 %v1438_v14, %v199_v55  ;;  %v159_v6 = vmul.f32 %v1425_v7, %v1019_v58  ;;  %v160_v8 = vmul.f32 %v1425_v7, %v1020_v59  ;;  %v1052_v10 = vunpack.c.h.bf16 %v1300_v1  ;;  %v1314_v1 = vld [vmem:[%s2052_s0 + $0xd0] sm:$0xff]  }
  0x1b   :  { %1370 = vmatpush.bf16.msra.mxu2 %v994_v22  ;;  %1371 = vmatpush.bf16.msra.mxu3 %v994_v22  ;;  %v1015_v22 = vunpack.c.l.bf16 %v1291_v15  ;;  %v319_v2 = vmax.f32 %v255_v61, 0.0  ;;  %v175_v13 = vmul.f32 %v1425_v7, %v1051_v9 }
  0x1c   :  { %v331_v4 = vmax.f32 %v267_v63, 0.0  ;;  %v176_v15 = vmul.f32 %v1425_v7, %v1052_v10  ;;  %v227_v16 = vadd.f32 %v1438_v14, %v159_v6  ;;  %v228_v17 = vadd.f32 %v1438_v14, %v160_v8 }
  0x1d   :  { %v157_v33 = vmul.f32 %v1425_v7, %v1015_v22  ;;  %v243_v18 = vadd.f32 %v1438_v14, %v175_v13  ;;  %v1108_v6 = vunpack.c.h.bf16 %v1314_v1 }
  0x1e   :  { %450 = vmatpush.bf16.msra.mxu0 %v993_v28  ;;  %1372 = vmatpush.bf16.msra.mxu1 %v993_v28  ;;  %v244_v19 = vadd.f32 %v1438_v14, %v176_v15  ;;  %v291_v20 = vmax.f32 %v227_v16, 0.0  ;;  %v292_v21 = vmax.f32 %v228_v17, 0.0 }
  0x1f   :  { %1373 = vmatpush.bf16.msra.mxu2 %v993_v28  ;;  %1374 = vmatpush.bf16.msra.mxu3 %v993_v28  ;;  %v1299_v28 = vld [vmem:[%s2052_s0 + $0x58] sm:$0xff]   ;;  %v225_v38 = vadd.f32 %v1438_v14, %v157_v33  ;;  %v307_v22 = vmax.f32 %v243_v18, 0.0 }
  0x20   :  { %v308_v23 = vmax.f32 %v244_v19, 0.0 }
  0x21   :  { %451 = vmatmul.bf16.vlgmr.msra.gmra.mxu0 %v347_v31  ;;  %491 = vmatmul.bf16.vlgmr.msra.gmra.mxu1 %v355_v32  ;;  %v1047_v31 = vunpack.c.l.bf16 %v1299_v28  ;;  %v1048_v32 = vunpack.c.h.bf16 %v1299_v28  ;;  %v289_v42 = vmax.f32 %v225_v38, 0.0 }
  0x22   :  { %531 = vmatmul.bf16.vlgmr.msra.gmra.mxu2 %v363_v3  ;;  %v320_v3 = vmax.f32 %v256_v62, 0.0  ;;  %v359_v38 = vpack.c.bf16 %v308_v23, %v307_v22 }
  0x23   :  { %v173_v36 = vmul.f32 %v1425_v7, %v1047_v31  ;;  %v174_v37 = vmul.f32 %v1425_v7, %v1048_v32 }
  0x24   :  { %v365_v11 = vpack.c.bf16 %v320_v3, %v319_v2  ;;  %v1294_v2 = vld [vmem:[%s2052_s0 + $0x30] sm:$0xff]  }
  0x25   :  { %v241_v40 = vadd.f32 %v1438_v14, %v173_v36  ;;  %v242_v41 = vadd.f32 %v1438_v14, %v174_v37  ;;  %v1023_v36 = vunpack.c.l.bf16 %v1293_v26  ;;  %v1024_v37 = vunpack.c.h.bf16 %v1293_v26 }
  0x26   :  { %v1027_v13 = vunpack.c.l.bf16 %v1294_v2  ;;  %v1028_v15 = vunpack.c.h.bf16 %v1294_v2 }
  0x27   :  { %v305_v44 = vmax.f32 %v241_v40, 0.0  ;;  %v306_v45 = vmax.f32 %v242_v41, 0.0  ;;  %v161_v48 = vmul.f32 %v1425_v7, %v1023_v36  ;;  %v162_v49 = vmul.f32 %v1425_v7, %v1024_v37 }
  0x28   :  { %v163_v26 = vmul.f32 %v1425_v7, %v1027_v13 }
  0x29   :  { %v358_v60 = vpack.c.bf16 %v306_v45, %v305_v44 }
  0x31   :  { %456 = vmatmul.bf16.gmra.mxu0 %v348_v56  ;;  %496 = vmatmul.bf16.gmra.mxu1 %v356_v57  ;;  %v200_v56 = vmul.f32 %v1425_v7, %v1100_v52  ;;  %v350_v57 = vpack.c.bf16 %v290_v43, %v289_v42  ;;  %v1301_v43 = vld [vmem:[%s2052_s0 + $0x68] sm:$0xff]  }
  0x32   :  { %536 = vmatmul.bf16.gmra.mxu2 %v364_v35  ;;  %v351_v35 = vpack.c.bf16 %v292_v21, %v291_v20  ;;  %v1055_v50 = vunpack.c.l.bf16 %v1301_v43  ;;  %v1056_v51 = vunpack.c.h.bf16 %v1301_v43  ;;  %v1302_v21 = vld [vmem:[%s2052_s0 + $0x70] sm:$0xff]   ;;  %v1315_v43 = vld [vmem:[%s2052_s0 + $0xd8] sm:$0xff]  }
  0x33   :  { %v268_v0 = vadd.f32 %v1438_v14, %v200_v56  ;;  %v229_v56 = vadd.f32 %v1438_v14, %v161_v48  ;;  %v1112_v48 = vunpack.c.h.bf16 %v1315_v43 }
  0x34   :  { %v177_v54 = vmul.f32 %v1425_v7, %v1055_v50  ;;  %v178_v55 = vmul.f32 %v1425_v7, %v1056_v51 }
  0x35   :  { %v332_v5 = vmax.f32 %v268_v0, 0.0  ;;  %v1308_v0 = vld [vmem:[%s2052_s0 + $0xa0] sm:$0xff]  }
  0x36   :  { %v245_v58 = vadd.f32 %v1438_v14, %v177_v54  ;;  %v246_v59 = vadd.f32 %v1438_v14, %v178_v55  ;;  %v1083_v3 = vunpack.c.l.bf16 %v1308_v0 }
  0x37   :  { %v371_v12 = vpack.c.bf16 %v332_v5, %v331_v4  ;;  %v1084_v4 = vunpack.c.h.bf16 %v1308_v0  ;;  %v1107_v5 = vunpack.c.l.bf16 %v1314_v1 }
  0x38   :  { %v309_v62 = vmax.f32 %v245_v58, 0.0  ;;  %v310_v63 = vmax.f32 %v246_v59, 0.0  ;;  %v191_v8 = vmul.f32 %v1425_v7, %v1083_v3 }
  0x39   :  { %571 = vmatmul.bf16.vlgmr.msra.gmra.mxu3 %v371_v12  ;;  %v192_v9 = vmul.f32 %v1425_v7, %v1084_v4  ;;  %v203_v10 = vmul.f32 %v1425_v7, %v1107_v5 }
  0x3a   :  { %v360_v16 = vpack.c.bf16 %v310_v63, %v309_v62  ;;  %v259_v17 = vadd.f32 %v1438_v14, %v191_v8 }
  0x3b   :  { %v260_v18 = vadd.f32 %v1438_v14, %v192_v9  ;;  %v271_v19 = vadd.f32 %v1438_v14, %v203_v10 }
  0x3c   :  { %v323_v22 = vmax.f32 %v259_v17, 0.0 }
  0x3d   :  { %v324_v23 = vmax.f32 %v260_v18, 0.0 }
  0x41   :  { %461 = vmatmul.bf16.gmra.mxu0 %v349_v24  ;;  %501 = vmatmul.bf16.gmra.mxu1 %v357_v25  ;;  %v1307_v24 = vld [vmem:[%s2052_s0 + $0x98] sm:$0xff]   ;;  %v1313_v25 = vld [vmem:[%s2052_s0 + $0xc8] sm:$0xff]  }
  0x42   :  { %541 = vmatmul.bf16.gmra.mxu2 %v365_v11  ;;  %v1079_v27 = vunpack.c.l.bf16 %v1307_v24  ;;  %v1080_v28 = vunpack.c.h.bf16 %v1307_v24  ;;  %v1103_v29 = vunpack.c.l.bf16 %v1313_v25  ;;  %v1104_v30 = vunpack.c.h.bf16 %v1313_v25 }
  0x43   :  { %v204_v11 = vmul.f32 %v1425_v7, %v1108_v6  ;;  %v335_v24 = vmax.f32 %v271_v19, 0.0 }
  0x44   :  { %v189_v31 = vmul.f32 %v1425_v7, %v1079_v27  ;;  %v190_v32 = vmul.f32 %v1425_v7, %v1080_v28  ;;  %v201_v33 = vmul.f32 %v1425_v7, %v1103_v29  ;;  %v202_v34 = vmul.f32 %v1425_v7, %v1104_v30 }
  0x45   :  { %v272_v20 = vadd.f32 %v1438_v14, %v204_v11  ;;  %v164_v27 = vmul.f32 %v1425_v7, %v1028_v15  ;;  %v1059_v28 = vunpack.c.l.bf16 %v1302_v21  ;;  %v1060_v29 = vunpack.c.h.bf16 %v1302_v21  ;;  %v1316_v21 = vld [vmem:[%s2052_s0 + $0xe0] sm:$0xff]  }
  0x46   :  { %v257_v39 = vadd.f32 %v1438_v14, %v189_v31  ;;  %v258_v40 = vadd.f32 %v1438_v14, %v190_v32  ;;  %v269_v41 = vadd.f32 %v1438_v14, %v201_v33  ;;  %v270_v42 = vadd.f32 %v1438_v14, %v202_v34 }
  0x47   :  { %v336_v25 = vmax.f32 %v272_v20, 0.0  ;;  %v367_v30 = vpack.c.bf16 %v324_v23, %v323_v22  ;;  %v179_v32 = vmul.f32 %v1425_v7, %v1059_v28  ;;  %v180_v33 = vmul.f32 %v1425_v7, %v1060_v29  ;;  %v1310_v20 = vld [vmem:[%s2052_s0 + $0xb0] sm:$0xff]  }
  0x48   :  { %v321_v44 = vmax.f32 %v257_v39, 0.0  ;;  %v322_v45 = vmax.f32 %v258_v40, 0.0  ;;  %v333_v46 = vmax.f32 %v269_v41, 0.0  ;;  %v334_v47 = vmax.f32 %v270_v42, 0.0  ;;  %v1309_v42 = vld [vmem:[%s2052_s0 + $0xa8] sm:$0xff]  }
  0x49   :  { %v373_v31 = vpack.c.bf16 %v336_v25, %v335_v24  ;;  %v231_v34 = vadd.f32 %v1438_v14, %v163_v26  ;;  %v247_v36 = vadd.f32 %v1438_v14, %v179_v32  ;;  %v248_v37 = vadd.f32 %v1438_v14, %v180_v33 }
  0x4a   :  { %v366_v52 = vpack.c.bf16 %v322_v45, %v321_v44  ;;  %v372_v53 = vpack.c.bf16 %v334_v47, %v333_v46  ;;  %v1295_v44 = vld [vmem:[%s2052_s0 + $0x38] sm:$0xff]   ;;  %v1087_v45 = vunpack.c.l.bf16 %v1309_v42  ;;  %v1088_v46 = vunpack.c.h.bf16 %v1309_v42 }
  0x4b   :  { %v311_v40 = vmax.f32 %v247_v36, 0.0  ;;  %v312_v41 = vmax.f32 %v248_v37, 0.0  ;;  %v1111_v47 = vunpack.c.l.bf16 %v1315_v43  ;;  %v1031_v54 = vunpack.c.l.bf16 %v1295_v44  ;;  %v1311_v42 = vld [vmem:[%s2052_s0 + $0xb8] sm:$0xff]   ;;  %v1317_v43 = vld [vmem:[%s2052_s0 + $0xe8] sm:$0xff]  }
  0x4c   :  { %576 = vmatmul.bf16.gmra.mxu3 %v372_v53  ;;  %v194_v50 = vmul.f32 %v1425_v7, %v1088_v46  ;;  %v1032_v55 = vunpack.c.h.bf16 %v1295_v44  ;;  %v1091_v22 = vunpack.c.l.bf16 %v1310_v20  ;;  %v1092_v23 = vunpack.c.h.bf16 %v1310_v20 }
  0x4d   :  { %v205_v51 = vmul.f32 %v1425_v7, %v1111_v47  ;;  %v165_v2 = vmul.f32 %v1425_v7, %v1031_v54  ;;  %v1115_v24 = vunpack.c.l.bf16 %v1316_v21  ;;  %v1116_v25 = vunpack.c.h.bf16 %v1316_v21 }
  0x4e   :  { %v262_v58 = vadd.f32 %v1438_v14, %v194_v50  ;;  %v166_v3 = vmul.f32 %v1425_v7, %v1032_v55  ;;  %v195_v26 = vmul.f32 %v1425_v7, %v1091_v22  ;;  %v1095_v44 = vunpack.c.l.bf16 %v1311_v42 }
  0x4f   :  { %v273_v59 = vadd.f32 %v1438_v14, %v205_v51  ;;  %v233_v11 = vadd.f32 %v1438_v14, %v165_v2  ;;  %v207_v28 = vmul.f32 %v1425_v7, %v1115_v24  ;;  %v208_v29 = vmul.f32 %v1425_v7, %v1116_v25 }
  0x50   :  { %v326_v63 = vmax.f32 %v262_v58, 0.0  ;;  %v263_v32 = vadd.f32 %v1438_v14, %v195_v26  ;;  %v1119_v46 = vunpack.c.l.bf16 %v1317_v43  ;;  %v1120_v47 = vunpack.c.h.bf16 %v1317_v43 }
  0x51   :  { %466 = vmatmul.bf16.gmra.mxu0 %v350_v57  ;;  %506 = vmatmul.bf16.gmra.mxu1 %v358_v60  ;;  %v230_v57 = vadd.f32 %v1438_v14, %v162_v49  ;;  %v293_v60 = vmax.f32 %v229_v56, 0.0  ;;  %v193_v49 = vmul.f32 %v1425_v7, %v1087_v45  ;;  %v361_v56 = vpack.c.bf16 %v312_v41, %v311_v40 }
  0x52   :  { %546 = vmatmul.bf16.gmra.mxu2 %v366_v52  ;;  %v206_v52 = vmul.f32 %v1425_v7, %v1112_v48  ;;  %v337_v0 = vmax.f32 %v273_v59, 0.0  ;;  %v327_v36 = vmax.f32 %v263_v32, 0.0  ;;  %v1096_v45 = vunpack.c.h.bf16 %v1311_v42  ;;  %v1319_v32 = vld [vmem:[%s2052_s0 + $0xf8] sm:$0xff]  }
  0x53   :  { %v294_v61 = vmax.f32 %v230_v57, 0.0  ;;  %v261_v57 = vadd.f32 %v1438_v14, %v193_v49  ;;  %v197_v48 = vmul.f32 %v1425_v7, %v1095_v44  ;;  %v209_v50 = vmul.f32 %v1425_v7, %v1119_v46 }
  0x54   :  { %v198_v49 = vmul.f32 %v1425_v7, %v1096_v45  ;;  %v210_v51 = vmul.f32 %v1425_v7, %v1120_v47 }
  0x55   :  { %v352_v12 = vpack.c.bf16 %v294_v61, %v293_v60  ;;  %v274_v60 = vadd.f32 %v1438_v14, %v206_v52  ;;  %v1303_v61 = vld [vmem:[%s2052_s0 + $0x78] sm:$0xff]   ;;  %v325_v62 = vmax.f32 %v261_v57, 0.0  ;;  %v265_v52 = vadd.f32 %v1438_v14, %v197_v48 }
  0x56   :  { %v1063_v4 = vunpack.c.l.bf16 %v1303_v61  ;;  %v1064_v5 = vunpack.c.h.bf16 %v1303_v61  ;;  %v277_v54 = vadd.f32 %v1438_v14, %v209_v50  ;;  %v278_v55 = vadd.f32 %v1438_v14, %v210_v51 }
  0x57   :  { %v338_v1 = vmax.f32 %v274_v60, 0.0  ;;  %v368_v6 = vpack.c.bf16 %v326_v63, %v325_v62  ;;  %v329_v58 = vmax.f32 %v265_v52, 0.0 }
  0x58   :  { %v181_v9 = vmul.f32 %v1425_v7, %v1063_v4  ;;  %v182_v10 = vmul.f32 %v1425_v7, %v1064_v5  ;;  %v341_v60 = vmax.f32 %v277_v54, 0.0  ;;  %v342_v61 = vmax.f32 %v278_v55, 0.0 }
  0x59   :  { %v374_v8 = vpack.c.bf16 %v338_v1, %v337_v0 }
  0x5a   :  { %v249_v13 = vadd.f32 %v1438_v14, %v181_v9  ;;  %v250_v15 = vadd.f32 %v1438_v14, %v182_v10  ;;  %v376_v63 = vpack.c.bf16 %v342_v61, %v341_v60 }
  0x5c   :  { %581 = vmatmul.bf16.gmra.mxu3 %v373_v31  ;;  %v313_v18 = vmax.f32 %v249_v13, 0.0  ;;  %v314_v19 = vmax.f32 %v250_v15, 0.0 }
  0x5e   :  { %v362_v31 = vpack.c.bf16 %v314_v19, %v313_v18 }
  0x61   :  { %471 = vmatmul.bf16.gmra.mxu0 %v351_v35  ;;  %511 = vmatmul.bf16.gmra.mxu1 %v359_v38  ;;  %v232_v35 = vadd.f32 %v1438_v14, %v164_v27  ;;  %v295_v38 = vmax.f32 %v231_v34, 0.0  ;;  %v196_v27 = vmul.f32 %v1425_v7, %v1092_v23  ;;  %v275_v34 = vadd.f32 %v1438_v14, %v207_v28 }
  0x62   :  { %551 = vmatmul.bf16.gmra.mxu2 %v367_v30 }
  0x63   :  { %v296_v39 = vmax.f32 %v232_v35, 0.0  ;;  %v264_v33 = vadd.f32 %v1438_v14, %v196_v27  ;;  %v276_v35 = vadd.f32 %v1438_v14, %v208_v29 }
  0x65   :  { %v353_v53 = vpack.c.bf16 %v296_v39, %v295_v38  ;;  %v328_v37 = vmax.f32 %v264_v33, 0.0  ;;  %v339_v38 = vmax.f32 %v275_v34, 0.0  ;;  %v340_v39 = vmax.f32 %v276_v35, 0.0 }
  0x66   :  { %v1127_v34 = vunpack.c.l.bf16 %v1319_v32  ;;  %v1128_v35 = vunpack.c.h.bf16 %v1319_v32 }
  0x67   :  { %v369_v40 = vpack.c.bf16 %v328_v37, %v327_v36  ;;  %v375_v41 = vpack.c.bf16 %v340_v39, %v339_v38 }
  0x68   :  { %v213_v36 = vmul.f32 %v1425_v7, %v1127_v34  ;;  %v214_v37 = vmul.f32 %v1425_v7, %v1128_v35 }
  0x6a   :  { %v281_v38 = vadd.f32 %v1438_v14, %v213_v36  ;;  %v282_v39 = vadd.f32 %v1438_v14, %v214_v37 }
  0x6c   :  { %586 = vmatmul.bf16.gmra.mxu3 %v374_v8  ;;  %v1318_v8 = vld [vmem:[%s2052_s0 + $0xf0] sm:$0xff]   ;;  %v345_v45 = vmax.f32 %v281_v38, 0.0  ;;  %v346_v47 = vmax.f32 %v282_v39, 0.0 }
  0x6d   :  { %v1123_v10 = vunpack.c.l.bf16 %v1318_v8 }
  0x71   :  { %476 = vmatmul.bf16.gmra.mxu0 %v352_v12  ;;  %516 = vmatmul.bf16.gmra.mxu1 %v360_v16  ;;  %v234_v12 = vadd.f32 %v1438_v14, %v166_v3  ;;  %v297_v16 = vmax.f32 %v233_v11, 0.0  ;;  %v1124_v11 = vunpack.c.h.bf16 %v1318_v8 }
  0x72   :  { %556 = vmatmul.bf16.gmra.mxu2 %v368_v6 }
  0x73   :  { %v298_v17 = vmax.f32 %v234_v12, 0.0  ;;  %v211_v12 = vmul.f32 %v1425_v7, %v1123_v10  ;;  %v212_v13 = vmul.f32 %v1425_v7, %v1124_v11  ;;  %v378_v7 = vpack.c.bf16 %v346_v47, %v345_v45 }
  0x75   :  { %v354_v30 = vpack.c.bf16 %v298_v17, %v297_v16  ;;  %v279_v15 = vadd.f32 %v1438_v14, %v211_v12  ;;  %v280_v16 = vadd.f32 %v1438_v14, %v212_v13 }
  0x77   :  { %v343_v21 = vmax.f32 %v279_v15, 0.0  ;;  %v344_v22 = vmax.f32 %v280_v16, 0.0 }
  0x79   :  { %v377_v24 = vpack.c.bf16 %v344_v22, %v343_v21 }
  0x7c   :  { %591 = vmatmul.bf16.gmra.mxu3 %v375_v41 }
  0x81   :  { %481 = vmatmul.bf16.gmra.mxu0 %v353_v53  ;;  %521 = vmatmul.bf16.gmra.mxu1 %v361_v56  ;;  %v266_v53 = vadd.f32 %v1438_v14, %v198_v49 }
  0x82   :  { %561 = vmatmul.bf16.gmra.mxu2 %v369_v40 }
  0x83   :  { %v330_v59 = vmax.f32 %v266_v53, 0.0 }
  0x85   :  { %v370_v62 = vpack.c.bf16 %v330_v59, %v329_v58 }
  0x8c   :  { %596 = vmatmul.bf16.gmra.mxu3 %v376_v63 }
  0x91   :  { %486 = vmatmul.bf16.gmra.mxu0 %v354_v30  ;;  %526 = vmatmul.bf16.gmra.mxu1 %v362_v31 }
  0x92   :  { %566 = vmatmul.bf16.gmra.mxu2 %v370_v62 }
  0x9c   :  { %601 = vmatmul.bf16.gmra.mxu3 %v377_v24 }
  0x9e   :  { %v452_v56 = vpop.f32.mrf.mxu0  ;;  %v1651_v57 = vpop.f32.mrf.mxu1 }
  0x9f   :  { %v809_v0 = vmul.f32 %v452_v56, %v452_v56 }
  0xa5   :  { %v1676_v31 = vpop.f32.mrf.mxu2 }
  0xa6   :  { %v454_v1 = vpop.f32.mrf.mxu0  ;;  %v1653_v2 = vpop.f32.mrf.mxu1 }
  0xa7   :  { %v1132_v3 = vpack.c.bf16 %v454_v1, %v452_v56  ;;  %v740_v4 = vadd.f32 %v454_v1, %v452_v56  ;;  %v810_v5 = vmul.f32 %v454_v1, %v454_v1  ;;  %v1172_v6 = vpack.c.bf16 %v1653_v2, %v1651_v57 }
  0xa9   :  { %1133 = vst [vmem:[%s2053_s4] sm:$0xff] %v1132_v3   ;;  %v873_v9 = vadd.f32 %v810_v5, %v809_v0 }
  0xaa   :  { %1327 = vst [vmem:[%s2053_s4 + $0x40] sm:$0xff] %v1172_v6  }
  0xac   :  { %606 = vmatmul.bf16.gmra.mxu3 %v378_v7 }
  0xad   :  { %v1693_v44 = vpop.f32.mrf.mxu2 }
  0xae   :  { %v457_v17 = vpop.f32.mrf.mxu0  ;;  %v1670_v18 = vpop.f32.mrf.mxu1  ;;  %v1212_v46 = vpack.c.bf16 %v1693_v44, %v1676_v31 }
  0xaf   :  { %v741_v19 = vadd.f32 %v740_v4, %v457_v17  ;;  %v811_v20 = vmul.f32 %v457_v17, %v457_v17 }
  0xb0   :  { %1335 = vst [vmem:[%s2053_s4 + $0x80] sm:$0xff] %v1212_v46  }
  0xb1   :  { %v874_v23 = vadd.f32 %v873_v9, %v811_v20 }
  0xb5   :  { %v1706_v53 = vpop.f32.mrf.mxu2 }
  0xb6   :  { %v459_v25 = vpop.f32.mrf.mxu0  ;;  %v1672_v26 = vpop.f32.mrf.mxu1 }
  0xb7   :  { %v1137_v27 = vpack.c.bf16 %v459_v25, %v457_v17  ;;  %v742_v28 = vadd.f32 %v741_v19, %v459_v25  ;;  %v812_v29 = vmul.f32 %v459_v25, %v459_v25  ;;  %v1177_v30 = vpack.c.bf16 %v1672_v26, %v1670_v18 }
  0xb9   :  { %1320 = vst [vmem:[%s2053_s4 + $0x8] sm:$0xff] %v1137_v27   ;;  %v875_v33 = vadd.f32 %v874_v23, %v812_v29 }
  0xba   :  { %1328 = vst [vmem:[%s2053_s4 + $0x48] sm:$0xff] %v1177_v30  }
  0xbc   :  { %v1729_v0 = vpop.f32.mrf.mxu3 }
  0xbd   :  { %v1716_v56 = vpop.f32.mrf.mxu2 }
  0xbe   :  { %v462_v40 = vpop.f32.mrf.mxu0  ;;  %v1691_v41 = vpop.f32.mrf.mxu1  ;;  %v1217_v58 = vpack.c.bf16 %v1716_v56, %v1706_v53 }
  0xbf   :  { %v743_v42 = vadd.f32 %v742_v28, %v462_v40  ;;  %v813_v43 = vmul.f32 %v462_v40, %v462_v40 }
  0xc0   :  { %1336 = vst [vmem:[%s2053_s4 + $0x88] sm:$0xff] %v1217_v58  }
  0xc1   :  { %v1697_v48 = vadd.f32 %v875_v33, %v813_v43 }
  0xc4   :  { %v1741_v5 = vpop.f32.mrf.mxu3 }
  0xc5   :  { %v1727_v63 = vpop.f32.mrf.mxu2  ;;  %v1252_v8 = vpack.c.bf16 %v1741_v5, %v1729_v0 }
  0xc6   :  { %v464_v14 = vpop.f32.mrf.mxu0  ;;  %v1702_v49 = vpop.f32.mrf.mxu1 }
  0xc7   :  { %v1142_v50 = vpack.c.bf16 %v464_v14, %v462_v40  ;;  %v744_v51 = vadd.f32 %v743_v42, %v464_v14  ;;  %v1182_v52 = vpack.c.bf16 %v1702_v49, %v1691_v41  ;;  %1343 = vst [vmem:[%s2053_s4 + $0xc0] sm:$0xff] %v1252_v8   ;;  %v814_v35 = vmul.f32 %v464_v14, %v464_v14 }
  0xc9   :  { %1321 = vst [vmem:[%s2053_s4 + $0x10] sm:$0xff] %v1142_v50   ;;  %v877_v39 = vadd.f32 %v1697_v48, %v814_v35 }
  0xca   :  { %1329 = vst [vmem:[%s2053_s4 + $0x50] sm:$0xff] %v1182_v52  }
  0xcd   :  { %v1739_v4 = vpop.f32.mrf.mxu2 }
  0xce   :  { %v467_v54 = vpop.f32.mrf.mxu0  ;;  %v1714_v55 = vpop.f32.mrf.mxu1  ;;  %v1222_v6 = vpack.c.bf16 %v1739_v4, %v1727_v63 }
  0xcf   :  { %v1759_v15 = vpop.f32.mrf.mxu3  ;;  %v815_v38 = vmul.f32 %v467_v54, %v467_v54  ;;  %v745_v42 = vadd.f32 %v744_v51, %v467_v54 }
  0xd0   :  { %1337 = vst [vmem:[%s2053_s4 + $0x90] sm:$0xff] %v1222_v6  }
  0xd1   :  { %v878_v43 = vadd.f32 %v877_v39, %v815_v38 }
  0xd5   :  { %v1757_v13 = vpop.f32.mrf.mxu2 }
  0xd6   :  { %v469_v59 = vpop.f32.mrf.mxu0  ;;  %v1723_v60 = vpop.f32.mrf.mxu1 }
  0xd7   :  { %v1147_v61 = vpack.c.bf16 %v469_v59, %v467_v54  ;;  %v1187_v62 = vpack.c.bf16 %v1723_v60, %v1714_v55  ;;  %v1771_v20 = vpop.f32.mrf.mxu3  ;;  %v816_v40 = vmul.f32 %v469_v59, %v469_v59  ;;  %v746_v7 = vadd.f32 %v745_v42, %v469_v59 }
  0xd8   :  { %v1257_v22 = vpack.c.bf16 %v1771_v20, %v1759_v15 }
  0xd9   :  { %1322 = vst [vmem:[%s2053_s4 + $0x18] sm:$0xff] %v1147_v61   ;;  %v879_v61 = vadd.f32 %v878_v43, %v816_v40 }
  0xda   :  { %1330 = vst [vmem:[%s2053_s4 + $0x58] sm:$0xff] %v1187_v62  }
  0xdb   :  { %1344 = vst [vmem:[%s2053_s4 + $0xc8] sm:$0xff] %v1257_v22  }
  0xdd   :  { %v1769_v19 = vpop.f32.mrf.mxu2 }
  0xde   :  { %v472_v1 = vpop.f32.mrf.mxu0  ;;  %v1737_v3 = vpop.f32.mrf.mxu1  ;;  %v1227_v21 = vpack.c.bf16 %v1769_v19, %v1757_v13 }
  0xdf   :  { %v1789_v29 = vpop.f32.mrf.mxu3  ;;  %v817_v45 = vmul.f32 %v472_v1, %v472_v1  ;;  %v747_v6 = vadd.f32 %v746_v7, %v472_v1 }
  0xe0   :  { %1338 = vst [vmem:[%s2053_s4 + $0x98] sm:$0xff] %v1227_v21  }
  0xe1   :  { %v880_v48 = vadd.f32 %v879_v61, %v817_v45 }
  0xe5   :  { %v1787_v28 = vpop.f32.mrf.mxu2 }
  0xe6   :  { %v474_v9 = vpop.f32.mrf.mxu0  ;;  %v1753_v10 = vpop.f32.mrf.mxu1 }
  0xe7   :  { %v1152_v11 = vpack.c.bf16 %v474_v9, %v472_v1  ;;  %v1192_v12 = vpack.c.bf16 %v1753_v10, %v1737_v3  ;;  %v1801_v34 = vpop.f32.mrf.mxu3  ;;  %v818_v62 = vmul.f32 %v474_v9, %v474_v9  ;;  %v748_v54 = vadd.f32 %v747_v6, %v474_v9 }
  0xe8   :  { %v1262_v37 = vpack.c.bf16 %v1801_v34, %v1789_v29 }
  0xe9   :  { %1323 = vst [vmem:[%s2053_s4 + $0x20] sm:$0xff] %v1152_v11   ;;  %v881_v59 = vadd.f32 %v880_v48, %v818_v62 }
  0xea   :  { %1331 = vst [vmem:[%s2053_s4 + $0x60] sm:$0xff] %v1192_v12  }
  0xeb   :  { %1345 = vst [vmem:[%s2053_s4 + $0xd0] sm:$0xff] %v1262_v37  }
  0xed   :  { %v1799_v33 = vpop.f32.mrf.mxu2 }
  0xee   :  { %v477_v16 = vpop.f32.mrf.mxu0  ;;  %v1767_v17 = vpop.f32.mrf.mxu1  ;;  %v1232_v36 = vpack.c.bf16 %v1799_v33, %v1787_v28 }
  0xef   :  { %v1820_v58 = vpop.f32.mrf.mxu3  ;;  %v819_v51 = vmul.f32 %v477_v16, %v477_v16  ;;  %v749_v11 = vadd.f32 %v748_v54, %v477_v16 }
  0xf0   :  { %1339 = vst [vmem:[%s2053_s4 + $0xa0] sm:$0xff] %v1232_v36  }
  0xf1   :  { %v882_v12 = vadd.f32 %v881_v59, %v819_v51  ;;  %v826_v59 = vmul.f32 %v1653_v2, %v1653_v2 }
  0xf5   :  { %v1818_v52 = vpop.f32.mrf.mxu2 }
  0xf6   :  { %v479_v23 = vpop.f32.mrf.mxu0  ;;  %v1783_v24 = vpop.f32.mrf.mxu1 }
  0xf7   :  { %v1157_v25 = vpack.c.bf16 %v479_v23, %v477_v16  ;;  %v1197_v27 = vpack.c.bf16 %v1783_v24, %v1767_v17  ;;  %v820_v8 = vmul.f32 %v479_v23, %v479_v23  ;;  %v750_v1 = vadd.f32 %v749_v11, %v479_v23  ;;  %v1832_v35 = vpop.f32.mrf.mxu3 }
  0xf8   :  { %v1267_v9 = vpack.c.bf16 %v1832_v35, %v1820_v58 }
  0xf9   :  { %1324 = vst [vmem:[%s2053_s4 + $0x28] sm:$0xff] %v1157_v25   ;;  %v883_v36 = vadd.f32 %v882_v12, %v820_v8  ;;  %v827_v12 = vmul.f32 %v1670_v18, %v1670_v18 }
  0xfa   :  { %1332 = vst [vmem:[%s2053_s4 + $0x68] sm:$0xff] %v1197_v27  }
  0xfb   :  { %1346 = vst [vmem:[%s2053_s4 + $0xd8] sm:$0xff] %v1267_v9  }
  0xfd   :  { %v1830_v27 = vpop.f32.mrf.mxu2 }
  0xfe   :  { %v482_v30 = vpop.f32.mrf.mxu0  ;;  %v1797_v32 = vpop.f32.mrf.mxu1  ;;  %v1237_v38 = vpack.c.bf16 %v1830_v27, %v1818_v52 }
  0xff   :  { %v821_v21 = vmul.f32 %v482_v30, %v482_v30  ;;  %v751_v39 = vadd.f32 %v750_v1, %v482_v30  ;;  %v1850_v48 = vpop.f32.mrf.mxu3 }
 0x100   :  { %1340 = vst [vmem:[%s2053_s4 + $0xa8] sm:$0xff] %v1237_v38  }
 0x101   :  { %v884_v16 = vadd.f32 %v883_v36, %v821_v21 }
 0x105   :  { %v1848_v6 = vpop.f32.mrf.mxu2 }
 0x106   :  { %v484_v46 = vpop.f32.mrf.mxu0  ;;  %v1814_v47 = vpop.f32.mrf.mxu1 }
 0x107   :  { %v1162_v14 = vpack.c.bf16 %v484_v46, %v482_v30  ;;  %v1202_v50 = vpack.c.bf16 %v1814_v47, %v1797_v32  ;;  %v822_v37 = vmul.f32 %v484_v46, %v484_v46  ;;  %v752_v23 = vadd.f32 %v751_v39, %v484_v46  ;;  %v1872_v38 = vpop.f32.mrf.mxu3 }
 0x108   :  { %v825_v46 = vmul.f32 %v1651_v57, %v1651_v57  ;;  %v1272_v9 = vpack.c.bf16 %v1872_v38, %v1850_v48 }
 0x109   :  { %1325 = vst [vmem:[%s2053_s4 + $0x30] sm:$0xff] %v1162_v14   ;;  %v885_v42 = vadd.f32 %v884_v16, %v822_v37 }
 0x10a   :  { %1333 = vst [vmem:[%s2053_s4 + $0x70] sm:$0xff] %v1202_v50  }
 0x10b   :  { %1347 = vst [vmem:[%s2053_s4 + $0xe0] sm:$0xff] %v1272_v9   ;;  %v838_v9 = vmul.f32 %v1814_v47, %v1814_v47 }
 0x10d   :  { %v1870_v37 = vpop.f32.mrf.mxu2 }
 0x10e   :  { %v487_v22 = vpop.f32.mrf.mxu0  ;;  %v1828_v25 = vpop.f32.mrf.mxu1 }
 0x10f   :  { %v823_v40 = vmul.f32 %v487_v22, %v487_v22  ;;  %v753_v43 = vadd.f32 %v752_v23, %v487_v22 }
 0x111   :  { %v886_v45 = vadd.f32 %v885_v42, %v823_v40  ;;  %v831_v42 = vmul.f32 %v1714_v55, %v1714_v55 }
 0x116   :  { %v489_v7 = vpop.f32.mrf.mxu0  ;;  %v1844_v14 = vpop.f32.mrf.mxu1 }
 0x117   :  { %v1167_v50 = vpack.c.bf16 %v489_v7, %v487_v22  ;;  %v754_v61 = vadd.f32 %v753_v43, %v489_v7  ;;  %v824_v30 = vmul.f32 %v489_v7, %v489_v7  ;;  %v1207_v62 = vpack.c.bf16 %v1844_v14, %v1828_v25 }
 0x119   :  { %1326 = vst [vmem:[%s2053_s4 + $0x38] sm:$0xff] %v1167_v50   ;;  %v755_v51 = vadd.f32 %v754_v61, %v1651_v57  ;;  %v887_v54 = vadd.f32 %v886_v45, %v824_v30  ;;  %v828_v57 = vmul.f32 %v1672_v26, %v1672_v26  ;;  %v832_v45 = vmul.f32 %v1723_v60, %v1723_v60  ;;  %v1896_v61 = vpop.f32.mrf.mxu2 }
 0x11a   :  { %1334 = vst [vmem:[%s2053_s4 + $0x78] sm:$0xff] %v1207_v62   ;;  %v833_v30 = vmul.f32 %v1737_v3, %v1737_v3 }
 0x11b   :  { %v756_v8 = vadd.f32 %v755_v51, %v1653_v2  ;;  %v888_v11 = vadd.f32 %v887_v54, %v825_v46  ;;  %v1242_v2 = vpack.c.bf16 %v1870_v37, %v1848_v6  ;;  %v834_v51 = vmul.f32 %v1753_v10, %v1753_v10 }
 0x11d   :  { %v757_v21 = vadd.f32 %v756_v8, %v1670_v18  ;;  %v889_v22 = vadd.f32 %v888_v11, %v826_v59  ;;  %v829_v18 = vmul.f32 %v1691_v41, %v1691_v41  ;;  %1341 = vst [vmem:[%s2053_s4 + $0xb0] sm:$0xff] %v1242_v2   ;;  %v836_v11 = vmul.f32 %v1783_v24, %v1783_v24 }
 0x11f   :  { %v758_v1 = vadd.f32 %v757_v21, %v1672_v26  ;;  %v890_v36 = vadd.f32 %v889_v22, %v827_v12  ;;  %v830_v26 = vmul.f32 %v1702_v49, %v1702_v49 }
 0x121   :  { %v759_v39 = vadd.f32 %v758_v1, %v1691_v41  ;;  %v891_v16 = vadd.f32 %v890_v36, %v828_v57 }
 0x123   :  { %v760_v40 = vadd.f32 %v759_v39, %v1702_v49  ;;  %v892_v23 = vadd.f32 %v891_v16, %v829_v18  ;;  %v1898_v49 = vpop.f32.mrf.mxu3 }
 0x125   :  { %v893_v43 = vadd.f32 %v892_v23, %v830_v26  ;;  %v761_v41 = vadd.f32 %v760_v40, %v1714_v55  ;;  %v840_v40 = vmul.f32 %v1844_v14, %v1844_v14 }
 0x127   :  { %v762_v7 = vadd.f32 %v761_v41, %v1723_v60  ;;  %v894_v50 = vadd.f32 %v893_v43, %v831_v42  ;;  %v835_v60 = vmul.f32 %v1767_v17, %v1767_v17  ;;  %v842_v41 = vmul.f32 %v1693_v44, %v1693_v44 }
 0x129   :  { %v763_v62 = vadd.f32 %v762_v7, %v1737_v3  ;;  %v895_v46 = vadd.f32 %v894_v50, %v832_v45  ;;  %v1912_v3 = vpop.f32.mrf.mxu2  ;;  %v843_v7 = vmul.f32 %v1706_v53, %v1706_v53 }
 0x12b   :  { %v764_v55 = vadd.f32 %v763_v62, %v1753_v10  ;;  %v896_v54 = vadd.f32 %v895_v46, %v833_v30  ;;  %v1914_v22 = vpop.f32.mrf.mxu3  ;;  %v1247_v10 = vpack.c.bf16 %v1912_v3, %v1896_v61  ;;  %v844_v30 = vmul.f32 %v1716_v56, %v1716_v56 }
 0x12c   :  { %v1277_v57 = vpack.c.bf16 %v1914_v22, %v1898_v49 }
 0x12d   :  { %v765_v59 = vadd.f32 %v764_v55, %v1767_v17  ;;  %v897_v8 = vadd.f32 %v896_v54, %v834_v51  ;;  %v837_v17 = vmul.f32 %v1797_v32, %v1797_v32  ;;  %1342 = vst [vmem:[%s2053_s4 + $0xb8] sm:$0xff] %v1247_v10  }
 0x12e   :  { %1348 = vst [vmem:[%s2053_s4 + $0xe8] sm:$0xff] %v1277_v57   ;;  %v849_v57 = vmul.f32 %v1787_v28, %v1787_v28 }
 0x12f   :  { %v766_v12 = vadd.f32 %v765_v59, %v1783_v24  ;;  %v898_v21 = vadd.f32 %v897_v8, %v835_v60  ;;  %v847_v59 = vmul.f32 %v1757_v13, %v1757_v13 }
 0x131   :  { %v767_v1 = vadd.f32 %v766_v12, %v1797_v32  ;;  %v899_v36 = vadd.f32 %v898_v21, %v836_v11  ;;  %v839_v32 = vmul.f32 %v1828_v25, %v1828_v25 }
 0x133   :  { %v900_v24 = vadd.f32 %v899_v36, %v837_v17  ;;  %v768_v2 = vadd.f32 %v767_v1, %v1814_v47  ;;  %v1938_v23 = vpop.f32.mrf.mxu3  ;;  %v841_v47 = vmul.f32 %v1676_v31, %v1676_v31  ;;  %v850_v17 = vmul.f32 %v1799_v33, %v1799_v33 }
 0x135   :  { %v901_v18 = vadd.f32 %v900_v24, %v838_v9  ;;  %v769_v39 = vadd.f32 %v768_v2, %v1828_v25  ;;  %v851_v24 = vmul.f32 %v1818_v52, %v1818_v52 }
 0x137   :  { %v902_v16 = vadd.f32 %v901_v18, %v839_v32  ;;  %v770_v26 = vadd.f32 %v769_v39, %v1844_v14  ;;  %v852_v18 = vmul.f32 %v1830_v27, %v1830_v27 }
 0x139   :  { %v771_v42 = vadd.f32 %v770_v26, %v1676_v31  ;;  %v903_v43 = vadd.f32 %v902_v16, %v840_v40 }
 0x13b   :  { %v772_v45 = vadd.f32 %v771_v42, %v1693_v44  ;;  %v904_v25 = vadd.f32 %v903_v43, %v841_v47  ;;  %v1952_v31 = vpop.f32.mrf.mxu3  ;;  %v845_v44 = vmul.f32 %v1727_v63, %v1727_v63  ;;  %v855_v43 = vmul.f32 %v1896_v61, %v1896_v61 }
 0x13c   :  { %v1282_v51 = vpack.c.bf16 %v1952_v31, %v1938_v23 }
 0x13d   :  { %v773_v50 = vadd.f32 %v772_v45, %v1706_v53  ;;  %v905_v14 = vadd.f32 %v904_v25, %v842_v41  ;;  %v846_v53 = vmul.f32 %v1739_v4, %v1739_v4  ;;  %v857_v25 = vmul.f32 %v1729_v0, %v1729_v0 }
 0x13e   :  { %1349 = vst [vmem:[%s2053_s4 + $0xf0] sm:$0xff] %v1282_v51  }
 0x13f   :  { %v774_v62 = vadd.f32 %v773_v50, %v1716_v56  ;;  %v906_v46 = vadd.f32 %v905_v14, %v843_v7 }
 0x141   :  { %v775_v55 = vadd.f32 %v774_v62, %v1727_v63  ;;  %v907_v54 = vadd.f32 %v906_v46, %v844_v30  ;;  %v848_v63 = vmul.f32 %v1769_v19, %v1769_v19 }
 0x143   :  { %v776_v56 = vadd.f32 %v775_v55, %v1739_v4  ;;  %v908_v60 = vadd.f32 %v907_v54, %v845_v44  ;;  %v1971_v10 = vpop.f32.mrf.mxu3 }
 0x145   :  { %v909_v8 = vadd.f32 %v908_v60, %v846_v53  ;;  %v777_v11 = vadd.f32 %v776_v56, %v1757_v13 }
 0x147   :  { %v778_v12 = vadd.f32 %v777_v11, %v1769_v19  ;;  %v910_v21 = vadd.f32 %v909_v8, %v847_v59 }
 0x149   :  { %v779_v4 = vadd.f32 %v778_v12, %v1787_v28  ;;  %v911_v1 = vadd.f32 %v910_v21, %v848_v63 }
 0x14b   :  { %v780_v36 = vadd.f32 %v779_v4, %v1799_v33  ;;  %v912_v13 = vadd.f32 %v911_v1, %v849_v57  ;;  %v609_v28 = vpop.f32.mrf.mxu3  ;;  %v853_v33 = vmul.f32 %v1848_v6, %v1848_v6 }
 0x14c   :  { %v1287_v32 = vpack.c.bf16 %v609_v28, %v1971_v10 }
 0x14d   :  { %v781_v19 = vadd.f32 %v780_v36, %v1818_v52  ;;  %v913_v2 = vadd.f32 %v912_v13, %v850_v17  ;;  %v868_v17 = vmul.f32 %v1914_v22, %v1914_v22 }
 0x14e   :  { %1350 = vst [vmem:[%s2053_s4 + $0xf8] sm:$0xff] %v1287_v32   ;;  %v872_v32 = vmul.f32 %v609_v28, %v609_v28 }
 0x14f   :  { %v782_v9 = vadd.f32 %v781_v19, %v1830_v27  ;;  %v914_v39 = vadd.f32 %v913_v2, %v851_v24  ;;  %v854_v27 = vmul.f32 %v1870_v37, %v1870_v37  ;;  %v869_v24 = vmul.f32 %v1938_v23, %v1938_v23 }
 0x150   :  { %v870_v2 = vmul.f32 %v1952_v31, %v1952_v31 }
 0x151   :  { %v915_v16 = vadd.f32 %v914_v39, %v852_v18  ;;  %v783_v26 = vadd.f32 %v782_v9, %v1848_v6  ;;  %v856_v6 = vmul.f32 %v1912_v3, %v1912_v3  ;;  %v871_v18 = vmul.f32 %v1971_v10, %v1971_v10 }
 0x153   :  { %v916_v52 = vadd.f32 %v915_v16, %v853_v33  ;;  %v784_v40 = vadd.f32 %v783_v26, %v1870_v37  ;;  %v858_v37 = vmul.f32 %v1741_v5, %v1741_v5 }
 0x155   :  { %v917_v47 = vadd.f32 %v916_v52, %v854_v27  ;;  %v785_v42 = vadd.f32 %v784_v40, %v1896_v61  ;;  %v859_v61 = vmul.f32 %v1759_v15, %v1759_v15 }
 0x157   :  { %v918_v41 = vadd.f32 %v917_v47, %v855_v43  ;;  %v786_v45 = vadd.f32 %v785_v42, %v1912_v3  ;;  %v860_v3 = vmul.f32 %v1771_v20, %v1771_v20 }
 0x159   :  { %v787_v7 = vadd.f32 %v786_v45, %v1729_v0  ;;  %v919_v50 = vadd.f32 %v918_v41, %v856_v6  ;;  %v861_v0 = vmul.f32 %v1789_v29, %v1789_v29  ;;  %v948_v41 = vlaneseq }
 0x15b   :  { %v788_v14 = vadd.f32 %v787_v7, %v1741_v5  ;;  %v920_v30 = vadd.f32 %v919_v50, %v857_v25  ;;  %v862_v5 = vmul.f32 %v1801_v34, %v1801_v34  ;;  %vm950_vm1 = vcmp.lt.s32.totalorder %v948_v41, 256 }
 0x15d   :  { %v789_v62 = vadd.f32 %v788_v14, %v1759_v15  ;;  %v921_v46 = vadd.f32 %v920_v30, %v858_v37  ;;  %v863_v15 = vmul.f32 %v1820_v58, %v1820_v58 }
 0x15f   :  { %v790_v51 = vadd.f32 %v789_v62, %v1771_v20  ;;  %v922_v44 = vadd.f32 %v921_v46, %v859_v61  ;;  %v864_v20 = vmul.f32 %v1832_v35, %v1832_v35 }
 0x161   :  { %v791_v55 = vadd.f32 %v790_v51, %v1789_v29  ;;  %v923_v54 = vadd.f32 %v922_v44, %v860_v3  ;;  %v865_v29 = vmul.f32 %v1850_v48, %v1850_v48 }
 0x163   :  { %v792_v53 = vadd.f32 %v791_v55, %v1801_v34  ;;  %v924_v56 = vadd.f32 %v923_v54, %v861_v0  ;;  %v866_v34 = vmul.f32 %v1872_v38, %v1872_v38 }
 0x165   :  { %v925_v60 = vadd.f32 %v924_v56, %v862_v5  ;;  %v793_v59 = vadd.f32 %v792_v53, %v1820_v58  ;;  %v867_v58 = vmul.f32 %v1898_v49, %v1898_v49 }
 0x167   :  { %v794_v8 = vadd.f32 %v793_v59, %v1832_v35  ;;  %v926_v11 = vadd.f32 %v925_v60, %v863_v15 }
 0x169   :  { %v795_v63 = vadd.f32 %v794_v8, %v1850_v48  ;;  %v927_v12 = vadd.f32 %v926_v11, %v864_v20 }
 0x16b   :  { %v796_v21 = vadd.f32 %v795_v63, %v1872_v38  ;;  %v928_v57 = vadd.f32 %v927_v12, %v865_v29 }
 0x16d   :  { %v797_v4 = vadd.f32 %v796_v21, %v1898_v49  ;;  %v929_v1 = vadd.f32 %v928_v57, %v866_v34 }
 0x16f   :  { %v798_v35 = vadd.f32 %v797_v4, %v1914_v22  ;;  %v930_v36 = vadd.f32 %v929_v1, %v867_v58 }
 0x171   :  { %v931_v48 = vadd.f32 %v930_v36, %v868_v17  ;;  %v799_v13 = vadd.f32 %v798_v35, %v1938_v23 }
 0x173   :  { %v932_v38 = vadd.f32 %v931_v48, %v869_v24  ;;  %v800_v19 = vadd.f32 %v799_v13, %v1952_v31 }
 0x175   :  { %v933_v49 = vadd.f32 %v932_v38, %v870_v2  ;;  %v801_v9 = vadd.f32 %v800_v19, %v1971_v10 }
 0x177   :  { %v934_v22 = vadd.f32 %v933_v49, %v871_v18  ;;  %v802_v39 = vadd.f32 %v801_v9, %v609_v28 }
 0x179   :  { %v803_v16 = vrot.slane %v802_v39, 4  ;;  %v935_v26 = vadd.f32 %v934_v22, %v872_v32 }
 0x17b   :  { %v804_v33 = vadd.f32 %v803_v16, %v802_v39  ;;  %v936_v52 = vrot.slane %v935_v26, 4 }
 0x17d   :  { %v805_v23 = vrot.slane %v804_v33, 2  ;;  %v937_v40 = vadd.f32 %v936_v52, %v935_v26 }
 0x17f   :  { %v806_v27 = vadd.f32 %v805_v23, %v804_v33  ;;  %v938_v47 = vrot.slane %v937_v40, 2 }
 0x181   :  { %v939_v42 = vadd.f32 %v938_v47, %v937_v40  ;;  %v807_v43 = vrot.slane %v806_v27, 1 }
 0x183   :  { %v940_v31 = vrot.slane %v939_v42, 1  ;;  %v808_v6 = vadd.f32 %v807_v43, %v806_v27 }
 0x185   :  { %v941_v45 = vadd.f32 %v940_v31, %v939_v42 }
 0x187   :  { %v944_v25 = vrot.slane %v941_v45, 7 }
 0x189   :  { %v946_v10 = vsel %vm945_vm0, %v808_v6, %v944_v25 }
 0x18a   :  { %952 = vst.msk [vmem:[%s2054_s5] sm:$0x3] %vm950_vm1, %v946_v10 }

// kernel: bottleneck_forward.4
= control target key start
LH: loop header
LB: loop body
LE: loop exit
PB: predicated region body
PF: predicated region fallthrough
CT: control target
= control target key end

     0   :  { %vm835_vm0 = vcmask 1040384   ;;  %s1790_s1 = inlined_call_operand.vmem [shape: bf16[128,128], index: 1, kind: input, shape index: {}]   ;;  %s1791_s0 = inlined_call_operand.vmem [shape: bf16[512,128], index: 0, kind: input, shape index: {}]   ;;  %s1792_s2 = inlined_call_operand.vmem [shape: bf16[512,128], index: 2, kind: output, shape index: {0}]   ;;  %s1793_s3 = inlined_call_operand.vmem [shape: f32[1,1,256], index: 3, kind: output, shape index: {1}]  }
   0x1   :  { %v1050_v0 = vld [vmem:[%s1790_s1 + $0x38] sm:$0xff]  ;;  %v1049_v1 = vld [vmem:[%s1790_s1 + $0x30] sm:$0xff]  ;;  %v1048_v2 = vld [vmem:[%s1790_s1 + $0x28] sm:$0xff] }
   0x2   :  { %333 = vmatpush.bf16.msra.mxu0 %v1050_v0  ;;  %1242 = vmatpush.bf16.msra.mxu1 %v1050_v0  ;;  %v1047_v3 = vld [vmem:[%s1790_s1 + $0x20] sm:$0xff]  ;;  %v1046_v4 = vld [vmem:[%s1790_s1 + $0x18] sm:$0xff]  ;;  %v1045_v5 = vld [vmem:[%s1790_s1 + $0x10] sm:$0xff] }
   0x3   :  { %1243 = vmatpush.bf16.msra.mxu2 %v1050_v0  ;;  %1244 = vmatpush.bf16.msra.mxu3 %v1050_v0  ;;  %v1044_v6 = vld [vmem:[%s1790_s1 + $0x8] sm:$0xff]  ;;  %v1043_v7 = vld [vmem:[%s1790_s1] sm:$0xff]  ;;  %v1013_v13 = vld [vmem:[%s1791_s0 + $0x10] sm:$0xff] }
   0x4   :  { %v1011_v8 = vld [vmem:[%s1791_s0] sm:$0xff]  ;;  %v1012_v10 = vld [vmem:[%s1791_s0 + $0x8] sm:$0xff]  ;;  %v1021_v14 = vld [vmem:[%s1791_s0 + $0x50] sm:$0xff] }
   0x5   :  { %v1019_v9 = vld [vmem:[%s1791_s0 + $0x40] sm:$0xff]  ;;  %v1020_v11 = vld [vmem:[%s1791_s0 + $0x48] sm:$0xff]  ;;  %v1014_v16 = vld [vmem:[%s1791_s0 + $0x18] sm:$0xff] }
   0x6   :  { %334 = vmatpush.bf16.msra.mxu0 %v1049_v1  ;;  %1245 = vmatpush.bf16.msra.mxu1 %v1049_v1  ;;  %v1027_v12 = vld [vmem:[%s1791_s0 + $0x80] sm:$0xff]  ;;  %v1028_v15 = vld [vmem:[%s1791_s0 + $0x88] sm:$0xff]  ;;  %v1022_v17 = vld [vmem:[%s1791_s0 + $0x58] sm:$0xff] }
   0x7   :  { %1246 = vmatpush.bf16.msra.mxu2 %v1049_v1  ;;  %1247 = vmatpush.bf16.msra.mxu3 %v1049_v1  ;;  %v1029_v18 = vld [vmem:[%s1791_s0 + $0x90] sm:$0xff]  ;;  %v1035_v19 = vld [vmem:[%s1791_s0 + $0xc0] sm:$0xff]  ;;  %v1030_v22 = vld [vmem:[%s1791_s0 + $0x98] sm:$0xff] }
   0x8   :  { %v1015_v20 = vld [vmem:[%s1791_s0 + $0x20] sm:$0xff]  ;;  %v1036_v23 = vld [vmem:[%s1791_s0 + $0xc8] sm:$0xff]  ;;  %v1037_v27 = vld [vmem:[%s1791_s0 + $0xd0] sm:$0xff] }
   0x9   :  { %v1023_v21 = vld [vmem:[%s1791_s0 + $0x60] sm:$0xff]  ;;  %v1016_v24 = vld [vmem:[%s1791_s0 + $0x28] sm:$0xff]  ;;  %v1017_v28 = vld [vmem:[%s1791_s0 + $0x30] sm:$0xff] }
   0xa   :  { %335 = vmatpush.bf16.msra.mxu0 %v1048_v2  ;;  %1248 = vmatpush.bf16.msra.mxu1 %v1048_v2  ;;  %v1024_v25 = vld [vmem:[%s1791_s0 + $0x68] sm:$0xff]  ;;  %v1031_v26 = vld [vmem:[%s1791_s0 + $0xa0] sm:$0xff]  ;;  %v1025_v29 = vld [vmem:[%s1791_s0 + $0x70] sm:$0xff] }
   0xb   :  { %1249 = vmatpush.bf16.msra.mxu2 %v1048_v2  ;;  %1250 = vmatpush.bf16.msra.mxu3 %v1048_v2  ;;  %v1032_v30 = vld [vmem:[%s1791_s0 + $0xa8] sm:$0xff]  ;;  %v1038_v31 = vld [vmem:[%s1791_s0 + $0xd8] sm:$0xff]  ;;  %v1033_v34 = vld [vmem:[%s1791_s0 + $0xb0] sm:$0xff] }
   0xc   :  { %v1018_v32 = vld [vmem:[%s1791_s0 + $0x38] sm:$0xff]  ;;  %v1039_v35 = vld [vmem:[%s1791_s0 + $0xe0] sm:$0xff]  ;;  %v1040_v39 = vld [vmem:[%s1791_s0 + $0xe8] sm:$0xff] }
   0xd   :  { %v1026_v33 = vld [vmem:[%s1791_s0 + $0x78] sm:$0xff]  ;;  %v1041_v53 = vld [vmem:[%s1791_s0 + $0xf0] sm:$0xff] }
   0xe   :  { %336 = vmatpush.bf16.msra.mxu0 %v1047_v3  ;;  %1251 = vmatpush.bf16.msra.mxu1 %v1047_v3  ;;  %v1034_v38 = vld [vmem:[%s1791_s0 + $0xb8] sm:$0xff] }
   0xf   :  { %1252 = vmatpush.bf16.msra.mxu2 %v1047_v3  ;;  %1253 = vmatpush.bf16.msra.mxu3 %v1047_v3 }
  0x12   :  { %337 = vmatpush.bf16.msra.mxu0 %v1046_v4  ;;  %1254 = vmatpush.bf16.msra.mxu1 %v1046_v4 }
  0x13   :  { %1255 = vmatpush.bf16.msra.mxu2 %v1046_v4  ;;  %1256 = vmatpush.bf16.msra.mxu3 %v1046_v4 }
  0x16   :  { %338 = vmatpush.bf16.msra.mxu0 %v1045_v5  ;;  %1257 = vmatpush.bf16.msra.mxu1 %v1045_v5 }
  0x17   :  { %1258 = vmatpush.bf16.msra.mxu2 %v1045_v5  ;;  %1259 = vmatpush.bf16.msra.mxu3 %v1045_v5  ;;  %v1042_v5 = vld [vmem:[%s1791_s0 + $0xf8] sm:$0xff] }
  0x1a   :  { %339 = vmatpush.bf16.msra.mxu0 %v1044_v6  ;;  %1260 = vmatpush.bf16.msra.mxu1 %v1044_v6 }
  0x1b   :  { %1261 = vmatpush.bf16.msra.mxu2 %v1044_v6  ;;  %1262 = vmatpush.bf16.msra.mxu3 %v1044_v6 }
  0x1e   :  { %340 = vmatpush.bf16.msra.mxu0 %v1043_v7  ;;  %1263 = vmatpush.bf16.msra.mxu1 %v1043_v7 }
  0x1f   :  { %1264 = vmatpush.bf16.msra.mxu2 %v1043_v7  ;;  %1265 = vmatpush.bf16.msra.mxu3 %v1043_v7 }
  0x21   :  { %341 = vmatmul.bf16.vlgmr.msra.gmra.mxu0 %v1011_v8  ;;  %381 = vmatmul.bf16.vlgmr.msra.gmra.mxu1 %v1019_v9 }
  0x22   :  { %421 = vmatmul.bf16.vlgmr.msra.gmra.mxu2 %v1027_v12  ;;  %461 = vmatmul.bf16.vlgmr.msra.gmra.mxu3 %v1035_v19 }
  0x31   :  { %346 = vmatmul.bf16.gmra.mxu0 %v1012_v10  ;;  %386 = vmatmul.bf16.gmra.mxu1 %v1020_v11 }
  0x32   :  { %426 = vmatmul.bf16.gmra.mxu2 %v1028_v15  ;;  %466 = vmatmul.bf16.gmra.mxu3 %v1036_v23 }
  0x41   :  { %351 = vmatmul.bf16.gmra.mxu0 %v1013_v13  ;;  %391 = vmatmul.bf16.gmra.mxu1 %v1021_v14 }
  0x42   :  { %431 = vmatmul.bf16.gmra.mxu2 %v1029_v18  ;;  %471 = vmatmul.bf16.gmra.mxu3 %v1037_v27 }
  0x51   :  { %356 = vmatmul.bf16.gmra.mxu0 %v1014_v16  ;;  %396 = vmatmul.bf16.gmra.mxu1 %v1022_v17 }
  0x52   :  { %436 = vmatmul.bf16.gmra.mxu2 %v1030_v22  ;;  %476 = vmatmul.bf16.gmra.mxu3 %v1038_v31 }
  0x61   :  { %361 = vmatmul.bf16.gmra.mxu0 %v1015_v20  ;;  %401 = vmatmul.bf16.gmra.mxu1 %v1023_v21 }
  0x62   :  { %441 = vmatmul.bf16.gmra.mxu2 %v1031_v26  ;;  %481 = vmatmul.bf16.gmra.mxu3 %v1039_v35 }
  0x71   :  { %366 = vmatmul.bf16.gmra.mxu0 %v1016_v24  ;;  %406 = vmatmul.bf16.gmra.mxu1 %v1024_v25 }
  0x72   :  { %446 = vmatmul.bf16.gmra.mxu2 %v1032_v30  ;;  %486 = vmatmul.bf16.gmra.mxu3 %v1040_v39 }
  0x81   :  { %371 = vmatmul.bf16.gmra.mxu0 %v1017_v28  ;;  %411 = vmatmul.bf16.gmra.mxu1 %v1025_v29 }
  0x82   :  { %451 = vmatmul.bf16.gmra.mxu2 %v1033_v34  ;;  %491 = vmatmul.bf16.gmra.mxu3 %v1041_v53 }
  0x91   :  { %376 = vmatmul.bf16.gmra.mxu0 %v1018_v32  ;;  %416 = vmatmul.bf16.gmra.mxu1 %v1026_v33 }
  0x92   :  { %456 = vmatmul.bf16.gmra.mxu2 %v1034_v38  ;;  %496 = vmatmul.bf16.gmra.mxu3 %v1042_v5 }
  0x9e   :  { %v342_v36 = vpop.f32.mrf.mxu0  ;;  %v1394_v37 = vpop.f32.mrf.mxu1 }
  0x9f   :  { %v699_v40 = vmul.f32 %v342_v36, %v342_v36 }
  0xa5   :  { %v1421_v60 = vpop.f32.mrf.mxu2  ;;  %v1470_v21 = vpop.f32.mrf.mxu3 }
  0xa6   :  { %v344_v41 = vpop.f32.mrf.mxu0  ;;  %v1402_v42 = vpop.f32.mrf.mxu1 }
  0xa7   :  { %v1054_v43 = vpack.c.bf16 %v344_v41, %v342_v36  ;;  %v630_v44 = vadd.f32 %v344_v41, %v342_v36  ;;  %v700_v45 = vmul.f32 %v344_v41, %v344_v41  ;;  %v1094_v46 = vpack.c.bf16 %v1402_v42, %v1394_v37 }
  0xa9   :  { %1055 = vst [vmem:[%s1792_s2] sm:$0xff] %v1054_v43   ;;  %v763_v47 = vadd.f32 %v700_v45, %v699_v40 }
  0xaa   :  { %1218 = vst [vmem:[%s1792_s2 + $0x40] sm:$0xff] %v1094_v46  }
  0xad   :  { %v1431_v2 = vpop.f32.mrf.mxu2  ;;  %v1482_v25 = vpop.f32.mrf.mxu3 }
  0xae   :  { %v347_v48 = vpop.f32.mrf.mxu0  ;;  %v1412_v49 = vpop.f32.mrf.mxu1  ;;  %v1134_v3 = vpack.c.bf16 %v1431_v2, %v1421_v60  ;;  %v1174_v27 = vpack.c.bf16 %v1482_v25, %v1470_v21 }
  0xaf   :  { %v631_v50 = vadd.f32 %v630_v44, %v347_v48  ;;  %v701_v51 = vmul.f32 %v347_v48, %v347_v48 }
  0xb0   :  { %1226 = vst [vmem:[%s1792_s2 + $0x80] sm:$0xff] %v1134_v3  }
  0xb1   :  { %v764_v52 = vadd.f32 %v763_v47, %v701_v51  ;;  %1234 = vst [vmem:[%s1792_s2 + $0xc0] sm:$0xff] %v1174_v27  }
  0xb5   :  { %v1447_v11 = vpop.f32.mrf.mxu2  ;;  %v1500_v33 = vpop.f32.mrf.mxu3 }
  0xb6   :  { %v349_v54 = vpop.f32.mrf.mxu0  ;;  %v1417_v55 = vpop.f32.mrf.mxu1 }
  0xb7   :  { %v1059_v56 = vpack.c.bf16 %v349_v54, %v347_v48  ;;  %v632_v57 = vadd.f32 %v631_v50, %v349_v54  ;;  %v702_v58 = vmul.f32 %v349_v54, %v349_v54  ;;  %v1099_v59 = vpack.c.bf16 %v1417_v55, %v1412_v49 }
  0xb9   :  { %1211 = vst [vmem:[%s1792_s2 + $0x8] sm:$0xff] %v1059_v56   ;;  %v765_v61 = vadd.f32 %v764_v52, %v702_v58 }
  0xba   :  { %1219 = vst [vmem:[%s1792_s2 + $0x48] sm:$0xff] %v1099_v59  }
  0xbd   :  { %v1457_v14 = vpop.f32.mrf.mxu2  ;;  %v1512_v38 = vpop.f32.mrf.mxu3 }
  0xbe   :  { %v352_v62 = vpop.f32.mrf.mxu0  ;;  %v1429_v63 = vpop.f32.mrf.mxu1  ;;  %v1139_v15 = vpack.c.bf16 %v1457_v14, %v1447_v11  ;;  %v1179_v40 = vpack.c.bf16 %v1512_v38, %v1500_v33 }
  0xbf   :  { %v633_v0 = vadd.f32 %v632_v57, %v352_v62  ;;  %v703_v1 = vmul.f32 %v352_v62, %v352_v62 }
  0xc0   :  { %1227 = vst [vmem:[%s1792_s2 + $0x88] sm:$0xff] %v1139_v15  }
  0xc1   :  { %v1435_v4 = vadd.f32 %v765_v61, %v703_v1  ;;  %1235 = vst [vmem:[%s1792_s2 + $0xc8] sm:$0xff] %v1179_v40  }
  0xc5   :  { %v1468_v20 = vpop.f32.mrf.mxu2  ;;  %v1530_v47 = vpop.f32.mrf.mxu3 }
  0xc6   :  { %v354_v6 = vpop.f32.mrf.mxu0  ;;  %v1443_v7 = vpop.f32.mrf.mxu1 }
  0xc7   :  { %v1064_v8 = vpack.c.bf16 %v354_v6, %v352_v62  ;;  %v634_v9 = vadd.f32 %v633_v0, %v354_v6  ;;  %v1104_v10 = vpack.c.bf16 %v1443_v7, %v1429_v63  ;;  %v704_v53 = vmul.f32 %v354_v6, %v354_v6 }
  0xc9   :  { %1212 = vst [vmem:[%s1792_s2 + $0x10] sm:$0xff] %v1064_v8   ;;  %v767_v58 = vadd.f32 %v1435_v4, %v704_v53 }
  0xca   :  { %1220 = vst [vmem:[%s1792_s2 + $0x50] sm:$0xff] %v1104_v10  }
  0xcd   :  { %v1480_v24 = vpop.f32.mrf.mxu2  ;;  %v1542_v52 = vpop.f32.mrf.mxu3 }
  0xce   :  { %v357_v12 = vpop.f32.mrf.mxu0  ;;  %v1455_v13 = vpop.f32.mrf.mxu1  ;;  %v1144_v26 = vpack.c.bf16 %v1480_v24, %v1468_v20  ;;  %v1184_v56 = vpack.c.bf16 %v1542_v52, %v1530_v47 }
  0xcf   :  { %v705_v57 = vmul.f32 %v357_v12, %v357_v12  ;;  %v635_v61 = vadd.f32 %v634_v9, %v357_v12 }
  0xd0   :  { %1228 = vst [vmem:[%s1792_s2 + $0x90] sm:$0xff] %v1144_v26  }
  0xd1   :  { %1236 = vst [vmem:[%s1792_s2 + $0xd0] sm:$0xff] %v1184_v56   ;;  %v768_v62 = vadd.f32 %v767_v58, %v705_v57 }
  0xd5   :  { %v1498_v32 = vpop.f32.mrf.mxu2  ;;  %v1561_v15 = vpop.f32.mrf.mxu3 }
  0xd6   :  { %v359_v16 = vpop.f32.mrf.mxu0  ;;  %v1464_v17 = vpop.f32.mrf.mxu1 }
  0xd7   :  { %v1069_v18 = vpack.c.bf16 %v359_v16, %v357_v12  ;;  %v1109_v19 = vpack.c.bf16 %v1464_v17, %v1455_v13  ;;  %v706_v59 = vmul.f32 %v359_v16, %v359_v16  ;;  %v636_v5 = vadd.f32 %v635_v61, %v359_v16 }
  0xd9   :  { %1213 = vst [vmem:[%s1792_s2 + $0x18] sm:$0xff] %v1069_v18   ;;  %v769_v18 = vadd.f32 %v768_v62, %v706_v59 }
  0xda   :  { %1221 = vst [vmem:[%s1792_s2 + $0x58] sm:$0xff] %v1109_v19  }
  0xdd   :  { %v1510_v36 = vpop.f32.mrf.mxu2  ;;  %v1573_v53 = vpop.f32.mrf.mxu3 }
  0xde   :  { %v362_v22 = vpop.f32.mrf.mxu0  ;;  %v1478_v23 = vpop.f32.mrf.mxu1  ;;  %v1149_v39 = vpack.c.bf16 %v1510_v36, %v1498_v32 }
  0xdf   :  { %v707_v0 = vmul.f32 %v362_v22, %v362_v22  ;;  %v637_v26 = vadd.f32 %v636_v5, %v362_v22 }
  0xe0   :  { %1229 = vst [vmem:[%s1792_s2 + $0x98] sm:$0xff] %v1149_v39  }
  0xe1   :  { %v770_v4 = vadd.f32 %v769_v18, %v707_v0 }
  0xe5   :  { %v1528_v46 = vpop.f32.mrf.mxu2 }
  0xe6   :  { %v364_v28 = vpop.f32.mrf.mxu0  ;;  %v1494_v29 = vpop.f32.mrf.mxu1 }
  0xe7   :  { %v1074_v30 = vpack.c.bf16 %v364_v28, %v362_v22  ;;  %v1114_v31 = vpack.c.bf16 %v1494_v29, %v1478_v23  ;;  %v708_v19 = vmul.f32 %v364_v28, %v364_v28  ;;  %v638_v12 = vadd.f32 %v637_v26, %v364_v28 }
  0xe8   :  { %v1189_v28 = vpack.c.bf16 %v1573_v53, %v1561_v15 }
  0xe9   :  { %1214 = vst [vmem:[%s1792_s2 + $0x20] sm:$0xff] %v1074_v30   ;;  %v771_v16 = vadd.f32 %v770_v4, %v708_v19  ;;  %v1591_v4 = vpop.f32.mrf.mxu3 }
  0xea   :  { %1222 = vst [vmem:[%s1792_s2 + $0x60] sm:$0xff] %v1114_v31  }
  0xeb   :  { %1237 = vst [vmem:[%s1792_s2 + $0xd8] sm:$0xff] %v1189_v28  }
  0xed   :  { %v1540_v51 = vpop.f32.mrf.mxu2 }
  0xee   :  { %v367_v34 = vpop.f32.mrf.mxu0  ;;  %v1508_v35 = vpop.f32.mrf.mxu1  ;;  %v1154_v54 = vpack.c.bf16 %v1540_v51, %v1528_v46 }
  0xef   :  { %v709_v9 = vmul.f32 %v367_v34, %v367_v34  ;;  %v639_v30 = vadd.f32 %v638_v12, %v367_v34 }
  0xf0   :  { %1230 = vst [vmem:[%s1792_s2 + $0xa0] sm:$0xff] %v1154_v54  }
  0xf1   :  { %v772_v31 = vadd.f32 %v771_v16, %v709_v9  ;;  %v716_v16 = vmul.f32 %v1402_v42, %v1402_v42 }
  0xf5   :  { %v1559_v10 = vpop.f32.mrf.mxu2 }
  0xf6   :  { %v369_v41 = vpop.f32.mrf.mxu0  ;;  %v1524_v43 = vpop.f32.mrf.mxu1 }
  0xf7   :  { %v1079_v44 = vpack.c.bf16 %v369_v41, %v367_v34  ;;  %v1119_v45 = vpack.c.bf16 %v1524_v43, %v1508_v35  ;;  %v710_v27 = vmul.f32 %v369_v41, %v369_v41  ;;  %v640_v22 = vadd.f32 %v639_v30, %v369_v41 }
  0xf9   :  { %1215 = vst [vmem:[%s1792_s2 + $0x28] sm:$0xff] %v1079_v44   ;;  %v773_v54 = vadd.f32 %v772_v31, %v710_v27  ;;  %v717_v31 = vmul.f32 %v1412_v49, %v1412_v49 }
  0xfa   :  { %1223 = vst [vmem:[%s1792_s2 + $0x68] sm:$0xff] %v1119_v45  }
  0xfd   :  { %v1571_v45 = vpop.f32.mrf.mxu2 }
  0xfe   :  { %v372_v48 = vpop.f32.mrf.mxu0  ;;  %v1538_v50 = vpop.f32.mrf.mxu1  ;;  %v1159_v57 = vpack.c.bf16 %v1571_v45, %v1559_v10 }
  0xff   :  { %v711_v39 = vmul.f32 %v372_v48, %v372_v48  ;;  %v641_v58 = vadd.f32 %v640_v22, %v372_v48 }
 0x100   :  { %1231 = vst [vmem:[%s1792_s2 + $0xa8] sm:$0xff] %v1159_v57   ;;  %v1613_v57 = vpop.f32.mrf.mxu3 }
 0x101   :  { %v774_v34 = vadd.f32 %v773_v54, %v711_v39  ;;  %v1194_v28 = vpack.c.bf16 %v1613_v57, %v1591_v4 }
 0x103   :  { %1238 = vst [vmem:[%s1792_s2 + $0xe0] sm:$0xff] %v1194_v28  }
 0x105   :  { %v1589_v26 = vpop.f32.mrf.mxu2 }
 0x106   :  { %v374_v1 = vpop.f32.mrf.mxu0  ;;  %v1555_v3 = vpop.f32.mrf.mxu1 }
 0x107   :  { %v1084_v6 = vpack.c.bf16 %v374_v1, %v372_v48  ;;  %v1124_v8 = vpack.c.bf16 %v1555_v3, %v1538_v50  ;;  %v712_v56 = vmul.f32 %v374_v1, %v374_v1  ;;  %v642_v41 = vadd.f32 %v641_v58, %v374_v1 }
 0x108   :  { %v715_v1 = vmul.f32 %v1394_v37, %v1394_v37  ;;  %v728_v28 = vmul.f32 %v1555_v3, %v1555_v3 }
 0x109   :  { %1216 = vst [vmem:[%s1792_s2 + $0x30] sm:$0xff] %v1084_v6   ;;  %v775_v61 = vadd.f32 %v774_v34, %v712_v56 }
 0x10a   :  { %1224 = vst [vmem:[%s1792_s2 + $0x70] sm:$0xff] %v1124_v8  }
 0x10d   :  { %v1611_v56 = vpop.f32.mrf.mxu2 }
 0x10e   :  { %v377_v40 = vpop.f32.mrf.mxu0  ;;  %v1569_v44 = vpop.f32.mrf.mxu1 }
 0x10f   :  { %v713_v59 = vmul.f32 %v377_v40, %v377_v40  ;;  %v643_v62 = vadd.f32 %v642_v41, %v377_v40 }
 0x111   :  { %v776_v0 = vadd.f32 %v775_v61, %v713_v59  ;;  %v721_v61 = vmul.f32 %v1455_v13, %v1455_v13 }
 0x116   :  { %v379_v5 = vpop.f32.mrf.mxu0  ;;  %v1585_v6 = vpop.f32.mrf.mxu1 }
 0x117   :  { %v1089_v8 = vpack.c.bf16 %v379_v5, %v377_v40  ;;  %v644_v18 = vadd.f32 %v643_v62, %v379_v5  ;;  %v714_v48 = vmul.f32 %v379_v5, %v379_v5  ;;  %v1129_v19 = vpack.c.bf16 %v1585_v6, %v1569_v44 }
 0x119   :  { %1217 = vst [vmem:[%s1792_s2 + $0x38] sm:$0xff] %v1089_v8   ;;  %v645_v9 = vadd.f32 %v644_v18, %v1394_v37  ;;  %v777_v12 = vadd.f32 %v776_v0, %v714_v48  ;;  %v718_v37 = vmul.f32 %v1417_v55, %v1417_v55  ;;  %v722_v0 = vmul.f32 %v1464_v17, %v1464_v17  ;;  %v1637_v18 = vpop.f32.mrf.mxu2 }
 0x11a   :  { %1225 = vst [vmem:[%s1792_s2 + $0x78] sm:$0xff] %v1129_v19   ;;  %v723_v48 = vmul.f32 %v1478_v23, %v1478_v23 }
 0x11b   :  { %v646_v27 = vadd.f32 %v645_v9, %v1402_v42  ;;  %v778_v30 = vadd.f32 %v777_v12, %v715_v1  ;;  %v1164_v42 = vpack.c.bf16 %v1611_v56, %v1589_v26  ;;  %v724_v9 = vmul.f32 %v1494_v29, %v1494_v29 }
 0x11d   :  { %v647_v39 = vadd.f32 %v646_v27, %v1412_v49  ;;  %v779_v40 = vadd.f32 %v778_v30, %v716_v16  ;;  %v719_v49 = vmul.f32 %v1429_v63, %v1429_v63  ;;  %1232 = vst [vmem:[%s1792_s2 + $0xb0] sm:$0xff] %v1164_v42   ;;  %v726_v30 = vmul.f32 %v1524_v43, %v1524_v43 }
 0x11f   :  { %v648_v22 = vadd.f32 %v647_v39, %v1417_v55  ;;  %v780_v54 = vadd.f32 %v779_v40, %v717_v31  ;;  %v720_v55 = vmul.f32 %v1443_v7, %v1443_v7 }
 0x121   :  { %v649_v58 = vadd.f32 %v648_v22, %v1429_v63  ;;  %v781_v34 = vadd.f32 %v780_v54, %v718_v37 }
 0x123   :  { %v650_v59 = vadd.f32 %v649_v58, %v1443_v7  ;;  %v782_v41 = vadd.f32 %v781_v34, %v719_v49  ;;  %v1639_v7 = vpop.f32.mrf.mxu3 }
 0x125   :  { %v783_v62 = vadd.f32 %v782_v41, %v720_v55  ;;  %v651_v63 = vadd.f32 %v650_v59, %v1455_v13  ;;  %v730_v59 = vmul.f32 %v1585_v6, %v1585_v6 }
 0x127   :  { %v652_v5 = vadd.f32 %v651_v63, %v1464_v17  ;;  %v784_v8 = vadd.f32 %v783_v62, %v721_v61  ;;  %v725_v17 = vmul.f32 %v1508_v35, %v1508_v35  ;;  %v732_v63 = vmul.f32 %v1431_v2, %v1431_v2 }
 0x129   :  { %v653_v19 = vadd.f32 %v652_v5, %v1478_v23  ;;  %v785_v1 = vadd.f32 %v784_v8, %v722_v0  ;;  %v1653_v23 = vpop.f32.mrf.mxu2  ;;  %v733_v5 = vmul.f32 %v1447_v11, %v1447_v11 }
 0x12b   :  { %v654_v13 = vadd.f32 %v653_v19, %v1494_v29  ;;  %v786_v12 = vadd.f32 %v785_v1, %v723_v48  ;;  %v1655_v40 = vpop.f32.mrf.mxu3  ;;  %v1169_v29 = vpack.c.bf16 %v1653_v23, %v1637_v18  ;;  %v734_v48 = vmul.f32 %v1457_v14, %v1457_v14 }
 0x12c   :  { %v1199_v37 = vpack.c.bf16 %v1655_v40, %v1639_v7 }
 0x12d   :  { %v655_v16 = vadd.f32 %v654_v13, %v1508_v35  ;;  %v787_v27 = vadd.f32 %v786_v12, %v724_v9  ;;  %v727_v35 = vmul.f32 %v1538_v50, %v1538_v50  ;;  %1233 = vst [vmem:[%s1792_s2 + $0xb8] sm:$0xff] %v1169_v29  }
 0x12e   :  { %1239 = vst [vmem:[%s1792_s2 + $0xe8] sm:$0xff] %v1199_v37   ;;  %v739_v37 = vmul.f32 %v1528_v46, %v1528_v46 }
 0x12f   :  { %v656_v31 = vadd.f32 %v655_v16, %v1524_v43  ;;  %v788_v39 = vadd.f32 %v787_v27, %v725_v17  ;;  %v737_v16 = vmul.f32 %v1498_v32, %v1498_v32 }
 0x131   :  { %v657_v22 = vadd.f32 %v656_v31, %v1538_v50  ;;  %v789_v54 = vadd.f32 %v788_v39, %v726_v30  ;;  %v729_v50 = vmul.f32 %v1569_v44, %v1569_v44 }
 0x133   :  { %v790_v43 = vadd.f32 %v789_v54, %v727_v35  ;;  %v658_v42 = vadd.f32 %v657_v22, %v1555_v3  ;;  %v1679_v41 = vpop.f32.mrf.mxu3  ;;  %v731_v3 = vmul.f32 %v1421_v60, %v1421_v60  ;;  %v740_v35 = vmul.f32 %v1540_v51, %v1540_v51 }
 0x135   :  { %v791_v49 = vadd.f32 %v790_v43, %v728_v28  ;;  %v659_v58 = vadd.f32 %v658_v42, %v1569_v44  ;;  %v741_v43 = vmul.f32 %v1559_v10, %v1559_v10 }
 0x137   :  { %v792_v34 = vadd.f32 %v791_v49, %v729_v50  ;;  %v660_v55 = vadd.f32 %v659_v58, %v1585_v6  ;;  %v742_v49 = vmul.f32 %v1571_v45, %v1571_v45 }
 0x139   :  { %v661_v61 = vadd.f32 %v660_v55, %v1421_v60  ;;  %v793_v62 = vadd.f32 %v792_v34, %v730_v59 }
 0x13b   :  { %v662_v0 = vadd.f32 %v661_v61, %v1431_v2  ;;  %v794_v44 = vadd.f32 %v793_v62, %v731_v3  ;;  %v1693_v60 = vpop.f32.mrf.mxu3  ;;  %v735_v2 = vmul.f32 %v1468_v20, %v1468_v20  ;;  %v745_v62 = vmul.f32 %v1637_v18, %v1637_v18 }
 0x13c   :  { %v1204_v9 = vpack.c.bf16 %v1693_v60, %v1679_v41 }
 0x13d   :  { %v663_v8 = vadd.f32 %v662_v0, %v1447_v11  ;;  %v795_v6 = vadd.f32 %v794_v44, %v732_v63  ;;  %v736_v11 = vmul.f32 %v1480_v24, %v1480_v24  ;;  %v747_v44 = vmul.f32 %v1470_v21, %v1470_v21 }
 0x13e   :  { %1240 = vst [vmem:[%s1792_s2 + $0xf0] sm:$0xff] %v1204_v9  }
 0x13f   :  { %v664_v19 = vadd.f32 %v663_v8, %v1457_v14  ;;  %v796_v1 = vadd.f32 %v795_v6, %v733_v5 }
 0x141   :  { %v665_v13 = vadd.f32 %v664_v19, %v1468_v20  ;;  %v797_v12 = vadd.f32 %v796_v1, %v734_v48  ;;  %v738_v20 = vmul.f32 %v1510_v36, %v1510_v36 }
 0x143   :  { %v666_v14 = vadd.f32 %v665_v13, %v1480_v24  ;;  %v798_v17 = vadd.f32 %v797_v12, %v735_v2  ;;  %v1712_v29 = vpop.f32.mrf.mxu3 }
 0x145   :  { %v799_v27 = vadd.f32 %v798_v17, %v736_v11  ;;  %v667_v30 = vadd.f32 %v666_v14, %v1498_v32 }
 0x147   :  { %v668_v31 = vadd.f32 %v667_v30, %v1510_v36  ;;  %v800_v39 = vadd.f32 %v799_v27, %v737_v16 }
 0x149   :  { %v669_v24 = vadd.f32 %v668_v31, %v1528_v46  ;;  %v801_v22 = vadd.f32 %v800_v39, %v738_v20 }
 0x14b   :  { %v670_v54 = vadd.f32 %v669_v24, %v1540_v51  ;;  %v802_v32 = vadd.f32 %v801_v22, %v739_v37  ;;  %v499_v46 = vpop.f32.mrf.mxu3  ;;  %v743_v51 = vmul.f32 %v1589_v26, %v1589_v26 }
 0x14c   :  { %v1209_v50 = vpack.c.bf16 %v499_v46, %v1712_v29 }
 0x14d   :  { %v671_v36 = vadd.f32 %v670_v54, %v1559_v10  ;;  %v803_v42 = vadd.f32 %v802_v32, %v740_v35  ;;  %v758_v35 = vmul.f32 %v1655_v40, %v1655_v40 }
 0x14e   :  { %1241 = vst [vmem:[%s1792_s2 + $0xf8] sm:$0xff] %v1209_v50   ;;  %v762_v50 = vmul.f32 %v499_v46, %v499_v46 }
 0x14f   :  { %v672_v28 = vadd.f32 %v671_v36, %v1571_v45  ;;  %v804_v58 = vadd.f32 %v803_v42, %v741_v43  ;;  %v744_v45 = vmul.f32 %v1611_v56, %v1611_v56  ;;  %v759_v43 = vmul.f32 %v1679_v41, %v1679_v41 }
 0x150   :  { %v760_v42 = vmul.f32 %v1693_v60, %v1693_v60 }
 0x151   :  { %v805_v34 = vadd.f32 %v804_v58, %v742_v49  ;;  %v673_v55 = vadd.f32 %v672_v28, %v1589_v26  ;;  %v746_v26 = vmul.f32 %v1653_v23, %v1653_v23  ;;  %v761_v49 = vmul.f32 %v1712_v29, %v1712_v29 }
 0x153   :  { %v806_v10 = vadd.f32 %v805_v34, %v743_v51  ;;  %v674_v59 = vadd.f32 %v673_v55, %v1611_v56  ;;  %v748_v56 = vmul.f32 %v1482_v25, %v1482_v25 }
 0x155   :  { %v807_v3 = vadd.f32 %v806_v10, %v744_v45  ;;  %v675_v61 = vadd.f32 %v674_v59, %v1637_v18  ;;  %v749_v18 = vmul.f32 %v1500_v33, %v1500_v33 }
 0x157   :  { %v808_v63 = vadd.f32 %v807_v3, %v745_v62  ;;  %v676_v0 = vadd.f32 %v675_v61, %v1653_v23  ;;  %v750_v23 = vmul.f32 %v1512_v38, %v1512_v38 }
 0x159   :  { %v677_v5 = vadd.f32 %v676_v0, %v1470_v21  ;;  %v809_v8 = vadd.f32 %v808_v63, %v746_v26  ;;  %v751_v21 = vmul.f32 %v1530_v47, %v1530_v47  ;;  %v838_v63 = vlaneseq }
 0x15b   :  { %v678_v6 = vadd.f32 %v677_v5, %v1482_v25  ;;  %v810_v48 = vadd.f32 %v809_v8, %v747_v44  ;;  %v752_v25 = vmul.f32 %v1542_v52, %v1542_v52  ;;  %vm840_vm1 = vcmp.lt.s32.totalorder %v838_v63, 256 }
 0x15d   :  { %v679_v19 = vadd.f32 %v678_v6, %v1500_v33  ;;  %v811_v1 = vadd.f32 %v810_v48, %v748_v56  ;;  %v753_v33 = vmul.f32 %v1561_v15, %v1561_v15 }
 0x15f   :  { %v680_v9 = vadd.f32 %v679_v19, %v1512_v38  ;;  %v812_v2 = vadd.f32 %v811_v1, %v749_v18  ;;  %v754_v38 = vmul.f32 %v1573_v53, %v1573_v53 }
 0x161   :  { %v681_v13 = vadd.f32 %v680_v9, %v1530_v47  ;;  %v813_v12 = vadd.f32 %v812_v2, %v750_v23  ;;  %v755_v47 = vmul.f32 %v1591_v4, %v1591_v4 }
 0x163   :  { %v682_v11 = vadd.f32 %v681_v13, %v1542_v52  ;;  %v814_v14 = vadd.f32 %v813_v12, %v751_v21  ;;  %v756_v52 = vmul.f32 %v1613_v57, %v1613_v57 }
 0x165   :  { %v815_v17 = vadd.f32 %v814_v14, %v752_v25  ;;  %v683_v16 = vadd.f32 %v682_v11, %v1561_v15  ;;  %v757_v15 = vmul.f32 %v1639_v7, %v1639_v7 }
 0x167   :  { %v684_v27 = vadd.f32 %v683_v16, %v1573_v53  ;;  %v816_v30 = vadd.f32 %v815_v17, %v753_v33 }
 0x169   :  { %v685_v20 = vadd.f32 %v684_v27, %v1591_v4  ;;  %v817_v31 = vadd.f32 %v816_v30, %v754_v38 }
 0x16b   :  { %v686_v39 = vadd.f32 %v685_v20, %v1613_v57  ;;  %v818_v37 = vadd.f32 %v817_v31, %v755_v47 }
 0x16d   :  { %v687_v24 = vadd.f32 %v686_v39, %v1639_v7  ;;  %v819_v22 = vadd.f32 %v818_v37, %v756_v52 }
 0x16f   :  { %v688_v53 = vadd.f32 %v687_v24, %v1655_v40  ;;  %v820_v54 = vadd.f32 %v819_v22, %v757_v15 }
 0x171   :  { %v821_v4 = vadd.f32 %v820_v54, %v758_v35  ;;  %v689_v32 = vadd.f32 %v688_v53, %v1679_v41 }
 0x173   :  { %v822_v57 = vadd.f32 %v821_v4, %v759_v43  ;;  %v690_v36 = vadd.f32 %v689_v32, %v1693_v60 }
 0x175   :  { %v823_v7 = vadd.f32 %v822_v57, %v760_v42  ;;  %v691_v28 = vadd.f32 %v690_v36, %v1712_v29 }
 0x177   :  { %v824_v40 = vadd.f32 %v823_v7, %v761_v49  ;;  %v692_v58 = vadd.f32 %v691_v28, %v499_v46 }
 0x179   :  { %v693_v34 = vrot.slane %v692_v58, 4  ;;  %v825_v55 = vadd.f32 %v824_v40, %v762_v50 }
 0x17b   :  { %v694_v51 = vadd.f32 %v693_v34, %v692_v58  ;;  %v826_v10 = vrot.slane %v825_v55, 4 }
 0x17d   :  { %v695_v41 = vrot.slane %v694_v51, 2  ;;  %v827_v59 = vadd.f32 %v826_v10, %v825_v55 }
 0x17f   :  { %v696_v45 = vadd.f32 %v695_v41, %v694_v51  ;;  %v828_v3 = vrot.slane %v827_v59, 2 }
 0x181   :  { %v829_v61 = vadd.f32 %v828_v3, %v827_v59  ;;  %v697_v62 = vrot.slane %v696_v45, 1 }
 0x183   :  { %v830_v60 = vrot.slane %v829_v61, 1  ;;  %v698_v26 = vadd.f32 %v697_v62, %v696_v45 }
 0x185   :  { %v831_v0 = vadd.f32 %v830_v60, %v829_v61 }
 0x187   :  { %v834_v44 = vrot.slane %v831_v0, 7 }
 0x189   :  { %v836_v29 = vsel %vm835_vm0, %v698_v26, %v834_v44 }
 0x18a   :  { %842 = vst.msk [vmem:[%s1793_s3] sm:$0x3] %vm840_vm1, %v836_v29 }

// kernel: bottleneck_forward.5
= control target key start
LH: loop header
LB: loop body
LE: loop exit
PB: predicated region body
PF: predicated region fallthrough
CT: control target
= control target key end

     0   :  { %s4186_s18 = smov 0   ;;  %s5790_s0 = inlined_call_operand.vmem [shape: bf16[512,128], index: 0, kind: input, shape index: {}]   ;;  %s5791_s1 = inlined_call_operand.vmem [shape: f32[1,128], index: 1, kind: input, shape index: {}]   ;;  %s5792_s2 = inlined_call_operand.vmem [shape: f32[1,128], index: 2, kind: input, shape index: {}]   ;;  %s5793_s3 = inlined_call_operand.vmem [shape: bf16[3,384,128], index: 3, kind: input, shape index: {}]   ;;  %s5794_s4 = inlined_call_operand.vmem [shape: bf16[512,128], index: 4, kind: output, shape index: {0}]   ;;  %s5795_s5 = inlined_call_operand.vmem [shape: f32[2,1,256], index: 5, kind: output, shape index: {1}]  }
   0x1 LB: > { %s4192_s19 = sadd.s32 4294967295, %s4152_s18   ;;  %p3069_p0 = scmp.ge.s32.totalorder %s4152_s18, 1  ;;  %s4152_s18 = sphi %s4186_s18, %s16_s18  }
   0x2   : > { %p191_p1 = scmp.lt.s32.totalorder %s4152_s18, 3 }
   0x4   : > { %p192_p2 = pnand %p3069_p0, %p191_p1 }
   0x6   : > { %195 = sbr.rel (%p192_p2) target bundleno = 770 (0x302), region = 36 }
   0xb   : > { %v3860_v0 = vld [vmem:[%s5793_s3 + $0x38] sm:$0xff]  ;;  %s3070_s22 = sshll.u32 %s4192_s19, 5  ;;  %v5796_v1 = vlaneseq  ;;  %v3859_v2 = vld [vmem:[%s5793_s3 + $0x30] sm:$0xff]  ;;  %v3858_v4 = vld [vmem:[%s5793_s3 + $0x28] sm:$0xff]  ;;  %vm5884_vm4 = vmmov 1   ;;  %v5926_v59 = vmov 0 }
   0xc   : > { %p224_p3 = scmp.lt.s32.totalorder %s3070_s22, 63  ;;  %1387 = vmatpush.bf16.msra.mxu0 %v3860_v0  ;;  %4107 = vmatpush.bf16.msra.mxu1 %v3860_v0  ;;  %v4222_v5 = vld [vmem:[%s5791_s1] ss:$0 sm:$0xff]  ;;  %v3856_v37 = vld [vmem:[%s5793_s3 + $0x18] sm:$0xff]  ;;  %v3855_v51 = vld [vmem:[%s5793_s3 + $0x10] sm:$0xff]  ;;  %p235_p4 = scmp.lt.s32.totalorder %s4192_s19, 1 }
   0xd   : > { %4108 = vmatpush.bf16.msra.mxu2 %v3860_v0  ;;  %4109 = vmatpush.bf16.msra.mxu3 %v3860_v0  ;;  %v4207_v3 = vshrl.u32 %v5796_v1, 7  ;;  %v4227_v6 = vld [vmem:[%s5792_s2] ss:$0 sm:$0xff] }
   0xe   : > { %s6210_s22 = smov (!%p224_p3, %s3070_s22), 63  ;;  %v3857_v20 = vld [vmem:[%s5793_s3 + $0x20] sm:$0xff]  ;;  %s6212_s19 = smov (!%p235_p4, %s4192_s19), 1 }
   0xf   : > { %s3071_s25 = sshll.u32 %s6210_s22, 2  ;;  %v414_v16 = vadd.s32 48, %v4207_v3  ;;  %v422_v38 = vadd.s32 112, %v4207_v3  ;;  %v4267_v40 = vadd.s32 176, %v4207_v3  ;;  %vm5836_vm0 = vcmp.lt.s32.totalorder %v4207_v3, 1  ;;  %s3074_s22 = sshll.u32 %s6212_s19, 1 }
  0x10   : > { %1388 = vmatpush.bf16.msra.mxu0 %v3859_v2  ;;  %4110 = vmatpush.bf16.msra.mxu1 %v3859_v2  ;;  %s4217_s30 = scalar_lea.vmem %s5790_s0, %s3071_s25  ;;  %s5664_s13 = scalar_lea.vmem %s5794_s4, %s3071_s25 }
  0x11   : > { %4111 = vmatpush.bf16.msra.mxu2 %v3859_v2  ;;  %4112 = vmatpush.bf16.msra.mxu3 %v3859_v2  ;;  %v4230_v7 = vld [vmem:[%s4217_s30 + $0x10] sm:$0xff]   ;;  %v4047_v8 = vld [vmem:[%s4217_s30 + $0x18] sm:$0xff]   ;;  %v446_v43 = vand.u32 15, %v414_v16  ;;  %v454_v52 = vand.u32 15, %v422_v38  ;;  %v462_v55 = vand.u32 15, %v4267_v40  ;;  %v3902_v56 = vld [vmem:[%s4217_s30] sm:$0xff]   ;;  %s238_s15 = scalar_lea.vmem %s5795_s5, %s3074_s22 }
  0x12   : > { %v4234_v9 = vld [vmem:[%s4217_s30 + $0x30] sm:$0xff]   ;;  %v3912_v10 = vunpack.c.h.bf16 %v4230_v7  ;;  %v3915_v11 = vunpack.c.l.bf16 %v4047_v8  ;;  %v3916_v12 = vunpack.c.h.bf16 %v4047_v8  ;;  %v4051_v13 = vld [vmem:[%s4217_s30 + $0x38] sm:$0xff]   ;;  %v4048_v62 = vld [vmem:[%s4217_s30 + $0x20] sm:$0xff]  }
  0x13   : > { %v4239_v14 = vld [vmem:[%s4217_s30 + $0x50] sm:$0xff]   ;;  %v4055_v15 = vld [vmem:[%s4217_s30 + $0x58] sm:$0xff]   ;;  %v3928_v17 = vunpack.c.h.bf16 %v4234_v9  ;;  %v3931_v18 = vunpack.c.l.bf16 %v4051_v13  ;;  %v3932_v19 = vunpack.c.h.bf16 %v4051_v13  ;;  %vm4295_vm1 = vcmp.ne.s32.totalorder %v446_v43, 0  ;;  %v3854_v13 = vld [vmem:[%s5793_s3 + $0x8] sm:$0xff] }
  0x14   : > { %1389 = vmatpush.bf16.msra.mxu0 %v3858_v4  ;;  %4113 = vmatpush.bf16.msra.mxu1 %v3858_v4  ;;  %v312_v21 = vmul.f32 %v4222_v5, %v3912_v10  ;;  %v313_v22 = vmul.f32 %v4222_v5, %v3915_v11  ;;  %v314_v23 = vmul.f32 %v4222_v5, %v3916_v12  ;;  %v3944_v24 = vunpack.c.h.bf16 %v4239_v14  ;;  %v4059_v61 = vld [vmem:[%s4217_s30 + $0x78] sm:$0xff]   ;;  %vm4375_vm5 = vmpackc.low %vm5884_vm4, %vm4295_vm1 }
  0x15   : > { %4114 = vmatpush.bf16.msra.mxu2 %v3858_v4  ;;  %4115 = vmatpush.bf16.msra.mxu3 %v3858_v4  ;;  %v320_v25 = vmul.f32 %v4222_v5, %v3928_v17  ;;  %v321_v26 = vmul.f32 %v4222_v5, %v3931_v18  ;;  %v322_v27 = vmul.f32 %v4222_v5, %v3932_v19  ;;  %v3947_v28 = vunpack.c.l.bf16 %v4055_v15 }
  0x16   : > { %v348_v29 = vadd.f32 %v4227_v6, %v312_v21  ;;  %v349_v30 = vadd.f32 %v4227_v6, %v313_v22  ;;  %v350_v31 = vadd.f32 %v4227_v6, %v314_v23  ;;  %v3948_v32 = vunpack.c.h.bf16 %v4055_v15  ;;  %v4052_v23 = vld [vmem:[%s4217_s30 + $0x40] sm:$0xff]  }
  0x17   : > { %v356_v33 = vadd.f32 %v4227_v6, %v320_v25  ;;  %v357_v34 = vadd.f32 %v4227_v6, %v321_v26  ;;  %v358_v35 = vadd.f32 %v4227_v6, %v322_v27  ;;  %v328_v36 = vmul.f32 %v4222_v5, %v3944_v24 }
  0x18   : > { %1390 = vmatpush.bf16.msra.mxu0 %v3857_v20  ;;  %4116 = vmatpush.bf16.msra.mxu1 %v3857_v20  ;;  %v329_v39 = vmul.f32 %v4222_v5, %v3947_v28  ;;  %v4269_v41 = vmax.f32 %v348_v29, 0.0  ;;  %v4271_v42 = vmax.f32 %v349_v30, 0.0  ;;  %v330_v44 = vmul.f32 %v4222_v5, %v3948_v32  ;;  %v3853_v32 = vld [vmem:[%s5793_s3] sm:$0xff] }
  0x19   : > { %4117 = vmatpush.bf16.msra.mxu2 %v3857_v20  ;;  %4118 = vmatpush.bf16.msra.mxu3 %v3857_v20  ;;  %v4274_v45 = vmax.f32 %v350_v31, 0.0  ;;  %v4276_v46 = vmax.f32 %v356_v33, 0.0  ;;  %v4278_v47 = vmax.f32 %v357_v34, 0.0  ;;  %v364_v48 = vadd.f32 %v4227_v6, %v328_v36 }
  0x1a   : > { %v4282_v49 = vmax.f32 %v358_v35, 0.0  ;;  %v365_v50 = vadd.f32 %v4227_v6, %v329_v39  ;;  %v366_v53 = vadd.f32 %v4227_v6, %v330_v44  ;;  %v5802_v57 = vrot.slane %v4269_v41, 7  ;;  %v3876_v44 = vld [vmem:[%s5793_s3 + $0xb8] sm:$0xff] }
  0x1b   : > { %v4289_v54 = vmax.f32 %v364_v48, 0.0  ;;  %v510_v58 = vrot.slane %v4271_v42, 7  ;;  %v511_v63 = vrot.slane %v4274_v45, 7  ;;  %v5801_v0 = vrot.slane %v4276_v46, 7  ;;  %v3836_v48 = vld [vmem:[%s5793_s3 + $0xf8] sm:$0xff] }
  0x1c   : > { %1391 = vmatpush.bf16.msra.mxu0 %v3856_v37  ;;  %4119 = vmatpush.bf16.msra.mxu1 %v3856_v37  ;;  %v4299_v60 = vmax.f32 %v365_v50, 0.0  ;;  %v518_v2 = vrot.slane %v4278_v47, 7  ;;  %v4306_v4 = vmax.f32 %v366_v53, 0.0  ;;  %v519_v8 = vrot.slane %v4282_v49, 7  ;;  %v4056_v53 = vld [vmem:[%s4217_s30 + $0x60] sm:$0xff]  }
  0x1d   : > { %4120 = vmatpush.bf16.msra.mxu2 %v3856_v37  ;;  %4121 = vmatpush.bf16.msra.mxu3 %v3856_v37  ;;  %v5800_v10 = vrot.slane %v4289_v54, 7  ;;  %v3903_v11 = vunpack.c.l.bf16 %v3902_v56  ;;  %v3904_v12 = vunpack.c.h.bf16 %v3902_v56  ;;  %v3964_v16 = vunpack.c.h.bf16 %v4059_v61 }
  0x1e   : > { %5914 = vst [vmem:[#allocation2_spill] sm:$0xff] %v4299_v60  ;;  %v526_v15 = vrot.slane %v4299_v60, 7  ;;  %v3919_v17 = vunpack.c.l.bf16 %v4048_v62  ;;  %v3920_v18 = vunpack.c.h.bf16 %v4048_v62  ;;  %vm4314_vm2 = vcmp.ne.s32.totalorder %v454_v52, 0 }
  0x1f   : > { %5915 = vst [vmem:[#allocation3_spill] sm:$0xff] %v4306_v4  ;;  %v527_v20 = vrot.slane %v4306_v4, 7  ;;  %v307_v21 = vmul.f32 %v4222_v5, %v3903_v11  ;;  %v308_v22 = vmul.f32 %v4222_v5, %v3904_v12  ;;  %v561_v24 = vsel %vm5836_vm0, %v510_v58, %v511_v63  ;;  %vm4389_vm6 = vmpackc.low %vm5884_vm4, %vm4314_vm2 }
  0x20   : > { %1392 = vmatpush.bf16.msra.mxu0 %v3855_v51  ;;  %4122 = vmatpush.bf16.msra.mxu1 %v3855_v51  ;;  %v338_v25 = vmul.f32 %v4222_v5, %v3964_v16  ;;  %v315_v26 = vmul.f32 %v4222_v5, %v3919_v17  ;;  %v316_v27 = vmul.f32 %v4222_v5, %v3920_v18  ;;  %v3935_v36 = vunpack.c.l.bf16 %v4052_v23  ;;  %v3868_v16 = vld [vmem:[%s5793_s3 + $0x78] sm:$0xff] }
  0x21   : > { %4123 = vmatpush.bf16.msra.mxu2 %v3855_v51  ;;  %4124 = vmatpush.bf16.msra.mxu3 %v3855_v51  ;;  %v562_v28 = vsel %vm5836_vm0, %v5802_v57, %v510_v58  ;;  %v553_v29 = vsel %vm5836_vm0, %v518_v2, %v519_v8  ;;  %v343_v30 = vadd.f32 %v4227_v6, %v307_v21  ;;  %v3936_v40 = vunpack.c.h.bf16 %v4052_v23  ;;  %v3844_v17 = vld [vmem:[%s5793_s3 + $0x138] sm:$0xff]  ;;  %v3875_v23 = vld [vmem:[%s5793_s3 + $0xb0] sm:$0xff] }
  0x22   : > { %v344_v31 = vadd.f32 %v4227_v6, %v308_v22  ;;  %v554_v33 = vsel %vm5836_vm0, %v5801_v0, %v518_v2  ;;  %v546_v34 = vsel %vm5836_vm0, %v5800_v10, %v526_v15  ;;  %v374_v35 = vadd.f32 %v4227_v6, %v338_v25  ;;  %v3832_v0 = vld [vmem:[%s5793_s3 + $0xd8] sm:$0xff] }
  0x23   : > { %v545_v37 = vsel %vm5836_vm0, %v526_v15, %v527_v20  ;;  %v351_v38 = vadd.f32 %v4227_v6, %v315_v26  ;;  %v352_v39 = vadd.f32 %v4227_v6, %v316_v27  ;;  %vm4357_vm3 = vcmp.ne.s32.totalorder %v462_v55, 0  ;;  %v4045_v27 = vld [vmem:[%s4217_s30 + $0x8] sm:$0xff]  }
  0x24   : > { %1393 = vmatpush.bf16.msra.mxu0 %v3854_v13  ;;  %4125 = vmatpush.bf16.msra.mxu1 %v3854_v13  ;;  %v4367_v50 = vmax.f32 %v343_v30, 0.0  ;;  %v416_v51 = vadd.s32 64, %v4207_v3  ;;  %v323_v52 = vmul.f32 %v4222_v5, %v3935_v36  ;;  %v5921_v55 = vmov 0  ;;  %vm4402_vm7 = vmpackc.low %vm5884_vm4, %vm4357_vm3 }
  0x25   : > { %4126 = vmatpush.bf16.msra.mxu2 %v3854_v13  ;;  %4127 = vmatpush.bf16.msra.mxu3 %v3854_v13  ;;  %v5922_v55 = vsel %vm4375_vm5, 4294967295, %v5921_v55  ;;  %v4379_v56 = vpack.c.bf16 %v561_v24, %v562_v28  ;;  %v4381_v58 = vmax.f32 %v344_v31, 0.0  ;;  %v4383_v61 = vmax.f32 %v374_v35, 0.0  ;;  %v3835_v24 = vld [vmem:[%s5793_s3 + $0xf0] sm:$0xff] }
  0x26   : > { %5920 = vst [vmem:[#allocation4_spill] sm:$0xff] %v4367_v50  ;;  %v324_v62 = vmul.f32 %v4222_v5, %v3936_v40  ;;  %v5927_v59 = vsel %vm4389_vm6, 4294967295, %v5926_v59  ;;  %v4393_v2 = vpack.c.bf16 %v553_v29, %v554_v33  ;;  %v4395_v11 = vpack.c.bf16 %v545_v37, %v546_v34  ;;  %v3843_v40 = vld [vmem:[%s5793_s3 + $0x130] sm:$0xff]  ;;  %v3865_v33 = vld [vmem:[%s5793_s3 + $0x60] sm:$0xff] }
  0x27   : > { %5923 = vst [vmem:[#allocation5_spill] sm:$0xff] %v5922_v55  ;;  %v440_v12 = vand.u32 15, %v4207_v3  ;;  %v359_v13 = vadd.f32 %v4227_v6, %v323_v52  ;;  %v5931_v15 = vmov 0  ;;  %v4412_v18 = vmax.f32 %v351_v38, 0.0 }
  0x28   : > { %5924 = vst [vmem:[#allocation6_spill] sm:$0xff] %v4379_v56  ;;  %1394 = vmatpush.bf16.msra.mxu0 %v3853_v32  ;;  %4128 = vmatpush.bf16.msra.mxu1 %v3853_v32  ;;  %v5932_v15 = vsel %vm4402_vm7, 4294967295, %v5931_v15  ;;  %v4414_v19 = vmax.f32 %v352_v39, 0.0  ;;  %v360_v21 = vadd.f32 %v4227_v6, %v324_v62  ;;  %v3951_v22 = vunpack.c.l.bf16 %v4056_v53  ;;  %v3867_v39 = vld [vmem:[%s5793_s3 + $0x70] sm:$0xff]  ;;  %v3874_v62 = vld [vmem:[%s5793_s3 + $0xa8] sm:$0xff] }
  0x29   : > { %5925 = vst [vmem:[#allocation7_spill] sm:$0xff] %v4383_v61  ;;  %4129 = vmatpush.bf16.msra.mxu2 %v3853_v32  ;;  %4130 = vmatpush.bf16.msra.mxu3 %v3853_v32  ;;  %v504_v25 = vrot.slane %v4367_v50, 7  ;;  %v448_v26 = vand.u32 15, %v416_v51  ;;  %v5798_v28 = vmov 0.0|0.0   ;;  %v5806_v29 = vrot.slane %v4381_v58, 7 }
  0x2a   : > { %5928 = vst [vmem:[#allocation8_spill] sm:$0xff] %v5927_v59  ;;  %v5797_v30 = vrot.slane %v4383_v61, 7  ;;  %v4431_v31 = vmax.f32 %v359_v13, 0.0  ;;  %v424_v32 = vadd.s32 128, %v4207_v3  ;;  %vm4440_vm8 = vcmp.ne.s32.totalorder %v440_v12, 0  ;;  %v3834_v12 = vld [vmem:[%s5793_s3 + $0xe8] sm:$0xff] }
  0x2b   : > { %5929 = vst [vmem:[#allocation9_spill] sm:$0xff] %v4393_v2  ;;  %1395 = vmatmul.bf16.vlgmr.msra.gmra.mxu0 %v5798_v28  ;;  %3234 = vmatmul.msk.bf16.vlgmr.msra.gmra.mxu1 %vm4375_vm5, %v4379_v56  ;;  %v4444_v34 = vmax.f32 %v360_v21, 0.0  ;;  %v3952_v35 = vunpack.c.h.bf16 %v4056_v53  ;;  %v331_v36 = vmul.f32 %v4222_v5, %v3951_v22  ;;  %v512_v37 = vrot.slane %v4412_v18, 7  ;;  %v4049_v13 = vld [vmem:[%s4217_s30 + $0x28] sm:$0xff]   ;;  %vm4527_vm11 = vmpackc.low %vm5884_vm4, %vm4440_vm8 }
  0x2c   : > { %5930 = vst [vmem:[#allocation10_spill] sm:$0xff] %v4395_v11  ;;  %3250 = vmatmul.msk.bf16.vlgmr.msra.gmra.mxu2 %vm4389_vm6, %v4393_v2  ;;  %3266 = vmatmul.msk.bf16.vlgmr.msra.gmra.mxu3 %vm4402_vm7, %v4395_v11  ;;  %v5805_v38 = vrot.slane %v4414_v19, 7  ;;  %v3907_v43 = vunpack.c.l.bf16 %v4045_v27  ;;  %vm4455_vm9 = vcmp.ne.s32.totalorder %v448_v26, 0  ;;  %v432_v53 = vadd.s32 192, %v4207_v3 }
  0x2d   : > { %5933 = vst [vmem:[#allocation11_spill] sm:$0xff] %v5932_v15  ;;  %1565 = vmatpush.bf16.msrb.mxu2 %v3876_v44  ;;  %1798 = vmatpush.bf16.msrb.mxu3 %v3836_v48  ;;  %v3908_v44 = vunpack.c.h.bf16 %v4045_v27  ;;  %v332_v51 = vmul.f32 %v4222_v5, %v3952_v35  ;;  %v367_v52 = vadd.f32 %v4227_v6, %v331_v36  ;;  %v456_v21 = vand.u32 15, %v424_v32  ;;  %v4053_v35 = vld [vmem:[%s4217_s30 + $0x48] sm:$0xff]   ;;  %vm4565_vm13 = vmpackc.low %vm5884_vm4, %vm4455_vm9 }
  0x2e   : > { %1476 = vmatpush.bf16.msrb.mxu1 %v3868_v16  ;;  %1887 = vmatpush.bf16.msrb.mxu0 %v3844_v17  ;;  %v567_v16 = vsel %vm5836_vm0, %v504_v25, %v5806_v29  ;;  %v568_v17 = vsel %vm5836_vm0, %v5797_v30, %v504_v25  ;;  %v520_v22 = vrot.slane %v4431_v31, 7  ;;  %v309_v27 = vmul.f32 %v4222_v5, %v3907_v43  ;;  %v3866_v32 = vld [vmem:[%s5793_s3 + $0x68] sm:$0xff] }
  0x2f   : > { %v4480_v26 = vmax.f32 %v367_v52, 0.0  ;;  %v559_v36 = vsel %vm5836_vm0, %v512_v37, %v5805_v38  ;;  %v560_v25 = vsel %vm5836_vm0, %v511_v63, %v512_v37  ;;  %v3842_v43 = vld [vmem:[%s5793_s3 + $0x128] sm:$0xff]  ;;  %v3923_v52 = vunpack.c.l.bf16 %v4049_v13  ;;  %v3873_v63 = vld [vmem:[%s5793_s3 + $0xa0] sm:$0xff] }
  0x30   : > { %v464_v30 = vand.u32 15, %v432_v53  ;;  %v3833_v37 = vld [vmem:[%s5793_s3 + $0xe0] sm:$0xff]  ;;  %vm4512_vm10 = vcmp.ne.s32.totalorder %v456_v21, 0 }
  0x31   : > { %1566 = vmatpush.bf16.msrb.mxu2 %v3875_v23  ;;  %1799 = vmatpush.bf16.msrb.mxu3 %v3835_v24  ;;  %v5804_v23 = vrot.slane %v4444_v34, 7  ;;  %v368_v24 = vadd.f32 %v4227_v6, %v332_v51  ;;  %5938 = vst [vmem:[#allocation12_spill] sm:$0xff] %v4480_v26  ;;  %v310_v51 = vmul.f32 %v4222_v5, %v3908_v44  ;;  %v528_v28 = vrot.slane %v4480_v26, 7  ;;  %vm4575_vm14 = vmpackc.low %vm5884_vm4, %vm4512_vm10 }
  0x32   : > { %1477 = vmatpush.bf16.msrb.mxu1 %v3867_v39  ;;  %1888 = vmatpush.bf16.msrb.mxu0 %v3843_v40  ;;  %v3924_v39 = vunpack.c.h.bf16 %v4049_v13  ;;  %v552_v40 = vsel %vm5836_vm0, %v519_v8, %v520_v22  ;;  %v317_v53 = vmul.f32 %v4222_v5, %v3923_v52  ;;  %v345_v13 = vadd.f32 %v4227_v6, %v309_v27 }
  0x33   : > { %v4499_v1 = vmax.f32 %v368_v24, 0.0  ;;  %v544_v21 = vsel %vm5836_vm0, %v527_v20, %v528_v28  ;;  %v3940_v52 = vunpack.c.h.bf16 %v4053_v35  ;;  %vm4547_vm12 = vcmp.ne.s32.totalorder %v464_v30, 0 }
  0x34   : > { %v318_v10 = vmul.f32 %v4222_v5, %v3924_v39  ;;  %v353_v27 = vadd.f32 %v4227_v6, %v317_v53  ;;  %v3841_v39 = vld [vmem:[%s5793_s3 + $0x120] sm:$0xff]  ;;  %v3872_v53 = vld [vmem:[%s5793_s3 + $0x98] sm:$0xff]  ;;  %v5945_v30 = vmov 0  ;;  %vm4588_vm15 = vmpackc.low %vm5884_vm4, %vm4547_vm12  ;;  %v418_v44 = vadd.s32 80, %v4207_v3 }
  0x35   : > { %1567 = vmatpush.bf16.msrb.mxu2 %v3874_v62  ;;  %1800 = vmatpush.bf16.msrb.mxu3 %v3834_v12  ;;  %v3939_v62 = vunpack.c.l.bf16 %v4053_v35  ;;  %v551_v12 = vsel %vm5836_vm0, %v520_v22, %v5804_v23  ;;  %v5803_v24 = vrot.slane %v4499_v1, 7  ;;  %v346_v22 = vadd.f32 %v4227_v6, %v310_v51  ;;  %v4057_v51 = vld [vmem:[%s4217_s30 + $0x68] sm:$0xff]  }
  0x36   : > { %1478 = vmatpush.bf16.msrb.mxu1 %v3866_v32  ;;  %1889 = vmatpush.bf16.msrb.mxu0 %v3842_v43  ;;  %v354_v35 = vadd.f32 %v4227_v6, %v318_v10  ;;  %v5946_v30 = vsel %vm4565_vm13, 4294967295, %v5945_v30  ;;  %v4569_v10 = vpack.c.bf16 %v559_v36, %v560_v25  ;;  %v326_v48 = vmul.f32 %v4222_v5, %v3940_v52 }
  0x37   : > { %v543_v20 = vsel %vm5836_vm0, %v528_v28, %v5803_v24  ;;  %v325_v43 = vmul.f32 %v4222_v5, %v3939_v62  ;;  %v4560_v28 = vpack.c.bf16 %v567_v16, %v568_v17  ;;  %5947 = vst [vmem:[#allocation13_spill] sm:$0xff] %v5946_v30  ;;  %v4579_v16 = vpack.c.bf16 %v551_v12, %v552_v40  ;;  %v3864_v12 = vld [vmem:[%s5793_s3 + $0x58] sm:$0xff]  ;;  %v3839_v24 = vld [vmem:[%s5793_s3 + $0x110] sm:$0xff]  ;;  %v3849_v30 = vld [vmem:[%s5793_s3 + $0x160] sm:$0xff] }
  0x38   : > { %5948 = vst [vmem:[#allocation14_spill] sm:$0xff] %v4569_v10  ;;  %v4581_v17 = vpack.c.bf16 %v543_v20, %v544_v21  ;;  %v5954_v36 = vmov 0  ;;  %v4592_v25 = vmax.f32 %v345_v13, 0.0  ;;  %v3955_v57 = vunpack.c.l.bf16 %v4057_v51  ;;  %v3840_v21 = vld [vmem:[%s5793_s3 + $0x118] sm:$0xff] }
  0x39   : > { %1568 = vmatpush.bf16.msrb.mxu2 %v3873_v63  ;;  %1801 = vmatpush.bf16.msrb.mxu3 %v3833_v37  ;;  %v410_v63 = vadd.s32 16, %v4207_v3  ;;  %v5949_v37 = vmov 0  ;;  %5952 = vst [vmem:[#allocation16_spill] sm:$0xff] %v4579_v16  ;;  %v361_v62 = vadd.f32 %v4227_v6, %v325_v43  ;;  %v5955_v36 = vsel %vm4588_vm15, 4294967295, %v5954_v36 }
  0x3a   : > { %v5950_v37 = vsel %vm4575_vm14, 4294967295, %v5949_v37  ;;  %5953 = vst [vmem:[#allocation17_spill] sm:$0xff] %v4581_v17  ;;  %v3956_v40 = vunpack.c.h.bf16 %v4057_v51  ;;  %1479 = vmatpush.bf16.msrb.mxu1 %v3865_v33  ;;  %1890 = vmatpush.bf16.msrb.mxu0 %v3841_v39  ;;  %v4601_v52 = vmax.f32 %v346_v22, 0.0  ;;  %v4603_v20 = vmax.f32 %v353_v27, 0.0  ;;  %v3871_v33 = vld [vmem:[%s5793_s3 + $0x90] sm:$0xff] }
  0x3b   : > { %5951 = vst [vmem:[#allocation15_spill] sm:$0xff] %v5950_v37  ;;  %v4605_v13 = vmax.f32 %v354_v35, 0.0  ;;  %v362_v32 = vadd.f32 %v4227_v6, %v326_v48  ;;  %v3831_v39 = vld [vmem:[%s5793_s3 + $0xd0] sm:$0xff]  ;;  %3222 = vmatmul.msk.bf16.gmra.mxu0 %vm4527_vm11, %v4560_v28  ;;  %3238 = vmatmul.msk.bf16.gmra.mxu1 %vm4565_vm13, %v4569_v10  ;;  %v4620_v22 = vmax.f32 %v361_v62, 0.0  ;;  %v333_v27 = vmul.f32 %v4222_v5, %v3955_v57 }
  0x3c   : > { %5956 = vst [vmem:[#allocation18_spill] sm:$0xff] %v5955_v36  ;;  %v334_v35 = vmul.f32 %v4222_v5, %v3956_v40  ;;  %3254 = vmatmul.msk.bf16.gmra.mxu2 %vm4575_vm14, %v4579_v16  ;;  %3270 = vmatmul.msk.bf16.gmra.mxu3 %vm4588_vm15, %v4581_v17  ;;  %v442_v43 = vand.u32 15, %v410_v63  ;;  %v450_v48 = vand.u32 15, %v418_v44  ;;  %v3863_v40 = vld [vmem:[%s5793_s3 + $0x50] sm:$0xff]  ;;  %v3943_v63 = vunpack.c.l.bf16 %v4239_v14 }
  0x3d   : > { %1569 = vmatpush.bf16.msrb.mxu2 %v3872_v53  ;;  %1802 = vmatpush.bf16.msrb.mxu3 %v3832_v0  ;;  %v426_v0 = vadd.s32 144, %v4207_v3  ;;  %v4631_v51 = vmax.f32 %v362_v32, 0.0  ;;  %v506_v53 = vrot.slane %v4592_v25, 7  ;;  %v369_v62 = vadd.f32 %v4227_v6, %v333_v27  ;;  %v4058_v44 = vld [vmem:[%s4217_s30 + $0x70] sm:$0xff]  }
  0x3e   : > { %v370_v57 = vadd.f32 %v4227_v6, %v334_v35  ;;  %1480 = vmatpush.bf16.msrb.mxu1 %v3864_v12  ;;  %1891 = vmatpush.bf16.msrb.mxu0 %v3840_v21  ;;  %v514_v32 = vrot.slane %v4603_v20, 7  ;;  %v434_v27 = vadd.s32 208, %v4207_v3  ;;  %v3870_v12 = vld [vmem:[%s5793_s3 + $0x88] sm:$0xff]  ;;  %v522_v23 = vrot.slane %v4620_v22, 7 }
  0x3f   : > { %v3830_v21 = vld [vmem:[%s5793_s3 + $0xc8] sm:$0xff]  ;;  %v458_v35 = vand.u32 15, %v426_v0  ;;  %v4653_v38 = vmax.f32 %v369_v62, 0.0  ;;  %vm4661_vm1 = vcmp.ne.s32.totalorder %v442_v43, 0  ;;  %v5961_v43 = vrot.slane %v4381_v58, 7 }
  0x40   : > { %v4655_v29 = vmax.f32 %v370_v57, 0.0  ;;  %v3862_v57 = vld [vmem:[%s5793_s3 + $0x48] sm:$0xff]  ;;  %vm4681_vm2 = vcmp.ne.s32.totalorder %v450_v48, 0  ;;  %v5964_v36 = vrot.slane %v4605_v13, 7  ;;  %v5965_v48 = vrot.slane %v4414_v19, 7  ;;  %vm4732_vm8 = vmpackc.low %vm5884_vm4, %vm4661_vm1 }
  0x41   : > { %1570 = vmatpush.bf16.msrb.mxu2 %v3871_v33  ;;  %1803 = vmatpush.bf16.msrb.mxu3 %v3831_v39  ;;  %5957 = vst [vmem:[#allocation19_spill] sm:$0xff] %v4653_v38  ;;  %v3911_v33 = vunpack.c.l.bf16 %v4230_v7  ;;  %v3927_v39 = vunpack.c.l.bf16 %v4234_v9  ;;  %v530_v0 = vrot.slane %v4653_v38, 7  ;;  %v3838_v7 = vld [vmem:[%s5793_s3 + $0x108] sm:$0xff]  ;;  %v5960_v9 = vrot.slane %v4601_v52, 7  ;;  %v3869_v38 = vld [vmem:[%s5793_s3 + $0x80] sm:$0xff]  ;;  %vm4741_vm10 = vmpackc.low %vm5884_vm4, %vm4681_vm2 }
  0x42   : > { %1481 = vmatpush.bf16.msrb.mxu1 %v3863_v40  ;;  %1892 = vmatpush.bf16.msrb.mxu0 %v3839_v24  ;;  %v566_v62 = vsel %vm5836_vm0, %v5961_v43, %v506_v53  ;;  %v466_v40 = vand.u32 15, %v434_v27  ;;  %v558_v27 = vsel %vm5836_vm0, %v5965_v48, %v514_v32  ;;  %vm4704_vm3 = vcmp.ne.s32.totalorder %v458_v35, 0 }
  0x43   : > { %v565_v14 = vsel %vm5836_vm0, %v506_v53, %v5960_v9  ;;  %v3829_v9 = vld [vmem:[%s5793_s3 + $0xc0] sm:$0xff]  ;;  %v557_v53 = vsel %vm5836_vm0, %v514_v32, %v5964_v36  ;;  %v5969_v17 = vrot.slane %v4631_v51, 7  ;;  %v311_v36 = vmul.f32 %v4222_v5, %v3911_v33  ;;  %vm4752_vm12 = vmpackc.low %vm5884_vm4, %vm4704_vm3 }
  0x44   : > { %v319_v15 = vmul.f32 %v4222_v5, %v3927_v39  ;;  %v327_v32 = vmul.f32 %v4222_v5, %v3943_v63  ;;  %v5970_v48 = vrot.slane %v4655_v29, 7  ;;  %v5971_v35 = vrot.slane %v4499_v1, 7 }
  0x45   : > { %1571 = vmatpush.bf16.msrb.mxu2 %v3870_v12  ;;  %1804 = vmatpush.bf16.msrb.mxu3 %v3830_v21  ;;  %v5966_v12 = vrot.slane %v4444_v34, 7  ;;  %v549_v26 = vsel %vm5836_vm0, %v522_v23, %v5969_v17  ;;  %v3959_v4 = vunpack.c.l.bf16 %v4058_v44  ;;  %v3960_v60 = vunpack.c.h.bf16 %v4058_v44  ;;  %v3837_v17 = vld [vmem:[%s5793_s3 + $0x100] sm:$0xff] }
  0x46   : > { %v542_v11 = vsel %vm5836_vm0, %v5971_v35, %v530_v0  ;;  %1482 = vmatpush.bf16.msrb.mxu1 %v3862_v57  ;;  %1893 = vmatpush.bf16.msrb.mxu0 %v3838_v7  ;;  %vm4088_vm9 = vcmp.ne.s32.totalorder %v466_v40, 0  ;;  %v4736_v44 = vpack.c.bf16 %v565_v14, %v566_v62  ;;  %v5974_v33 = vmov 0 }
  0x47   : > { %v550_v21 = vsel %vm5836_vm0, %v5966_v12, %v522_v23  ;;  %v541_v12 = vsel %vm5836_vm0, %v530_v0, %v5970_v48  ;;  %v3861_v23 = vld [vmem:[%s5793_s3 + $0x40] sm:$0xff]  ;;  %v5975_v33 = vsel %vm4741_vm10, 4294967295, %v5974_v33  ;;  %v4745_v39 = vpack.c.bf16 %v557_v53, %v558_v27  ;;  %vm4763_vm1 = vmpackc.low %vm5884_vm4, %vm4088_vm9  ;;  %v3892_v53 = vld [vmem:[%s5793_s3 + $0x1f8] sm:$0xff] }
  0x48   : > { %5976 = vst [vmem:[#allocation20_spill] sm:$0xff] %v5975_v33  ;;  %v335_v61 = vmul.f32 %v4222_v5, %v3959_v4  ;;  %v336_v0 = vmul.f32 %v4222_v5, %v3960_v60  ;;  %v4756_v62 = vpack.c.bf16 %v549_v26, %v550_v21  ;;  %v4758_v57 = vpack.c.bf16 %v541_v12, %v542_v11  ;;  %v3852_v27 = vld [vmem:[%s5793_s3 + $0x178] sm:$0xff] }
  0x49   : > { %1572 = vmatpush.bf16.msrb.mxu2 %v3869_v38  ;;  %1805 = vmatpush.bf16.msrb.mxu3 %v3829_v9  ;;  %5977 = vst [vmem:[#allocation21_spill] sm:$0xff] %v4745_v39  ;;  %v5978_v38 = vmov 0  ;;  %v347_v7 = vadd.f32 %v4227_v6, %v311_v36  ;;  %v355_v14 = vadd.f32 %v4227_v6, %v319_v15  ;;  %v5980_v4 = vmov 0  ;;  %v3884_v9 = vld [vmem:[%s5793_s3 + $0x1b8] sm:$0xff] }
  0x4a   : > { %v5979_v38 = vsel %vm4752_vm12, 4294967295, %v5978_v38  ;;  %v5981_v4 = vsel %vm4763_vm1, 4294967295, %v5980_v4  ;;  %v363_v5 = vadd.f32 %v4227_v6, %v327_v32  ;;  %v371_v60 = vadd.f32 %v4227_v6, %v335_v61  ;;  %1483 = vmatpush.bf16.msrb.mxu1 %v3861_v23  ;;  %1894 = vmatpush.bf16.msrb.mxu0 %v3837_v17  ;;  %v3900_v32 = vld [vmem:[%s5793_s3 + $0x238] sm:$0xff] }
  0x4b   : > { %v372_v24 = vadd.f32 %v4227_v6, %v336_v0  ;;  %3226 = vmatmul.msk.bf16.gmra.mxu0 %vm4732_vm8, %v4736_v44  ;;  %3242 = vmatmul.msk.bf16.gmra.mxu1 %vm4741_vm10, %v4745_v39  ;;  %v412_v11 = vadd.s32 32, %v4207_v3  ;;  %v420_v15 = vadd.s32 96, %v4207_v3  ;;  %v428_v26 = vadd.s32 160, %v4207_v3 }
  0x4c   : > { %3258 = vmatmul.msk.bf16.gmra.mxu2 %vm4752_vm12, %v4756_v62  ;;  %3274 = vmatmul.msk.bf16.gmra.mxu3 %vm4763_vm1, %v4758_v57  ;;  %v4785_v6 = vmax.f32 %v347_v7, 0.0  ;;  %v4787_v40 = vmax.f32 %v355_v14, 0.0  ;;  %v4798_v21 = vmax.f32 %v363_v5, 0.0  ;;  %v4800_v43 = vmax.f32 %v371_v60, 0.0 }
  0x4d   : > { %v4802_v36 = vmax.f32 %v372_v24, 0.0  ;;  %v436_v48 = vadd.s32 224, %v4207_v3  ;;  %2498 = vmatpush.bf16.msra.mxu2 %v3884_v9  ;;  %2587 = vmatpush.bf16.msra.mxu3 %v3892_v53  ;;  %v444_v12 = vand.u32 15, %v412_v11  ;;  %v452_v35 = vand.u32 15, %v420_v15 }
  0x4e   : > { %v460_v23 = vand.u32 15, %v428_v26  ;;  %1976 = vmatpush.bf16.msra.mxu1 %v3852_v27  ;;  %2676 = vmatpush.bf16.msra.mxu0 %v3900_v32  ;;  %v508_v17 = vrot.slane %v4785_v6, 7  ;;  %v516_v61 = vrot.slane %v4787_v40, 7  ;;  %v524_v0 = vrot.slane %v4798_v21, 7 }
  0x4f   : > { %v532_v7 = vrot.slane %v4800_v43, 7  ;;  %v5834_v14 = vrot.slane %v4802_v36, 7  ;;  %v468_v5 = vand.u32 15, %v436_v48  ;;  %vm4077_vm2 = vcmp.ne.s32.totalorder %v444_v12, 0 }
  0x50   : > { %vm4081_vm3 = vcmp.ne.s32.totalorder %v452_v35, 0  ;;  %vm4085_vm9 = vcmp.ne.s32.totalorder %v460_v23, 0  ;;  %v5982_v60 = vrot.slane %v4269_v41, 7  ;;  %v5983_v11 = vrot.slane %v4601_v52, 7  ;;  %vm4846_vm1 = vmpackc.low %vm5884_vm4, %vm4077_vm2 }
  0x51   : > { %v5984_v26 = vrot.slane %v4276_v46, 7  ;;  %v5985_v53 = vrot.slane %v4605_v13, 7  ;;  %v5986_v32 = vrot.slane %v4289_v54, 7  ;;  %v5987_v12 = vrot.slane %v4631_v51, 7  ;;  %vm4853_vm7 = vmpackc.low %vm5884_vm4, %vm4081_vm3 }
  0x52   : > { %v563_v24 = vsel %vm5836_vm0, %v508_v17, %v5982_v60  ;;  %v564_v15 = vsel %vm5836_vm0, %v5983_v11, %v508_v17  ;;  %v539_v23 = vsel %vm5836_vm0, %v532_v7, %v5834_v14  ;;  %v5988_v17 = vrot.slane %v4655_v29, 7  ;;  %vm4860_vm12 = vmpackc.low %vm5884_vm4, %vm4085_vm9 }
  0x53   : > { %v555_v9 = vsel %vm5836_vm0, %v516_v61, %v5984_v26  ;;  %v556_v27 = vsel %vm5836_vm0, %v5985_v53, %v516_v61  ;;  %v547_v48 = vsel %vm5836_vm0, %v524_v0, %v5986_v32  ;;  %v548_v35 = vsel %vm5836_vm0, %v5987_v12, %v524_v0  ;;  %v3899_v12 = vld [vmem:[%s5793_s3 + $0x230] sm:$0xff] }
  0x54   : > { %v540_v61 = vsel %vm5836_vm0, %v5988_v17, %v532_v7  ;;  %v5989_v60 = vmov 0  ;;  %vm4089_vm15 = vcmp.ne.s32.totalorder %v468_v5, 0  ;;  %v4850_v11 = vpack.c.bf16 %v563_v24, %v564_v15  ;;  %2677 = vmatpush.bf16.msra.mxu0 %v3899_v12 }
  0x55   : > { %v5990_v60 = vsel %vm4846_vm1, 4294967295, %v5989_v60  ;;  %v5992_v0 = vmov 0  ;;  %v4857_v26 = vpack.c.bf16 %v555_v9, %v556_v27  ;;  %v5996_v53 = vmov 0  ;;  %vm4869_vm2 = vmpackc.low %vm5884_vm4, %vm4089_vm15  ;;  %v3883_v9 = vld [vmem:[%s5793_s3 + $0x1b0] sm:$0xff] }
  0x56   : > { %5991 = vst [vmem:[#allocation22_spill] sm:$0xff] %v5990_v60  ;;  %v5993_v0 = vsel %vm4853_vm7, 4294967295, %v5992_v0  ;;  %v5997_v53 = vsel %vm4860_vm12, 4294967295, %v5996_v53  ;;  %v4864_v7 = vpack.c.bf16 %v547_v48, %v548_v35  ;;  %v4866_v32 = vpack.c.bf16 %v539_v23, %v540_v61  ;;  %v3891_v27 = vld [vmem:[%s5793_s3 + $0x1f0] sm:$0xff]  ;;  %2499 = vmatpush.bf16.msra.mxu2 %v3883_v9 }
  0x57   : > { %5994 = vst [vmem:[#allocation23_spill] sm:$0xff] %v5993_v0  ;;  %v6000_v5 = vmov 0  ;;  %v859_v24 = vpack.c.bf16 %v4381_v58, %v4367_v50  ;;  %v6003_v15 = vmov 0.0|0.0   ;;  %v3851_v48 = vld [vmem:[%s5793_s3 + $0x170] sm:$0xff]  ;;  %v409_v35 = vadd.s32 8, %v4207_v3  ;;  %2588 = vmatpush.bf16.msra.mxu3 %v3891_v27 }
  0x58   : > { %5995 = vst [vmem:[#allocation24_spill] sm:$0xff] %v4857_v26  ;;  %v6001_v5 = vsel %vm4869_vm2, 4294967295, %v6000_v5  ;;  %1977 = vmatpush.bf16.msra.mxu1 %v3851_v48  ;;  %v5833_v8 = vrot.slane %v4367_v50, 1  ;;  %v699_v23 = vrot.slane %v4592_v25, 1  ;;  %v4917_v27 = vpack.c.bf16 %v4601_v52, %v4592_v25 }
  0x59   : > { %5998 = vst [vmem:[#allocation25_spill] sm:$0xff] %v5997_v53  ;;  %v441_v17 = vand.u32 15, %v409_v35  ;;  %v411_v25 = vadd.s32 24, %v4207_v3  ;;  %v700_v12 = vrot.slane %v4601_v52, 1  ;;  %v701_v35 = vrot.slane %v4785_v6, 1  ;;  %v3882_v52 = vld [vmem:[%s5793_s3 + $0x1a8] sm:$0xff] }
  0x5a   : > { %5999 = vst [vmem:[#allocation26_spill] sm:$0xff] %v4864_v7  ;;  %2500 = vmatpush.bf16.msra.mxu2 %v3882_v52  ;;  %v710_v0 = vrot.slane %v4276_v46, 1  ;;  %v6046_v60 = vmov 0  ;;  %v714_v37 = vrot.slane %v4444_v34, 1 }
  0x5b   : > { %6002 = vst [vmem:[#allocation27_spill] sm:$0xff] %v6001_v5  ;;  %3230 = vmatmul.msk.bf16.gmra.mxu0 %vm4846_vm1, %v4850_v11  ;;  %3246 = vmatmul.msk.bf16.gmra.mxu1 %vm4853_vm7, %v4857_v26  ;;  %vm4090_vm15 = vcmp.ne.s32.totalorder %v441_v17, 15  ;;  %v6101_v5 = vrot.slane %v4802_v36, 7 }
  0x5c   : > { %3262 = vmatmul.msk.bf16.gmra.mxu2 %vm4860_vm12, %v4864_v7  ;;  %3278 = vmatmul.msk.bf16.gmra.mxu3 %vm4869_vm2, %v4866_v32  ;;  %vm4922_vm3 = vmpackc.low %vm4090_vm15, %vm5884_vm4 }
  0x6b   : > { %1484 = vmatmul.bf16.vlgmr.msrb.gmra.mxu1 %v6003_v15  ;;  %1895 = vmatmul.bf16.vlgmr.msrb.gmra.mxu0 %v859_v24 }
  0x6c   : > { %1573 = vmatmul.bf16.vlgmr.msrb.gmra.mxu2 %v6003_v15  ;;  %3438 = vmatmul.msk.bf16.vlgmr.msrb.gmra.mxu3 %vm4527_vm11, %v4560_v28  ;;  %v698_v28 = vrot.slane %v4381_v58, 1  ;;  %vm5883_vm11 = vcmp.lt.s32.totalorder %v4207_v3, 7 }
  0x6d   : > { %v758_v17 = vsel %vm5883_vm11, %v699_v23, %v700_v12 }
  0x6e   : > { %v759_v61 = vsel %vm5883_vm11, %v698_v28, %v699_v23  ;;  %v760_v9 = vsel %vm5883_vm11, %v5833_v8, %v698_v28  ;;  %v443_v28 = vand.u32 15, %v411_v25  ;;  %v413_v23 = vadd.s32 40, %v4207_v3  ;;  %v3850_v25 = vld [vmem:[%s5793_s3 + $0x168] sm:$0xff] }
  0x6f   : > { %v4919_v48 = vpack.c.bf16 %v759_v61, %v760_v9  ;;  %v4942_v61 = vpack.c.bf16 %v4269_v41, %v4785_v6  ;;  %v3890_v6 = vld [vmem:[%s5793_s3 + $0x1e8] sm:$0xff]  ;;  %1978 = vmatpush.bf16.msra.mxu1 %v3850_v25 }
  0x70   : > { %vm4091_vm9 = vcmp.ne.s32.totalorder %v443_v28, 15  ;;  %2589 = vmatpush.bf16.msra.mxu3 %v3890_v6  ;;  %v702_v28 = vrot.slane %v4269_v41, 1  ;;  %v4980_v6 = vpack.c.bf16 %v4274_v45, %v4271_v42 }
  0x71   : > { %6006 = vst [vmem:[#allocation28_spill] sm:$0xff] %v4942_v61  ;;  %vm4947_vm15 = vmpackc.low %vm4091_vm9, %vm5884_vm4 }
  0x72   : > { %v756_v52 = vsel %vm5883_vm11, %v701_v35, %v702_v28  ;;  %6009 = vst [vmem:[#allocation29_spill] sm:$0xff] %v4980_v6 }
  0x73   : > { %1979 = vmatpush.bf16.msra.mxu1 %v3849_v30 }
  0x7b   : > { %1489 = vmatmul.bf16.gmra.mxu1 %v859_v24  ;;  %1900 = vmatmul.bf16.gmra.mxu0 %v4917_v27  ;;  %v757_v24 = vsel %vm5883_vm11, %v700_v12, %v701_v35  ;;  %v3898_v12 = vld [vmem:[%s5793_s3 + $0x228] sm:$0xff]  ;;  %v705_v35 = vrot.slane %v4412_v18, 1 }
  0x7c   : > { %3282 = vmatmul.msk.bf16.gmra.mxu2 %vm4922_vm3, %v4919_v48  ;;  %3442 = vmatmul.msk.bf16.gmra.mxu3 %vm4732_vm8, %v4736_v44  ;;  %v4944_v9 = vpack.c.bf16 %v757_v24, %v758_v17  ;;  %v703_v24 = vrot.slane %v4271_v42, 1  ;;  %v445_v17 = vand.u32 15, %v413_v23  ;;  %v415_v42 = vadd.s32 56, %v4207_v3 }
  0x7d   : > { %2678 = vmatpush.bf16.msra.mxu0 %v3898_v12 }
  0x7e   : > { %v755_v14 = vsel %vm5883_vm11, %v702_v28, %v703_v24  ;;  %vm4092_vm9 = vcmp.ne.s32.totalorder %v445_v17, 15  ;;  %v447_v23 = vand.u32 15, %v415_v42  ;;  %v5006_v28 = vpack.c.bf16 %v4414_v19, %v4412_v18  ;;  %v3881_v18 = vld [vmem:[%s5793_s3 + $0x1a0] sm:$0xff] }
  0x7f   : > { %v4982_v15 = vpack.c.bf16 %v755_v14, %v756_v52  ;;  %vm4985_vm0 = vmpackc.low %vm4092_vm9, %vm5884_vm4  ;;  %v704_v14 = vrot.slane %v4274_v45, 1  ;;  %v6014_v45 = vmov 0  ;;  %v417_v42 = vadd.s32 72, %v4207_v3  ;;  %2501 = vmatpush.bf16.msra.mxu2 %v3881_v18 }
  0x80   : > { %vm4093_vm9 = vcmp.ne.s32.totalorder %v447_v23, 15  ;;  %6012 = vst [vmem:[#allocation30_spill] sm:$0xff] %v5006_v28  ;;  %v707_v18 = vrot.slane %v4603_v20, 1 }
  0x81   : > { %v753_v25 = vsel %vm5883_vm11, %v704_v14, %v705_v35  ;;  %v754_v12 = vsel %vm5883_vm11, %v703_v24, %v704_v14  ;;  %v3889_v24 = vld [vmem:[%s5793_s3 + $0x1e0] sm:$0xff] }
  0x82   : > { %v5012_v50 = vpack.c.bf16 %v753_v25, %v754_v12  ;;  %2590 = vmatpush.bf16.msra.mxu3 %v3889_v24  ;;  %v449_v24 = vand.u32 15, %v417_v42 }
  0x84   : > { %6013 = vst [vmem:[#allocation31_spill] sm:$0xff] %v5012_v50 }
  0x8b   : > { %1494 = vmatmul.bf16.gmra.mxu1 %v4917_v27  ;;  %1905 = vmatmul.bf16.gmra.mxu0 %v4942_v61 }
  0x8c   : > { %3286 = vmatmul.msk.bf16.gmra.mxu2 %vm4947_vm15, %v4944_v9  ;;  %3446 = vmatmul.msk.bf16.gmra.mxu3 %vm4846_vm1, %v4850_v11 }
  0x9b   : > { %1499 = vmatmul.bf16.gmra.mxu1 %v4942_v61  ;;  %1910 = vmatmul.bf16.gmra.mxu0 %v4980_v6  ;;  %v6030_v61 = vmov 0 }
  0x9c   : > { %3290 = vmatmul.msk.bf16.gmra.mxu2 %vm4985_vm0, %v4982_v15  ;;  %3450 = vmatmul.msk.bf16.gmra.mxu3 %vm4375_vm5, %v4379_v56  ;;  %vm5015_vm5 = vmpackc.low %vm4093_vm9, %vm5884_vm4  ;;  %vm4094_vm9 = vcmp.ne.s32.totalorder %v449_v24, 15  ;;  %v708_v24 = vrot.slane %v4605_v13, 1 }
  0x9d   : > { %v6015_v45 = vsel %vm5015_vm5, 4294967295, %v6014_v45 }
  0x9e   : > { %6016 = vst [vmem:[#allocation32_spill] sm:$0xff] %v6015_v45  ;;  %v750_v33 = vsel %vm5883_vm11, %v707_v18, %v708_v24 }
  0xa8   : > { %v5008_v17 = vpop.f32.mrf.mxu0  ;;  %v5010_v52 = vpop.f32.mrf.mxu1 }
  0xab   : > { %1504 = vmatmul.bf16.gmra.mxu1 %v4980_v6  ;;  %1915 = vmatmul.bf16.gmra.mxu0 %v5006_v28  ;;  %v706_v6 = vrot.slane %v4414_v19, 1 }
  0xac   : > { %3294 = vmatmul.msk.bf16.gmra.mxu2 %vm5015_vm5, %v5012_v50  ;;  %3454 = vmatmul.msk.bf16.gmra.mxu3 %vm4565_vm13, %v4569_v10  ;;  %v3897_v10 = vld [vmem:[%s5793_s3 + $0x220] sm:$0xff]  ;;  %v5060_v50 = vpack.c.bf16 %v4605_v13, %v4603_v20  ;;  %vm5069_vm13 = vmpackc.low %vm4094_vm9, %vm5884_vm4 }
  0xad   : > { %2679 = vmatpush.bf16.msra.mxu0 %v3897_v10  ;;  %v752_v55 = vsel %vm5883_vm11, %v705_v35, %v706_v6  ;;  %v6021_v10 = vmov 0 }
  0xae   : > { %6019 = vst [vmem:[#allocation35_spill] sm:$0xff] %v5060_v50  ;;  %v6022_v10 = vsel %vm5069_vm13, 4294967295, %v6021_v10 }
  0xaf   : > { %v5034_v14 = vpop.f32.mrf.mxu2  ;;  %v5036_v23 = vpop.f32.mrf.mxu3  ;;  %6023 = vst [vmem:[#allocation37_spill] sm:$0xff] %v6022_v10 }
  0xb0   : > { %6017 = vst [vmem:[#allocation33_spill] sm:$0xff] %v5036_v23  ;;  %v5038_v25 = vpop.f32.mrf.mxu0  ;;  %v5040_v12 = vpop.f32.mrf.mxu1  ;;  %v751_v23 = vsel %vm5883_vm11, %v706_v6, %v707_v18 }
  0xb1   : > { %v5066_v30 = vpack.c.bf16 %v751_v23, %v752_v55  ;;  %v419_v55 = vadd.s32 88, %v4207_v3 }
  0xb3   : > { %6020 = vst [vmem:[#allocation36_spill] sm:$0xff] %v5066_v30 }
  0xb7   : > { %v5054_v56 = vpop.f32.mrf.mxu2  ;;  %v5056_v45 = vpop.f32.mrf.mxu3 }
  0xb8   : > { %6018 = vst [vmem:[#allocation34_spill] sm:$0xff] %v5056_v45  ;;  %v5062_v19 = vpop.f32.mrf.mxu0  ;;  %v5064_v42 = vpop.f32.mrf.mxu1  ;;  %v709_v45 = vrot.slane %v4787_v40, 1 }
  0xba   : > { %v749_v10 = vsel %vm5883_vm11, %v708_v24, %v709_v45 }
  0xbb   : > { %1509 = vmatmul.bf16.gmra.mxu1 %v5006_v28  ;;  %1920 = vmatmul.bf16.gmra.mxu0 %v5060_v50  ;;  %v451_v28 = vand.u32 15, %v419_v55  ;;  %v5108_v55 = vpack.c.bf16 %v749_v10, %v750_v33  ;;  %v3880_v33 = vld [vmem:[%s5793_s3 + $0x198] sm:$0xff] }
  0xbc   : > { %3298 = vmatmul.msk.bf16.gmra.mxu2 %vm5069_vm13, %v5066_v30  ;;  %3458 = vmatmul.msk.bf16.gmra.mxu3 %vm4741_vm10, %v4745_v39 }
  0xbd   : > { %vm4095_vm9 = vcmp.ne.s32.totalorder %v451_v28, 15  ;;  %6029 = vst [vmem:[#allocation43_spill] sm:$0xff] %v5108_v55  ;;  %v421_v28 = vadd.s32 104, %v4207_v3  ;;  %2502 = vmatpush.bf16.msra.mxu2 %v3880_v33  ;;  %v3896_v33 = vld [vmem:[%s5793_s3 + $0x218] sm:$0xff] }
  0xbe   : > { %vm5111_vm10 = vmpackc.low %vm4095_vm9, %vm5884_vm4  ;;  %2680 = vmatpush.bf16.msra.mxu0 %v3896_v33  ;;  %v6039_v33 = vmov 0 }
  0xbf   : > { %v5082_v20 = vpop.f32.mrf.mxu2  ;;  %v5084_v6 = vpop.f32.mrf.mxu3  ;;  %v6031_v61 = vsel %vm5111_vm10, 4294967295, %v6030_v61 }
  0xc0   : > { %6024 = vst [vmem:[#allocation38_spill] sm:$0xff] %v5082_v20  ;;  %v5086_v35 = vpop.f32.mrf.mxu0  ;;  %v5088_v23 = vpop.f32.mrf.mxu1 }
  0xc1   : > { %6025 = vst [vmem:[#allocation39_spill] sm:$0xff] %v5084_v6  ;;  %v5102_v6 = vpack.c.bf16 %v4276_v46, %v4787_v40  ;;  %v3888_v40 = vld [vmem:[%s5793_s3 + $0x1d8] sm:$0xff] }
  0xc2   : > { %6032 = vst [vmem:[#allocation44_spill] sm:$0xff] %v6031_v61  ;;  %2591 = vmatpush.bf16.msra.mxu3 %v3888_v40  ;;  %v3848_v61 = vld [vmem:[%s5793_s3 + $0x158] sm:$0xff] }
  0xc3   : > { %6028 = vst [vmem:[#allocation42_spill] sm:$0xff] %v5102_v6  ;;  %1980 = vmatpush.bf16.msra.mxu1 %v3848_v61 }
  0xc7   : > { %v5096_v39 = vpop.f32.mrf.mxu2  ;;  %v5098_v30 = vpop.f32.mrf.mxu3 }
  0xc8   : > { %6026 = vst [vmem:[#allocation40_spill] sm:$0xff] %v5096_v39  ;;  %v5104_v20 = vpop.f32.mrf.mxu0  ;;  %v5106_v13 = vpop.f32.mrf.mxu1 }
  0xc9   : > { %6027 = vst [vmem:[#allocation41_spill] sm:$0xff] %v5098_v30 }
  0xcb   : > { %1514 = vmatmul.bf16.gmra.mxu1 %v5060_v50  ;;  %1925 = vmatmul.bf16.gmra.mxu0 %v5102_v6  ;;  %v453_v50 = vand.u32 15, %v421_v28 }
  0xcc   : > { %3302 = vmatmul.msk.bf16.gmra.mxu2 %vm5111_vm10, %v5108_v55  ;;  %3462 = vmatmul.msk.bf16.gmra.mxu3 %vm4853_vm7, %v4857_v26  ;;  %v711_v26 = vrot.slane %v4278_v47, 1  ;;  %v5156_v55 = vpack.c.bf16 %v4282_v49, %v4278_v47  ;;  %v423_v47 = vadd.s32 120, %v4207_v3 }
  0xcd   : > { %vm4096_vm9 = vcmp.ne.s32.totalorder %v453_v50, 15 }
  0xce   : > { %v747_v40 = vsel %vm5883_vm11, %v710_v0, %v711_v26  ;;  %6037 = vst [vmem:[#allocation49_spill] sm:$0xff] %v5156_v55  ;;  %vm5165_vm7 = vmpackc.low %vm4096_vm9, %vm5884_vm4 }
  0xcf   : > { %v5130_v18 = vpop.f32.mrf.mxu2  ;;  %v5132_v10 = vpop.f32.mrf.mxu3  ;;  %v6040_v33 = vsel %vm5165_vm7, 4294967295, %v6039_v33 }
  0xd0   : > { %6033 = vst [vmem:[#allocation45_spill] sm:$0xff] %v5130_v18  ;;  %v5134_v24 = vpop.f32.mrf.mxu0  ;;  %v5136_v30 = vpop.f32.mrf.mxu1 }
  0xd1   : > { %6034 = vst [vmem:[#allocation46_spill] sm:$0xff] %v5132_v10  ;;  %v748_v10 = vsel %vm5883_vm11, %v709_v45, %v710_v0 }
  0xd2   : > { %v5162_v61 = vpack.c.bf16 %v747_v40, %v748_v10  ;;  %6041 = vst [vmem:[#allocation51_spill] sm:$0xff] %v6040_v33  ;;  %v712_v40 = vrot.slane %v4282_v49, 1 }
  0xd4   : > { %6038 = vst [vmem:[#allocation50_spill] sm:$0xff] %v5162_v61  ;;  %v746_v59 = vsel %vm5883_vm11, %v711_v26, %v712_v40  ;;  %v425_v26 = vadd.s32 136, %v4207_v3 }
  0xd7   : > { %v5150_v46 = vpop.f32.mrf.mxu2  ;;  %v5152_v28 = vpop.f32.mrf.mxu3 }
  0xd8   : > { %6035 = vst [vmem:[#allocation47_spill] sm:$0xff] %v5150_v46  ;;  %v5158_v18 = vpop.f32.mrf.mxu0  ;;  %v5160_v39 = vpop.f32.mrf.mxu1 }
  0xd9   : > { %6036 = vst [vmem:[#allocation48_spill] sm:$0xff] %v5152_v28  ;;  %v713_v28 = vrot.slane %v4431_v31, 1 }
  0xdb   : > { %1519 = vmatmul.bf16.gmra.mxu1 %v5102_v6  ;;  %1930 = vmatmul.bf16.gmra.mxu0 %v5156_v55  ;;  %v455_v6 = vand.u32 15, %v423_v47  ;;  %v745_v33 = vsel %vm5883_vm11, %v712_v40, %v713_v28 }
  0xdc   : > { %3306 = vmatmul.msk.bf16.gmra.mxu2 %vm5165_vm7, %v5162_v61  ;;  %3466 = vmatmul.msk.bf16.gmra.mxu3 %vm4389_vm6, %v4393_v2  ;;  %v5200_v46 = vpack.c.bf16 %v745_v33, %v746_v59  ;;  %v3879_v59 = vld [vmem:[%s5793_s3 + $0x190] sm:$0xff] }
  0xdd   : > { %vm4097_vm9 = vcmp.ne.s32.totalorder %v455_v6, 15  ;;  %2503 = vmatpush.bf16.msra.mxu2 %v3879_v59  ;;  %v3895_v59 = vld [vmem:[%s5793_s3 + $0x210] sm:$0xff] }
  0xde   : > { %6045 = vst [vmem:[#allocation55_spill] sm:$0xff] %v5200_v46  ;;  %vm5204_vm6 = vmpackc.low %vm4097_vm9, %vm5884_vm4  ;;  %2681 = vmatpush.bf16.msra.mxu0 %v3895_v59 }
  0xdf   : > { %v5178_v50 = vpop.f32.mrf.mxu2  ;;  %v5180_v0 = vpop.f32.mrf.mxu3  ;;  %v6047_v60 = vsel %vm5204_vm6, 4294967295, %v6046_v60 }
  0xe0   : > { %6042 = vst [vmem:[#allocation52_spill] sm:$0xff] %v5178_v50  ;;  %v5182_v45 = vpop.f32.mrf.mxu0  ;;  %v5184_v10 = vpop.f32.mrf.mxu1 }
  0xe1   : > { %6043 = vst [vmem:[#allocation53_spill] sm:$0xff] %v5180_v0  ;;  %v5198_v0 = vpack.c.bf16 %v4444_v34, %v4431_v31  ;;  %v3887_v31 = vld [vmem:[%s5793_s3 + $0x1d0] sm:$0xff]  ;;  %v744_v34 = vsel %vm5883_vm11, %v713_v28, %v714_v37 }
  0xe2   : > { %6048 = vst [vmem:[#allocation56_spill] sm:$0xff] %v6047_v60  ;;  %2592 = vmatpush.bf16.msra.mxu3 %v3887_v31  ;;  %v457_v60 = vand.u32 15, %v425_v26 }
  0xe4   : > { %vm4098_vm9 = vcmp.ne.s32.totalorder %v457_v60, 15  ;;  %v427_v60 = vadd.s32 152, %v4207_v3 }
  0xe7   : > { %v5192_v2 = vpop.f32.mrf.mxu2  ;;  %v5194_v61 = vpop.f32.mrf.mxu3 }
  0xe8   : > { %6044 = vst [vmem:[#allocation54_spill] sm:$0xff] %v5194_v61  ;;  %v1485_v50 = vpop.f32.mrf.mxu1  ;;  %v1896_v49 = vpop.f32.mrf.mxu0 }
  0xe9   : > { %v1486_v47 = vadd.f32 %v1485_v50, %v5008_v17 }
  0xeb   : > { %1524 = vmatmul.bf16.gmra.mxu1 %v5156_v55  ;;  %1935 = vmatmul.bf16.gmra.mxu0 %v5198_v0 }
  0xec   : > { %3310 = vmatmul.msk.bf16.gmra.mxu2 %vm5204_vm6, %v5200_v46  ;;  %3470 = vmatmul.msk.bf16.gmra.mxu3 %vm4575_vm14, %v4579_v16  ;;  %v715_v16 = vrot.slane %v4620_v22, 1  ;;  %v3847_v46 = vld [vmem:[%s5793_s3 + $0x150] sm:$0xff]  ;;  %vm5246_vm14 = vmpackc.low %vm4098_vm9, %vm5884_vm4  ;;  %vm6055_vm9 = vcmp.lt.s32.totalorder %v4207_v3, 7 }
  0xed   : > { %1981 = vmatpush.bf16.msra.mxu1 %v3847_v46  ;;  %vm6056_vm4 = vmmov %vm6055_vm9 }
  0xef   : > { %v1574_v17 = vpop.f32.mrf.mxu2  ;;  %v1807_v6 = vpop.f32.mrf.mxu3 }
  0xf0   : > { %v1575_v33 = vadd.f32 %v1574_v17, %v1486_v47  ;;  %v1487_v50 = vpop.f32.mrf.mxu1  ;;  %v1898_v40 = vpop.f32.mrf.mxu0  ;;  %v5240_v17 = vpack.c.bf16 %v4631_v51, %v4620_v22 }
  0xf1   : > { %v1488_v61 = vadd.f32 %v1487_v50, %v5038_v25  ;;  %v743_v25 = vsel %vm5883_vm11, %v714_v37, %v715_v16  ;;  %vm6052_vm11 = vnez %v5979_v38 }
  0xf2   : > { %v1808_v55 = vadd.f32 %v1807_v6, %v1575_v33  ;;  %v5242_v46 = vpack.c.bf16 %v743_v25, %v744_v34 }
  0xf4   : > { %v5232_v47 = vadd.f32 %v1896_v49, %v1808_v55  ;;  %v6050_v49 = vmov 0 }
  0xf5   : > { %v6051_v49 = vsel %vm5246_vm14, 4294967295, %v6050_v49 }
  0xf6   : > { %6049 = vst [vmem:[#allocation57_spill] sm:$0xff] %v5232_v47 }
  0xf7   : > { %v1576_v31 = vpop.f32.mrf.mxu2  ;;  %v1809_v26 = vpop.f32.mrf.mxu3 }
  0xf8   : > { %v1577_v6 = vadd.f32 %v1576_v31, %v1488_v61  ;;  %v1490_v33 = vpop.f32.mrf.mxu1  ;;  %v1901_v50 = vpop.f32.mrf.mxu0  ;;  %v716_v31 = vrot.slane %v4631_v51, 1 }
  0xf9   : > { %v1491_v55 = vadd.f32 %v1490_v33, %v5062_v19  ;;  %v459_v33 = vand.u32 15, %v427_v60  ;;  %v6059_v60 = vmov 0 }
  0xfa   : > { %v1810_v37 = vadd.f32 %v1809_v26, %v1577_v6  ;;  %v717_v26 = vrot.slane %v4798_v21, 1 }
  0xfb   : > { %1529 = vmatmul.bf16.gmra.mxu1 %v5198_v0  ;;  %1940 = vmatmul.bf16.gmra.mxu0 %v5240_v17 }
  0xfc   : > { %3314 = vmatmul.msk.bf16.gmra.mxu2 %vm5246_vm14, %v5242_v46  ;;  %3474 = vmatmul.msk.bf16.gmra.mxu3 %vm6052_vm11, %v4756_v62  ;;  %v5258_v22 = vadd.f32 %v1898_v40, %v1810_v37  ;;  %v741_v40 = vsel %vm6055_vm9, %v716_v31, %v717_v26  ;;  %v742_v37 = vsel %vm6056_vm4, %v715_v16, %v716_v31  ;;  %vm4099_vm11 = vcmp.ne.s32.totalorder %v459_v33, 15 }
  0xfd   : > { %vm6058_vm14 = vmmov 1  }
  0xfe   : > { %6053 = vst [vmem:[#allocation58_spill] sm:$0xff] %v5258_v22  ;;  %vm5278_vm6 = vmpackc.low %vm4099_vm11, %vm6058_vm14 }
  0xff   : > { %v1579_v19 = vpop.f32.mrf.mxu2  ;;  %v1812_v28 = vpop.f32.mrf.mxu3  ;;  %v6060_v60 = vsel %vm5278_vm6, 4294967295, %v6059_v60  ;;  %vm6064_vm11 = vmmov %vm6056_vm4 }
 0x100   : > { %v1580_v61 = vadd.f32 %v1579_v19, %v1491_v55  ;;  %v1492_v59 = vpop.f32.mrf.mxu1  ;;  %v1903_v25 = vpop.f32.mrf.mxu0 }
 0x101   : > { %v1493_v34 = vadd.f32 %v1492_v59, %v5086_v35  ;;  %v5272_v35 = vpack.c.bf16 %v4289_v54, %v4798_v21  ;;  %v3878_v21 = vld [vmem:[%s5793_s3 + $0x188] sm:$0xff] }
 0x102   : > { %v1813_v6 = vadd.f32 %v1812_v28, %v1580_v61  ;;  %v5274_v28 = vpack.c.bf16 %v741_v40, %v742_v37  ;;  %2504 = vmatpush.bf16.msra.mxu2 %v3878_v21 }
 0x103   : > { %6057 = vst [vmem:[#allocation60_spill] sm:$0xff] %v5272_v35 }
 0x104   : > { %v5264_v47 = vadd.f32 %v1901_v50, %v1813_v6 }
 0x106   : > { %6054 = vst [vmem:[#allocation59_spill] sm:$0xff] %v5264_v47 }
 0x107   : > { %v1581_v55 = vpop.f32.mrf.mxu2  ;;  %v1814_v19 = vpop.f32.mrf.mxu3 }
 0x108   : > { %v1582_v51 = vadd.f32 %v1581_v55, %v1493_v34  ;;  %v1495_v59 = vpop.f32.mrf.mxu1  ;;  %v1906_v22 = vpop.f32.mrf.mxu0  ;;  %v429_v34 = vadd.s32 168, %v4207_v3 }
 0x109   : > { %v1496_v50 = vadd.f32 %v1495_v59, %v5104_v20  ;;  %v3886_v20 = vld [vmem:[%s5793_s3 + $0x1c8] sm:$0xff] }
 0x10a   : > { %v1815_v16 = vadd.f32 %v1814_v19, %v1582_v51  ;;  %2593 = vmatpush.bf16.msra.mxu3 %v3886_v20  ;;  %v718_v19 = vrot.slane %v4289_v54, 1  ;;  %v6062_v51 = vld [vmem:[#allocation2_spill] sm:$0xff]  ;;  %v461_v53 = vand.u32 15, %v429_v34  ;;  %v6065_v34 = vld [vmem:[#allocation3_spill] sm:$0xff] }
 0x10b   : > { %1534 = vmatmul.bf16.gmra.mxu1 %v5240_v17  ;;  %1945 = vmatmul.bf16.gmra.mxu0 %v5272_v35  ;;  %v719_v59 = vrot.slane %v6062_v51, 1 }
 0x10c   : > { %3318 = vmatmul.msk.bf16.gmra.mxu2 %vm5278_vm6, %v5274_v28  ;;  %3478 = vmatmul.msk.bf16.gmra.mxu3 %vm4860_vm12, %v4864_v7  ;;  %v5296_v61 = vadd.f32 %v1903_v25, %v1815_v16  ;;  %v3846_v25 = vld [vmem:[%s5793_s3 + $0x148] sm:$0xff]  ;;  %v740_v54 = vsel %vm6064_vm11, %v717_v26, %v718_v19  ;;  %vm4100_vm9 = vcmp.ne.s32.totalorder %v461_v53, 15  ;;  %v6069_v53 = vld [vmem:[#allocation10_spill] sm:$0xff] }
 0x10d   : > { %v3894_v16 = vld [vmem:[%s5793_s3 + $0x208] sm:$0xff]  ;;  %1982 = vmatpush.bf16.msra.mxu1 %v3846_v25  ;;  %vm5322_vm12 = vmpackc.low %vm4100_vm9, %vm6058_vm14 }
 0x10e   : > { %6061 = vst [vmem:[#allocation61_spill] sm:$0xff] %v5296_v61  ;;  %2682 = vmatpush.bf16.msra.mxu0 %v3894_v16  ;;  %vm6075_vm9 = vmmov %vm6064_vm11 }
 0x10f   : > { %v1584_v31 = vpop.f32.mrf.mxu2  ;;  %v1817_v6 = vpop.f32.mrf.mxu3 }
 0x110   : > { %v1585_v33 = vadd.f32 %v1584_v31, %v1496_v50  ;;  %v1497_v40 = vpop.f32.mrf.mxu1  ;;  %v1908_v37 = vpop.f32.mrf.mxu0  ;;  %v5316_v31 = vpack.c.bf16 %v6065_v34, %v6062_v51 }
 0x111   : > { %v1498_v55 = vadd.f32 %v1497_v40, %v5134_v24  ;;  %v739_v24 = vsel %vm6056_vm4, %v718_v19, %v719_v59 }
 0x112   : > { %v1818_v47 = vadd.f32 %v1817_v6, %v1585_v33  ;;  %6066 = vst [vmem:[#allocation3_spill] sm:$0xff] %v5316_v31  ;;  %v5318_v25 = vpack.c.bf16 %v739_v24, %v740_v54 }
 0x114   : > { %v5308_v50 = vadd.f32 %v1906_v22, %v1818_v47  ;;  %v6067_v22 = vmov 0 }
 0x115   : > { %v6068_v22 = vsel %vm5322_vm12, 4294967295, %v6067_v22 }
 0x116   : > { %6063 = vst [vmem:[#allocation2_spill] sm:$0xff] %v5308_v50 }
 0x117   : > { %v1586_v21 = vpop.f32.mrf.mxu2  ;;  %v1819_v20 = vpop.f32.mrf.mxu3 }
 0x118   : > { %v1587_v6 = vadd.f32 %v1586_v21, %v1498_v55  ;;  %v1500_v33 = vpop.f32.mrf.mxu1  ;;  %v1911_v40 = vpop.f32.mrf.mxu0  ;;  %v6070_v55 = vld [vmem:[#allocation11_spill] sm:$0xff] }
 0x119   : > { %v1501_v47 = vadd.f32 %v1500_v33, %v5158_v18  ;;  %vm6071_vm4 = vnez %v6070_v55  ;;  %v431_v18 = vadd.s32 184, %v4207_v3  ;;  %v6073_v33 = vld [vmem:[#allocation12_spill] sm:$0xff] }
 0x11a   : > { %v1820_v26 = vadd.f32 %v1819_v20, %v1587_v6  ;;  %v720_v6 = vrot.slane %v6065_v34, 1  ;;  %v721_v50 = vrot.slane %v6073_v33, 1 }
 0x11b   : > { %1539 = vmatmul.bf16.gmra.mxu1 %v5272_v35  ;;  %1950 = vmatmul.bf16.gmra.mxu0 %v5316_v31  ;;  %v463_v35 = vand.u32 15, %v431_v18  ;;  %v3877_v18 = vld [vmem:[%s5793_s3 + $0x180] sm:$0xff] }
 0x11c   : > { %3322 = vmatmul.msk.bf16.gmra.mxu2 %vm5322_vm12, %v5318_v25  ;;  %3482 = vmatmul.msk.bf16.gmra.mxu3 %vm6071_vm4, %v6069_v53  ;;  %v5334_v19 = vadd.f32 %v1908_v37, %v1820_v26  ;;  %v737_v37 = vsel %vm6064_vm11, %v720_v6, %v721_v50  ;;  %v738_v26 = vsel %vm6075_vm9, %v719_v59, %v720_v6  ;;  %v6079_v59 = vld [vmem:[#allocation18_spill] sm:$0xff] }
 0x11d   : > { %vm4101_vm4 = vcmp.ne.s32.totalorder %v463_v35, 15  ;;  %v6078_v35 = vld [vmem:[#allocation17_spill] sm:$0xff]  ;;  %vm6080_vm11 = vnez %v6079_v59  ;;  %2505 = vmatpush.bf16.msra.mxu2 %v3877_v18  ;;  %v6081_v59 = vld [vmem:[#allocation19_spill] sm:$0xff] }
 0x11e   : > { %6072 = vst [vmem:[#allocation10_spill] sm:$0xff] %v5334_v19  ;;  %vm5353_vm12 = vmpackc.low %vm4101_vm4, %vm6058_vm14 }
 0x11f   : > { %v1589_v51 = vpop.f32.mrf.mxu2  ;;  %v1822_v16 = vpop.f32.mrf.mxu3  ;;  %vm6083_vm4 = vmmov %vm6075_vm9 }
 0x120   : > { %v1590_v24 = vadd.f32 %v1589_v51, %v1501_v47  ;;  %v1502_v54 = vpop.f32.mrf.mxu1  ;;  %v1913_v21 = vpop.f32.mrf.mxu0  ;;  %vm6084_vm9 = vmmov %vm6083_vm4 }
 0x121   : > { %v1503_v20 = vadd.f32 %v1502_v54, %v5182_v45  ;;  %v5348_v45 = vpack.c.bf16 %v4499_v1, %v6073_v33  ;;  %v433_v33 = vadd.s32 200, %v4207_v3 }
 0x122   : > { %v1823_v61 = vadd.f32 %v1822_v16, %v1590_v24  ;;  %v5350_v16 = vpack.c.bf16 %v737_v37, %v738_v26  ;;  %v3885_v24 = vld [vmem:[%s5793_s3 + $0x1c0] sm:$0xff] }
 0x123   : > { %2594 = vmatpush.bf16.msra.mxu3 %v3885_v24  ;;  %v465_v55 = vand.u32 15, %v433_v33  ;;  %v5392_v33 = vpack.c.bf16 %v4655_v29, %v6081_v59 }
 0x124   : > { %v5340_v7 = vadd.f32 %v1911_v40, %v1823_v61  ;;  %v6076_v61 = vmov 0 }
 0x125   : > { %v6077_v61 = vsel %vm5353_vm12, 4294967295, %v6076_v61 }
 0x126   : > { %6074 = vst [vmem:[#allocation12_spill] sm:$0xff] %v5340_v7  ;;  %v722_v7 = vrot.slane %v4499_v1, 1 }
 0x127   : > { %v1591_v47 = vpop.f32.mrf.mxu2  ;;  %v1824_v51 = vpop.f32.mrf.mxu3 }
 0x128   : > { %v1592_v34 = vadd.f32 %v1591_v47, %v1503_v20  ;;  %v1505_v54 = vpop.f32.mrf.mxu1  ;;  %v1916_v19 = vpop.f32.mrf.mxu0  ;;  %v736_v1 = vsel %vm6084_vm9, %v721_v50, %v722_v7  ;;  %vm6087_vm9 = vnez %v5981_v4 }
 0x129   : > { %v1506_v6 = vadd.f32 %v1505_v54, %v5010_v52  ;;  %v3893_v52 = vld [vmem:[%s5793_s3 + $0x200] sm:$0xff] }
 0x12a   : > { %v1825_v40 = vadd.f32 %v1824_v51, %v1592_v34  ;;  %2683 = vmatpush.bf16.msra.mxu0 %v3893_v52 }
 0x12b   : > { %1544 = vmatmul.bf16.gmra.mxu1 %v5316_v31  ;;  %1955 = vmatmul.bf16.gmra.mxu0 %v5348_v45 }
 0x12c   : > { %3326 = vmatmul.msk.bf16.gmra.mxu2 %vm5353_vm12, %v5350_v16  ;;  %3486 = vmatmul.msk.bf16.gmra.mxu3 %vm6080_vm11, %v6078_v35  ;;  %v5371_v20 = vadd.f32 %v1913_v21, %v1825_v40  ;;  %v723_v35 = vrot.slane %v6081_v59, 1  ;;  %v3845_v21 = vld [vmem:[%s5793_s3 + $0x140] sm:$0xff]  ;;  %vm4102_vm11 = vcmp.ne.s32.totalorder %v465_v55, 15  ;;  %v435_v55 = vadd.s32 216, %v4207_v3 }
 0x12d   : > { %1983 = vmatpush.bf16.msra.mxu1 %v3845_v21  ;;  %v4143_v21 = vld [vmem:[%s4217_s30 + $0x78] sm:$0xff]  }
 0x12e   : > { %v735_v40 = vsel %vm6083_vm4, %v722_v7, %v723_v35  ;;  %vm5397_vm4 = vmpackc.low %vm4102_vm11, %vm6058_vm14  ;;  %v3963_v52 = vunpack.c.l.bf16 %v4143_v21  ;;  %vm6089_vm11 = vcmp.lt.s32.totalorder %v4207_v3, 7 }
 0x12f   : > { %v1594_v37 = vpop.f32.mrf.mxu2  ;;  %v1827_v26 = vpop.f32.mrf.mxu3 }
 0x130   : > { %v1595_v47 = vadd.f32 %v1594_v37, %v1506_v6  ;;  %v1507_v51 = vpop.f32.mrf.mxu1  ;;  %v1918_v34 = vpop.f32.mrf.mxu0 }
 0x131   : > { %v1508_v18 = vadd.f32 %v1507_v51, %v5040_v12 }
 0x132   : > { %v1828_v31 = vadd.f32 %v1827_v26, %v1595_v47  ;;  %v6085_v47 = vmov 0 }
 0x133   : > { %v6086_v47 = vsel %vm5397_vm4, 4294967295, %v6085_v47 }
 0x134   : > { %v5383_v54 = vadd.f32 %v1916_v19, %v1828_v31  ;;  %v5394_v19 = vpack.c.bf16 %v735_v40, %v736_v1 }
 0x136   : > { %6082 = vst [vmem:[#allocation19_spill] sm:$0xff] %v5383_v54  ;;  %v467_v54 = vand.u32 15, %v435_v55  ;;  %v5428_v55 = vpack.c.bf16 %v4802_v36, %v4800_v43 }
 0x137   : > { %v1596_v24 = vpop.f32.mrf.mxu2  ;;  %v1829_v6 = vpop.f32.mrf.mxu3 }
 0x138   : > { %v1597_v37 = vadd.f32 %v1596_v24, %v1508_v18  ;;  %v1510_v26 = vpop.f32.mrf.mxu1  ;;  %v1921_v31 = vpop.f32.mrf.mxu0  ;;  %v724_v24 = vrot.slane %v4655_v29, 1 }
 0x139   : > { %v1511_v50 = vadd.f32 %v1510_v26, %v5064_v42 }
 0x13a   : > { %v1830_v7 = vadd.f32 %v1829_v6, %v1597_v37  ;;  %v725_v6 = vrot.slane %v4800_v43, 1 }
 0x13b   : > { %1549 = vmatmul.bf16.gmra.mxu1 %v5348_v45  ;;  %1960 = vmatmul.bf16.gmra.mxu0 %v5392_v33 }
 0x13c   : > { %3330 = vmatmul.msk.bf16.gmra.mxu2 %vm5397_vm4, %v5394_v19  ;;  %3490 = vmatmul.msk.bf16.gmra.mxu3 %vm6087_vm9, %v4758_v57  ;;  %v5409_v12 = vadd.f32 %v1918_v34, %v1830_v7  ;;  %v4144_v34 = vld [vmem:[%s5791_s1] ss:$0 sm:$0xff]  ;;  %v733_v7 = vsel %vm6089_vm11, %v724_v24, %v725_v6  ;;  %vm6090_vm9 = vmmov %vm6089_vm11  ;;  %vm4103_vm4 = vcmp.ne.s32.totalorder %v467_v54, 15 }
 0x13d   : > { %v337_v42 = vmul.f32 %v4144_v34, %v3963_v52 }
 0x13f   : > { %v1599_v59 = vpop.f32.mrf.mxu2  ;;  %v1832_v51 = vpop.f32.mrf.mxu3 }
 0x140   : > { %v1600_v40 = vadd.f32 %v1599_v59, %v1511_v50  ;;  %v1512_v1 = vpop.f32.mrf.mxu1  ;;  %v1923_v18 = vpop.f32.mrf.mxu0  ;;  %v734_v50 = vsel %vm6090_vm9, %v723_v35, %v724_v24  ;;  %vm5436_vm9 = vmpackc.low %vm4103_vm4, %vm6058_vm14 }
 0x141   : > { %v1513_v59 = vadd.f32 %v1512_v1, %v5088_v23  ;;  %v6091_v23 = vmov 0  ;;  %v437_v1 = vadd.s32 232, %v4207_v3  ;;  %vm6095_vm4 = vmmov %vm6089_vm11 }
 0x142   : > { %v1833_v37 = vadd.f32 %v1832_v51, %v1600_v40  ;;  %v6092_v23 = vsel %vm5436_vm9, 4294967295, %v6091_v23  ;;  %vm6097_vm11 = vmmov %vm6095_vm4 }
 0x144   : > { %v5419_v26 = vadd.f32 %v1921_v31, %v1833_v37  ;;  %v5430_v31 = vpack.c.bf16 %v733_v7, %v734_v50  ;;  %v4145_v37 = vld [vmem:[%s5792_s2] ss:$0 sm:$0xff] }
 0x145   : > { %v373_v34 = vadd.f32 %v4145_v37, %v337_v42  ;;  %v438_v42 = vadd.s32 240, %v4207_v3 }
 0x146   : > { %6088 = vst [vmem:[#allocation62_spill] sm:$0xff] %v5419_v26  ;;  %v469_v26 = vand.u32 15, %v437_v1 }
 0x147   : > { %v1601_v29 = vpop.f32.mrf.mxu2  ;;  %v1834_v21 = vpop.f32.mrf.mxu3  ;;  %v5448_v43 = vmax.f32 %v373_v34, 0.0 }
 0x148   : > { %v1602_v51 = vadd.f32 %v1601_v29, %v1513_v59  ;;  %v1515_v40 = vpop.f32.mrf.mxu1  ;;  %v1926_v52 = vpop.f32.mrf.mxu0 }
 0x149   : > { %6093 = vst [vmem:[#allocation63_spill] sm:$0xff] %v5448_v43  ;;  %v1516_v24 = vadd.f32 %v1515_v40, %v5106_v13  ;;  %v5907_v37 = vrot.slane %v5448_v43, 1  ;;  %v534_v34 = vrot.slane %v5448_v43, 7 }
 0x14a   : > { %v1835_v35 = vadd.f32 %v1834_v21, %v1602_v51  ;;  %v726_v51 = vrot.slane %v4802_v36, 1 }
 0x14b   : > { %1554 = vmatmul.bf16.gmra.mxu1 %v5392_v33  ;;  %1965 = vmatmul.bf16.gmra.mxu0 %v5428_v55 }
 0x14c   : > { %3334 = vmatmul.msk.bf16.gmra.mxu2 %vm5436_vm9, %v5430_v31  ;;  %3494 = vmatmul.msk.bf16.gmra.mxu3 %vm4869_vm2, %v4866_v32  ;;  %v5450_v54 = vadd.f32 %v1923_v18, %v1835_v35  ;;  %v470_v35 = vand.u32 15, %v438_v42  ;;  %v731_v13 = vsel %vm6095_vm4, %v726_v51, %v5907_v37  ;;  %vm4104_vm2 = vcmp.ne.s32.totalorder %v469_v26, 15 }
 0x14d   : > { %vm6100_vm9 = vcmp.lt.s32.totalorder %v4207_v3, 1  ;;  %vm5480_vm4 = vmpackc.low %vm4104_vm2, %vm6058_vm14  ;;  %vm6163_vm2 = vnez %v6060_v60 }
 0x14e   : > { %6094 = vst [vmem:[#allocation64_spill] sm:$0xff] %v5450_v54  ;;  %vm6102_vm12 = vmmov %vm6100_vm9  ;;  %vm4105_vm6 = vcmp.ne.s32.totalorder %v470_v35, 0 }
 0x14f   : > { %v1604_v7 = vpop.f32.mrf.mxu2  ;;  %v1837_v50 = vpop.f32.mrf.mxu3  ;;  %v538_v42 = vsel %vm6102_vm12, %v6101_v5, %v534_v34  ;;  %vm5489_vm12 = vmpackc.low %vm6058_vm14, %vm4105_vm6 }
 0x150   : > { %v1605_v59 = vadd.f32 %v1604_v7, %v1516_v24  ;;  %v1517_v29 = vpop.f32.mrf.mxu1  ;;  %v1928_v21 = vpop.f32.mrf.mxu0  ;;  %v732_v24 = vsel %vm6097_vm11, %v725_v6, %v726_v51  ;;  %v6098_v7 = vld [vmem:[#allocation7_spill] sm:$0xff]  ;;  %vm6174_vm11 = vnez %v6077_v61 }
 0x151   : > { %v6099_v54 = vrot.slane %v6098_v7, 7  ;;  %v5484_v36 = vpack.c.bf16 %v731_v13, %v732_v24 }
 0x152   : > { %v1838_v18 = vadd.f32 %v1837_v50, %v1605_v59  ;;  %v1518_v50 = vadd.f32 %v1517_v29, %v5136_v30  ;;  %v6107_v30 = vmov 0 }
 0x153   : > { %v537_v1 = vsel %vm6100_vm9, %v534_v34, %v6099_v54  ;;  %v6108_v30 = vsel %vm5489_vm12, 4294967295, %v6107_v30 }
 0x154   : > { %v5462_v40 = vadd.f32 %v1926_v52, %v1838_v18  ;;  %v5477_v18 = vpack.c.bf16 %v6098_v7, %v5448_v43  ;;  %v5486_v5 = vpack.c.bf16 %v537_v1, %v538_v42  ;;  %6109 = vst [vmem:[#allocation67_spill] sm:$0xff] %v6108_v30 }
 0x156   : > { %6096 = vst [vmem:[#allocation65_spill] sm:$0xff] %v5462_v40 }
 0x157   : > { %v1606_v59 = vpop.f32.mrf.mxu2  ;;  %v1839_v52 = vpop.f32.mrf.mxu3  ;;  %6103 = vst [vmem:[#allocation7_spill] sm:$0xff] %v5477_v18 }
 0x158   : > { %v1607_v6 = vadd.f32 %v1606_v59, %v1518_v50  ;;  %v1520_v26 = vpop.f32.mrf.mxu1  ;;  %v1931_v51 = vpop.f32.mrf.mxu0  ;;  %6106 = vst [vmem:[#allocation66_spill] sm:$0xff] %v5486_v5 }
 0x159   : > { %v1521_v35 = vadd.f32 %v1520_v26, %v5160_v39 }
 0x15a   : > { %v1840_v29 = vadd.f32 %v1839_v52, %v1607_v6 }
 0x15b   : > { %1559 = vmatmul.bf16.gmra.mxu1 %v5428_v55  ;;  %1970 = vmatmul.bf16.gmra.mxu0 %v5477_v18 }
 0x15c   : > { %3338 = vmatmul.msk.bf16.gmra.mxu2 %vm5480_vm4, %v5484_v36  ;;  %3498 = vmatmul.msk.bf16.gmra.mxu3 %vm5489_vm12, %v5486_v5  ;;  %v5501_v34 = vadd.f32 %v1928_v21, %v1840_v29 }
 0x15f   : > { %v1609_v13 = vpop.f32.mrf.mxu2  ;;  %v1842_v24 = vpop.f32.mrf.mxu3 }
 0x160   : > { %v1610_v1 = vadd.f32 %v1609_v13, %v1521_v35  ;;  %v1522_v42 = vpop.f32.mrf.mxu1  ;;  %v1933_v50 = vpop.f32.mrf.mxu0 }
 0x161   : > { %v1523_v6 = vadd.f32 %v1522_v42, %v5184_v10 }
 0x162   : > { %v1843_v59 = vadd.f32 %v1842_v24, %v1610_v1 }
 0x164   : > { %v5504_v52 = vadd.f32 %v1931_v51, %v1843_v59 }
 0x167   : > { %v1611_v37 = vpop.f32.mrf.mxu2  ;;  %v1844_v40 = vpop.f32.mrf.mxu3 }
 0x168   : > { %v1612_v18 = vadd.f32 %v1611_v37, %v1523_v6  ;;  %v1525_v43 = vpop.f32.mrf.mxu1  ;;  %v1936_v30 = vpop.f32.mrf.mxu0  ;;  %v6113_v6 = vld [vmem:[#allocation40_spill] sm:$0xff] }
 0x169   : > { %v1526_v10 = vadd.f32 %v1525_v43, %v5034_v14  ;;  %v6111_v43 = vld [vmem:[#allocation28_spill] sm:$0xff] }
 0x16a   : > { %v1845_v5 = vadd.f32 %v1844_v40, %v1612_v18 }
 0x16b   : > { %3502 = vmatmul.msk.bf16.vlgmr.msra.gmra.mxu1 %vm4922_vm3, %v4919_v48  ;;  %3770 = vmatmul.msk.bf16.vlgmr.msra.gmra.mxu0 %vm4947_vm15, %v4944_v9  ;;  %vm6164_vm3 = vnez %v5979_v38 }
 0x16c   : > { %3710 = vmatmul.msk.bf16.vlgmr.msra.gmra.mxu2 %vm4732_vm8, %v4736_v44  ;;  %2595 = vmatmul.bf16.vlgmr.msra.gmra.mxu3 %v4917_v27  ;;  %v5517_v39 = vadd.f32 %v1933_v50, %v1845_v5  ;;  %v6112_v5 = vld [vmem:[#allocation38_spill] sm:$0xff] }
 0x16f   : > { %v1614_v21 = vpop.f32.mrf.mxu2  ;;  %v1847_v37 = vpop.f32.mrf.mxu3 }
 0x170   : > { %v1615_v40 = vadd.f32 %v1614_v21, %v1526_v10  ;;  %v1527_v18 = vpop.f32.mrf.mxu1  ;;  %v1938_v58 = vpop.f32.mrf.mxu0 }
 0x171   : > { %v1528_v51 = vadd.f32 %v1527_v18, %v5054_v56 }
 0x172   : > { %v1848_v48 = vadd.f32 %v1847_v37, %v1615_v40 }
 0x174   : > { %v5520_v26 = vadd.f32 %v1936_v30, %v1848_v48 }
 0x177   : > { %v1616_v29 = vpop.f32.mrf.mxu2  ;;  %v1849_v35 = vpop.f32.mrf.mxu3 }
 0x178   : > { %v1617_v63 = vadd.f32 %v1616_v29, %v1528_v51  ;;  %v1530_v44 = vpop.f32.mrf.mxu1  ;;  %v1941_v13 = vpop.f32.mrf.mxu0  ;;  %v6116_v29 = vld [vmem:[#allocation6_spill] sm:$0xff] }
 0x179   : > { %v1531_v30 = vadd.f32 %v1530_v44, %v6112_v5 }
 0x17a   : > { %v1850_v27 = vadd.f32 %v1849_v35, %v1617_v63  ;;  %v6117_v35 = vld [vmem:[#allocation5_spill] sm:$0xff] }
 0x17b   : > { %3506 = vmatmul.msk.bf16.gmra.mxu1 %vm4947_vm15, %v4944_v9  ;;  %3774 = vmatmul.msk.bf16.gmra.mxu0 %vm4985_vm0, %v4982_v15  ;;  %vm6118_vm6 = vnez %v6117_v35  ;;  %v6119_v63 = vld [vmem:[#allocation29_spill] sm:$0xff]  ;;  %v6128_v35 = vld [vmem:[#allocation52_spill] sm:$0xff]  ;;  %vm6167_vm15 = vnez %v6068_v22 }
 0x17c   : > { %3714 = vmatmul.msk.bf16.gmra.mxu2 %vm4846_vm1, %v4850_v11  ;;  %2600 = vmatmul.bf16.gmra.mxu3 %v6111_v43  ;;  %v5533_v56 = vadd.f32 %v1938_v58, %v1850_v27  ;;  %v6114_v58 = vld [vmem:[#allocation31_spill] sm:$0xff] }
 0x17f   : > { %v1619_v24 = vpop.f32.mrf.mxu2  ;;  %v1852_v1 = vpop.f32.mrf.mxu3 }
 0x180   : > { %v1620_v42 = vadd.f32 %v1619_v24, %v1531_v30  ;;  %v1532_v50 = vpop.f32.mrf.mxu1  ;;  %v1943_v8 = vpop.f32.mrf.mxu0 }
 0x181   : > { %v1533_v10 = vadd.f32 %v1532_v50, %v6113_v6 }
 0x182   : > { %v1853_v9 = vadd.f32 %v1852_v1, %v1620_v42  ;;  %v6121_v1 = vld [vmem:[#allocation47_spill] sm:$0xff] }
 0x184   : > { %v5536_v59 = vadd.f32 %v1941_v13, %v1853_v9  ;;  %v6120_v13 = vld [vmem:[#allocation45_spill] sm:$0xff] }
 0x187   : > { %v1621_v21 = vpop.f32.mrf.mxu2  ;;  %v1854_v37 = vpop.f32.mrf.mxu3 }
 0x188   : > { %v1622_v40 = vadd.f32 %v1621_v21, %v1533_v10  ;;  %v1535_v11 = vpop.f32.mrf.mxu1  ;;  %v1946_v18 = vpop.f32.mrf.mxu0 }
 0x189   : > { %v1536_v27 = vadd.f32 %v1535_v11, %v6120_v13  ;;  %v6124_v11 = vld [vmem:[#allocation14_spill] sm:$0xff] }
 0x18a   : > { %v1855_v48 = vadd.f32 %v1854_v37, %v1622_v40 }
 0x18b   : > { %3510 = vmatmul.msk.bf16.gmra.mxu1 %vm4985_vm0, %v4982_v15  ;;  %3778 = vmatmul.msk.bf16.gmra.mxu0 %vm5015_vm5, %v6114_v58 }
 0x18c   : > { %3718 = vmatmul.msk.bf16.gmra.mxu2 %vm6118_vm6, %v6116_v29  ;;  %2605 = vmatmul.bf16.gmra.mxu3 %v6119_v63  ;;  %v5549_v44 = vadd.f32 %v1943_v8, %v1855_v48  ;;  %v6122_v8 = vld [vmem:[#allocation36_spill] sm:$0xff]  ;;  %v6125_v48 = vld [vmem:[#allocation13_spill] sm:$0xff] }
 0x18d   : > { %vm6126_vm0 = vnez %v6125_v48  ;;  %v6135_v48 = vld [vmem:[#allocation33_spill] sm:$0xff] }
 0x18f   : > { %v1624_v14 = vpop.f32.mrf.mxu2  ;;  %v1857_v43 = vpop.f32.mrf.mxu3 }
 0x190   : > { %v1625_v5 = vadd.f32 %v1624_v14, %v1536_v27  ;;  %v1537_v30 = vpop.f32.mrf.mxu1  ;;  %v1948_v41 = vpop.f32.mrf.mxu0 }
 0x191   : > { %v1538_v42 = vadd.f32 %v1537_v30, %v6121_v1 }
 0x192   : > { %v1858_v15 = vadd.f32 %v1857_v43, %v1625_v5 }
 0x194   : > { %v5552_v24 = vadd.f32 %v1946_v18, %v1858_v15  ;;  %v6127_v18 = vld [vmem:[#allocation30_spill] sm:$0xff] }
 0x197   : > { %v1626_v50 = vpop.f32.mrf.mxu2  ;;  %v1859_v9 = vpop.f32.mrf.mxu3 }
 0x198   : > { %v1627_v6 = vadd.f32 %v1626_v50, %v1538_v42  ;;  %v1540_v10 = vpop.f32.mrf.mxu1  ;;  %v1951_v21 = vpop.f32.mrf.mxu0 }
 0x199   : > { %v1541_v63 = vadd.f32 %v1540_v10, %v6128_v35 }
 0x19a   : > { %v1860_v37 = vadd.f32 %v1859_v9, %v1627_v6 }
 0x19b   : > { %3514 = vmatmul.msk.bf16.gmra.mxu1 %vm5015_vm5, %v6114_v58  ;;  %3782 = vmatmul.msk.bf16.gmra.mxu0 %vm5069_vm13, %v6122_v8 }
 0x19c   : > { %3722 = vmatmul.msk.bf16.gmra.mxu2 %vm6126_vm0, %v6124_v11  ;;  %2610 = vmatmul.bf16.gmra.mxu3 %v6127_v18  ;;  %v5565_v29 = vadd.f32 %v1948_v41, %v1860_v37  ;;  %v6129_v41 = vld [vmem:[#allocation43_spill] sm:$0xff]  ;;  %v6131_v37 = vld [vmem:[#allocation21_spill] sm:$0xff]  ;;  %v6132_v11 = vld [vmem:[#allocation20_spill] sm:$0xff]  ;;  %vm6180_vm0 = vnez %v6086_v47 }
 0x19d   : > { %vm6133_vm5 = vnez %v6132_v11 }
 0x19f   : > { %v1629_v13 = vpop.f32.mrf.mxu2  ;;  %v1862_v27 = vpop.f32.mrf.mxu3 }
 0x1a0   : > { %v1630_v14 = vadd.f32 %v1629_v13, %v1541_v63  ;;  %v1542_v43 = vpop.f32.mrf.mxu1  ;;  %v1953_v51 = vpop.f32.mrf.mxu0 }
 0x1a1   : > { %v1543_v30 = vadd.f32 %v1542_v43, %v5192_v2  ;;  %v6137_v43 = vld [vmem:[#allocation34_spill] sm:$0xff] }
 0x1a2   : > { %v1863_v58 = vadd.f32 %v1862_v27, %v1630_v14 }
 0x1a4   : > { %v5568_v5 = vadd.f32 %v1951_v21, %v1863_v58  ;;  %v6134_v21 = vld [vmem:[#allocation35_spill] sm:$0xff] }
 0x1a7   : > { %v1631_v15 = vpop.f32.mrf.mxu2  ;;  %v1864_v1 = vpop.f32.mrf.mxu3 }
 0x1a8   : > { %v1632_v42 = vadd.f32 %v1631_v15, %v1543_v30  ;;  %v1545_v50 = vpop.f32.mrf.mxu1  ;;  %v1956_v9 = vpop.f32.mrf.mxu0 }
 0x1a9   : > { %v1546_v18 = vadd.f32 %v1545_v50, %v6135_v48 }
 0x1aa   : > { %v1865_v6 = vadd.f32 %v1864_v1, %v1632_v42 }
 0x1ab   : > { %3518 = vmatmul.msk.bf16.gmra.mxu1 %vm5069_vm13, %v6122_v8  ;;  %3786 = vmatmul.msk.bf16.gmra.mxu0 %vm5111_vm10, %v6129_v41 }
 0x1ac   : > { %3726 = vmatmul.msk.bf16.gmra.mxu2 %vm6133_vm5, %v6131_v37  ;;  %2615 = vmatmul.bf16.gmra.mxu3 %v6134_v21  ;;  %v5581_v2 = vadd.f32 %v1953_v51, %v1865_v6  ;;  %v6138_v51 = vld [vmem:[#allocation50_spill] sm:$0xff]  ;;  %v6140_v6 = vld [vmem:[#allocation24_spill] sm:$0xff]  ;;  %v6141_v21 = vld [vmem:[#allocation23_spill] sm:$0xff] }
 0x1ad   : > { %vm6142_vm13 = vnez %v6141_v21 }
 0x1af   : > { %v1634_v35 = vpop.f32.mrf.mxu2  ;;  %v1867_v63 = vpop.f32.mrf.mxu3 }
 0x1b0   : > { %v1635_v13 = vadd.f32 %v1634_v35, %v1546_v18  ;;  %v1547_v27 = vpop.f32.mrf.mxu1  ;;  %v1958_v40 = vpop.f32.mrf.mxu0  ;;  %v6145_v18 = vld [vmem:[#allocation39_spill] sm:$0xff] }
 0x1b1   : > { %v1548_v58 = vadd.f32 %v1547_v27, %v6137_v43 }
 0x1b2   : > { %v1868_v8 = vadd.f32 %v1867_v63, %v1635_v13 }
 0x1b4   : > { %v5584_v14 = vadd.f32 %v1956_v9, %v1868_v8  ;;  %v6143_v9 = vld [vmem:[#allocation42_spill] sm:$0xff] }
 0x1b6   : > { %6136 = vst [vmem:[#allocation22_spill] sm:$0xff] %v5584_v14 }
 0x1b7   : > { %v1636_v30 = vpop.f32.mrf.mxu2  ;;  %v1869_v15 = vpop.f32.mrf.mxu3 }
 0x1b8   : > { %v1637_v1 = vadd.f32 %v1636_v30, %v1548_v58  ;;  %v1550_v42 = vpop.f32.mrf.mxu1  ;;  %v1961_v37 = vpop.f32.mrf.mxu0  ;;  %v6147_v58 = vld [vmem:[#allocation41_spill] sm:$0xff] }
 0x1b9   : > { %v1551_v35 = vadd.f32 %v1550_v42, %v6145_v18  ;;  %v6149_v42 = vld [vmem:[#allocation56_spill] sm:$0xff] }
 0x1ba   : > { %v1870_v11 = vadd.f32 %v1869_v15, %v1637_v1  ;;  %vm6150_vm8 = vnez %v6149_v42  ;;  %v6152_v18 = vld [vmem:[#allocation8_spill] sm:$0xff] }
 0x1bb   : > { %3522 = vmatmul.msk.bf16.gmra.mxu1 %vm5111_vm10, %v6129_v41  ;;  %3790 = vmatmul.msk.bf16.gmra.mxu0 %vm5165_vm7, %v6138_v51  ;;  %vm6153_vm10 = vnez %v6152_v18 }
 0x1bc   : > { %3730 = vmatmul.msk.bf16.gmra.mxu2 %vm6142_vm13, %v6140_v6  ;;  %2620 = vmatmul.bf16.gmra.mxu3 %v6143_v9  ;;  %v5597_v48 = vadd.f32 %v1958_v40, %v1870_v11  ;;  %v6148_v40 = vld [vmem:[#allocation55_spill] sm:$0xff]  ;;  %v6151_v11 = vld [vmem:[#allocation9_spill] sm:$0xff]  ;;  %vm6185_vm13 = vnez %v6092_v23 }
 0x1be   : > { %6144 = vst [vmem:[#allocation28_spill] sm:$0xff] %v5597_v48 }
 0x1bf   : > { %v1639_v63 = vpop.f32.mrf.mxu2  ;;  %v1872_v13 = vpop.f32.mrf.mxu3 }
 0x1c0   : > { %v1640_v27 = vadd.f32 %v1639_v63, %v1551_v35  ;;  %v1552_v8 = vpop.f32.mrf.mxu1  ;;  %v1963_v10 = vpop.f32.mrf.mxu0  ;;  %v6155_v63 = vld [vmem:[#allocation46_spill] sm:$0xff] }
 0x1c1   : > { %v1553_v30 = vadd.f32 %v1552_v8, %v6147_v58 }
 0x1c2   : > { %v1873_v41 = vadd.f32 %v1872_v13, %v1640_v27 }
 0x1c4   : > { %v5600_v43 = vadd.f32 %v1961_v37, %v1873_v41  ;;  %v6154_v37 = vld [vmem:[#allocation49_spill] sm:$0xff] }
 0x1c6   : > { %6146 = vst [vmem:[#allocation38_spill] sm:$0xff] %v5600_v43 }
 0x1c7   : > { %v1641_v15 = vpop.f32.mrf.mxu2  ;;  %v1874_v1 = vpop.f32.mrf.mxu3 }
 0x1c8   : > { %v1642_v21 = vadd.f32 %v1641_v15, %v1553_v30  ;;  %v1555_v6 = vpop.f32.mrf.mxu1  ;;  %v1966_v14 = vpop.f32.mrf.mxu0  ;;  %v6156_v15 = vld [vmem:[#allocation48_spill] sm:$0xff] }
 0x1c9   : > { %v1556_v13 = vadd.f32 %v1555_v6, %v6155_v63  ;;  %v6159_v6 = vld [vmem:[#allocation15_spill] sm:$0xff] }
 0x1ca   : > { %v1875_v9 = vadd.f32 %v1874_v1, %v1642_v21  ;;  %vm6160_vm1 = vnez %v6159_v6 }
 0x1cb   : > { %3526 = vmatmul.msk.bf16.gmra.mxu1 %vm5165_vm7, %v6138_v51  ;;  %3794 = vmatmul.msk.bf16.gmra.mxu0 %vm6150_vm8, %v6148_v40  ;;  %vm6157_vm7 = vnez %v6051_v49 }
 0x1cc   : > { %3734 = vmatmul.msk.bf16.gmra.mxu2 %vm6153_vm10, %v6151_v11  ;;  %2625 = vmatmul.bf16.gmra.mxu3 %v6154_v37  ;;  %v5613_v35 = vadd.f32 %v1963_v10, %v1875_v9  ;;  %v6158_v10 = vld [vmem:[#allocation16_spill] sm:$0xff]  ;;  %v6161_v9 = vld [vmem:[#allocation53_spill] sm:$0xff] }
 0x1cf   : > { %v1644_v27 = vpop.f32.mrf.mxu2  ;;  %v1877_v8 = vpop.f32.mrf.mxu3 }
 0x1d0   : > { %v1645_v41 = vadd.f32 %v1644_v27, %v1556_v13  ;;  %v1557_v58 = vpop.f32.mrf.mxu1  ;;  %v1968_v50 = vpop.f32.mrf.mxu0 }
 0x1d1   : > { %v1558_v1 = vadd.f32 %v1557_v58, %v6156_v15  ;;  %v6162_v58 = vld [vmem:[#allocation54_spill] sm:$0xff] }
 0x1d2   : > { %v1878_v51 = vadd.f32 %v1877_v8, %v1645_v41 }
 0x1d4   : > { %v5616_v30 = vadd.f32 %v1966_v14, %v1878_v51 }
 0x1d7   : > { %v1646_v21 = vpop.f32.mrf.mxu2  ;;  %v1879_v43 = vpop.f32.mrf.mxu3 }
 0x1d8   : > { %v1647_v18 = vadd.f32 %v1646_v21, %v1558_v1  ;;  %v1560_v11 = vpop.f32.mrf.mxu1  ;;  %v1971_v48 = vpop.f32.mrf.mxu0 }
 0x1d9   : > { %v1561_v63 = vadd.f32 %v1560_v11, %v6161_v9 }
 0x1da   : > { %v1880_v37 = vadd.f32 %v1879_v43, %v1647_v18 }
 0x1db   : > { %3530 = vmatmul.msk.bf16.gmra.mxu1 %vm6150_vm8, %v6148_v40  ;;  %3798 = vmatmul.msk.bf16.gmra.mxu0 %vm6157_vm7, %v5242_v46  ;;  %vm6186_vm8 = vnez %v5981_v4 }
 0x1dc   : > { %3738 = vmatmul.msk.bf16.gmra.mxu2 %vm6160_vm1, %v6158_v10  ;;  %2630 = vmatmul.bf16.gmra.mxu3 %v5198_v0  ;;  %v5629_v14 = vadd.f32 %v1968_v50, %v1880_v37 }
 0x1df   : > { %v1649_v13 = vpop.f32.mrf.mxu2  ;;  %v1882_v43 = vpop.f32.mrf.mxu3 }
 0x1e0   : > { %v1650_v27 = vadd.f32 %v1649_v13, %v1561_v63  ;;  %v1562_v8 = vpop.f32.mrf.mxu1  ;;  %v1973_v42 = vpop.f32.mrf.mxu0  ;;  %v6165_v13 = vld [vmem:[#allocation57_spill] sm:$0xff] }
 0x1e1   : > { %v1563_v51 = vadd.f32 %v1562_v8, %v6162_v58 }
 0x1e2   : > { %v1883_v40 = vadd.f32 %v1882_v43, %v1650_v27 }
 0x1e4   : > { %v5632_v41 = vadd.f32 %v1971_v48, %v1883_v40 }
 0x1e7   : > { %v1651_v15 = vpop.f32.mrf.mxu2  ;;  %v1884_v1 = vpop.f32.mrf.mxu3 }
 0x1e8   : > { %v1652_v21 = vadd.f32 %v1651_v15, %v1563_v51  ;;  %v1985_v18 = vpop.f32.mrf.mxu1  ;;  %v2685_v10 = vpop.f32.mrf.mxu0  ;;  %v6168_v51 = vld [vmem:[#allocation26_spill] sm:$0xff]  ;;  %v6169_v15 = vld [vmem:[#allocation25_spill] sm:$0xff] }
 0x1e9   : > { %v1986_v43 = vadd.f32 %v1985_v18, %v6165_v13  ;;  %vm6170_vm9 = vnez %v6169_v15 }
 0x1ea   : > { %v1885_v0 = vadd.f32 %v1884_v1, %v1652_v21  ;;  %v6171_v1 = vld [vmem:[#allocation60_spill] sm:$0xff] }
 0x1eb   : > { %3534 = vmatmul.msk.bf16.gmra.mxu1 %vm6157_vm7, %v5242_v46  ;;  %3802 = vmatmul.msk.bf16.gmra.mxu0 %vm6163_vm2, %v5274_v28  ;;  %vm6193_vm7 = vcmp.lt.s32.totalorder %v4207_v3, 7 }
 0x1ec   : > { %3742 = vmatmul.msk.bf16.gmra.mxu2 %vm6164_vm3, %v4756_v62  ;;  %2635 = vmatmul.bf16.gmra.mxu3 %v5240_v17  ;;  %v5645_v48 = vadd.f32 %v1973_v42, %v1885_v0  ;;  %v6166_v62 = vld [vmem:[#allocation58_spill] sm:$0xff]  ;;  %vm6196_vm1 = vmmov %vm6193_vm7 }
 0x1ef   : > { %v2507_v50 = vpop.f32.mrf.mxu2  ;;  %v2596_v11 = vpop.f32.mrf.mxu3 }
 0x1f0   : > { %v1987_v37 = vpop.f32.mrf.mxu1  ;;  %v2687_v6 = vpop.f32.mrf.mxu0  ;;  %v2597_v9 = vadd.f32 %v2596_v11, %v2507_v50 }
 0x1f1   : > { %v1988_v58 = vadd.f32 %v1987_v37, %v6166_v62 }
 0x1f2   : > { %v2686_v49 = vadd.f32 %v2685_v10, %v2597_v9  ;;  %v6172_v9 = vld [vmem:[#allocation59_spill] sm:$0xff] }
 0x1f4   : > { %v2765_v38 = vadd.f32 %v2686_v49, %v1986_v43 }
 0x1f6   : > { %v2898_v60 = vmul.f32 %v2765_v38, %v2765_v38 }
 0x1f7   : > { %v2509_v46 = vpop.f32.mrf.mxu2  ;;  %v2598_v63 = vpop.f32.mrf.mxu3 }
 0x1f8   : > { %v2599_v27 = vadd.f32 %v2598_v63, %v2509_v46  ;;  %v1990_v8 = vpop.f32.mrf.mxu1  ;;  %v2690_v40 = vpop.f32.mrf.mxu0 }
 0x1f9   : > { %v1991_v49 = vadd.f32 %v1990_v8, %v6172_v9 }
 0x1fa   : > { %v2688_v17 = vadd.f32 %v2687_v6, %v2599_v27 }
 0x1fb   : > { %3538 = vmatmul.msk.bf16.gmra.mxu1 %vm6163_vm2, %v5274_v28  ;;  %3806 = vmatmul.msk.bf16.gmra.mxu0 %vm6167_vm15, %v5318_v25 }
 0x1fc   : > { %v2766_v42 = vadd.f32 %v2688_v17, %v1988_v58  ;;  %3746 = vmatmul.msk.bf16.gmra.mxu2 %vm6170_vm9, %v6168_v51  ;;  %2640 = vmatmul.bf16.gmra.mxu3 %v6171_v1  ;;  %v6173_v51 = vld [vmem:[#allocation61_spill] sm:$0xff] }
 0x1fe   : > { %v3968_v28 = vpack.c.bf16 %v2766_v42, %v2765_v38  ;;  %v2861_v21 = vadd.f32 %v2766_v42, %v2765_v38  ;;  %v2899_v18 = vmul.f32 %v2766_v42, %v2766_v42 }
 0x1ff   : > { %v2512_v10 = vpop.f32.mrf.mxu2  ;;  %v2601_v0 = vpop.f32.mrf.mxu3 }
 0x200   : > { %3969 = vst [vmem:[%s5664_s13] sm:$0xff] %v3968_v28   ;;  %v2930_v50 = vadd.f32 %v2899_v18, %v2898_v60  ;;  %v2602_v11 = vadd.f32 %v2601_v0, %v2512_v10  ;;  %v1992_v37 = vpop.f32.mrf.mxu1  ;;  %v2692_v6 = vpop.f32.mrf.mxu0  ;;  %v6177_v60 = vld [vmem:[#allocation3_spill] sm:$0xff] }
 0x201   : > { %v1993_v15 = vadd.f32 %v1992_v37, %v6173_v51  ;;  %v6178_v37 = vld [vmem:[#allocation2_spill] sm:$0xff] }
 0x202   : > { %v2691_v46 = vadd.f32 %v2690_v40, %v2602_v11  ;;  %v6175_v40 = vld [vmem:[#allocation11_spill] sm:$0xff]  ;;  %v6179_v51 = vld [vmem:[#allocation10_spill] sm:$0xff] }
 0x203   : > { %vm6176_vm6 = vnez %v6175_v40 }
 0x204   : > { %v2767_v63 = vadd.f32 %v2691_v46, %v1991_v49 }
 0x206   : > { %v2862_v13 = vadd.f32 %v2861_v21, %v2767_v63  ;;  %v2900_v43 = vmul.f32 %v2767_v63, %v2767_v63 }
 0x207   : > { %v2514_v27 = vpop.f32.mrf.mxu2  ;;  %v2603_v62 = vpop.f32.mrf.mxu3 }
 0x208   : > { %v2931_v58 = vadd.f32 %v2930_v50, %v2900_v43  ;;  %v2604_v17 = vadd.f32 %v2603_v62, %v2514_v27  ;;  %v1995_v38 = vpop.f32.mrf.mxu1  ;;  %v2695_v42 = vpop.f32.mrf.mxu0 }
 0x20a   : > { %v2693_v1 = vadd.f32 %v2692_v6, %v2604_v17  ;;  %v1996_v6 = vadd.f32 %v1995_v38, %v6178_v37  ;;  %v6181_v38 = vld [vmem:[#allocation17_spill] sm:$0xff] }
 0x20b   : > { %3542 = vmatmul.msk.bf16.gmra.mxu1 %vm6167_vm15, %v5318_v25  ;;  %3810 = vmatmul.msk.bf16.gmra.mxu0 %vm6174_vm11, %v5350_v16 }
 0x20c   : > { %v2768_v8 = vadd.f32 %v2693_v1, %v1993_v15  ;;  %3750 = vmatmul.msk.bf16.gmra.mxu2 %vm6176_vm6, %v6069_v53  ;;  %2645 = vmatmul.bf16.gmra.mxu3 %v6177_v60 }
 0x20e   : > { %v3973_v28 = vpack.c.bf16 %v2768_v8, %v2767_v63  ;;  %v2863_v21 = vadd.f32 %v2862_v13, %v2768_v8  ;;  %v2901_v18 = vmul.f32 %v2768_v8, %v2768_v8 }
 0x20f   : > { %v2517_v10 = vpop.f32.mrf.mxu2  ;;  %v2606_v0 = vpop.f32.mrf.mxu3 }
 0x210   : > { %4060 = vst [vmem:[%s5664_s13 + $0x8] sm:$0xff] %v3973_v28   ;;  %v2932_v50 = vadd.f32 %v2931_v58, %v2901_v18  ;;  %v2607_v22 = vadd.f32 %v2606_v0, %v2517_v10  ;;  %v1997_v25 = vpop.f32.mrf.mxu1  ;;  %v2697_v11 = vpop.f32.mrf.mxu0  ;;  %v6184_v0 = vld [vmem:[#allocation12_spill] sm:$0xff] }
 0x211   : > { %v1998_v15 = vadd.f32 %v1997_v25, %v6179_v51 }
 0x212   : > { %v2696_v9 = vadd.f32 %v2695_v42, %v2607_v22  ;;  %v6182_v42 = vld [vmem:[#allocation18_spill] sm:$0xff] }
 0x213   : > { %vm6183_vm5 = vnez %v6182_v42 }
 0x214   : > { %v2769_v49 = vadd.f32 %v2696_v9, %v1996_v6 }
 0x216   : > { %v2864_v46 = vadd.f32 %v2863_v21, %v2769_v49  ;;  %v2902_v43 = vmul.f32 %v2769_v49, %v2769_v49 }
 0x217   : > { %v2519_v27 = vpop.f32.mrf.mxu2  ;;  %v2608_v53 = vpop.f32.mrf.mxu3 }
 0x218   : > { %v2933_v62 = vadd.f32 %v2932_v50, %v2902_v43  ;;  %v2609_v63 = vadd.f32 %v2608_v53, %v2519_v27  ;;  %v2000_v13 = vpop.f32.mrf.mxu1  ;;  %v2700_v17 = vpop.f32.mrf.mxu0 }
 0x219   : > { %v2001_v50 = vadd.f32 %v2000_v13, %v6184_v0  ;;  %v6188_v0 = vld [vmem:[#allocation27_spill] sm:$0xff] }
 0x21a   : > { %v2698_v1 = vadd.f32 %v2697_v11, %v2609_v63  ;;  %vm6189_vm10 = vnez %v6188_v0 }
 0x21b   : > { %3546 = vmatmul.msk.bf16.gmra.mxu1 %vm6174_vm11, %v5350_v16  ;;  %3814 = vmatmul.msk.bf16.gmra.mxu0 %vm6180_vm0, %v5394_v19 }
 0x21c   : > { %v2770_v58 = vadd.f32 %v2698_v1, %v1998_v15  ;;  %3754 = vmatmul.msk.bf16.gmra.mxu2 %vm6183_vm5, %v6181_v38  ;;  %2650 = vmatmul.bf16.gmra.mxu3 %v5348_v45 }
 0x21e   : > { %v3978_v8 = vpack.c.bf16 %v2770_v58, %v2769_v49  ;;  %v2865_v40 = vadd.f32 %v2864_v46, %v2770_v58  ;;  %v2903_v60 = vmul.f32 %v2770_v58, %v2770_v58  ;;  %v6187_v58 = vld [vmem:[#allocation19_spill] sm:$0xff] }
 0x21f   : > { %v2522_v28 = vpop.f32.mrf.mxu2  ;;  %v2611_v21 = vpop.f32.mrf.mxu3 }
 0x220   : > { %4061 = vst [vmem:[%s5664_s13 + $0x10] sm:$0xff] %v3978_v8   ;;  %v2934_v18 = vadd.f32 %v2933_v62, %v2903_v60  ;;  %v2612_v61 = vadd.f32 %v2611_v21, %v2522_v28  ;;  %v2002_v16 = vpop.f32.mrf.mxu1  ;;  %v2702_v10 = vpop.f32.mrf.mxu0 }
 0x221   : > { %v2003_v27 = vadd.f32 %v2002_v16, %v5371_v20 }
 0x222   : > { %v2701_v22 = vadd.f32 %v2700_v17, %v2612_v61 }
 0x224   : > { %v2771_v25 = vadd.f32 %v2701_v22, %v2001_v50  ;;  %v439_v50 = vadd.s32 248, %v4207_v3 }
 0x226   : > { %v2866_v11 = vadd.f32 %v2865_v40, %v2771_v25  ;;  %v2904_v37 = vmul.f32 %v2771_v25, %v2771_v25 }
 0x227   : > { %v2524_v6 = vpop.f32.mrf.mxu2  ;;  %v2613_v9 = vpop.f32.mrf.mxu3 }
 0x228   : > { %v2935_v43 = vadd.f32 %v2934_v18, %v2904_v37  ;;  %v2614_v45 = vadd.f32 %v2613_v9, %v2524_v6  ;;  %v2005_v49 = vpop.f32.mrf.mxu1  ;;  %v2705_v46 = vpop.f32.mrf.mxu0 }
 0x229   : > { %v2006_v38 = vadd.f32 %v2005_v49, %v6187_v58  ;;  %v6190_v49 = vld [vmem:[#allocation62_spill] sm:$0xff] }
 0x22a   : > { %v2703_v53 = vadd.f32 %v2702_v10, %v2614_v45  ;;  %v471_v45 = vand.u32 15, %v439_v50  ;;  %v6203_v50 = vld [vmem:[#allocation65_spill] sm:$0xff] }
 0x22b   : > { %3550 = vmatmul.msk.bf16.gmra.mxu1 %vm6180_vm0, %v5394_v19  ;;  %3818 = vmatmul.msk.bf16.gmra.mxu0 %vm6185_vm13, %v5430_v31 }
 0x22c   : > { %v2772_v62 = vadd.f32 %v2703_v53, %v2003_v27  ;;  %3758 = vmatmul.msk.bf16.gmra.mxu2 %vm6186_vm8, %v4758_v57  ;;  %2655 = vmatmul.bf16.gmra.mxu3 %v5392_v33  ;;  %vm4106_vm2 = vcmp.ne.s32.totalorder %v471_v45, 15 }
 0x22d   : > { %vm5731_vm3 = vmpackc.low %vm4106_vm2, %vm6058_vm14  ;;  %vm2970_vm14 = vcmask 1040384  }
 0x22e   : > { %v3983_v63 = vpack.c.bf16 %v2772_v62, %v2771_v25  ;;  %v2867_v13 = vadd.f32 %v2866_v11, %v2772_v62  ;;  %v2905_v17 = vmul.f32 %v2772_v62, %v2772_v62 }
 0x22f   : > { %v2527_v20 = vpop.f32.mrf.mxu2  ;;  %v2616_v51 = vpop.f32.mrf.mxu3 }
 0x230   : > { %4062 = vst [vmem:[%s5664_s13 + $0x18] sm:$0xff] %v3983_v63   ;;  %v2936_v15 = vadd.f32 %v2935_v43, %v2905_v17  ;;  %v2617_v47 = vadd.f32 %v2616_v51, %v2527_v20  ;;  %v2007_v19 = vpop.f32.mrf.mxu1  ;;  %v2707_v1 = vpop.f32.mrf.mxu0  ;;  %v728_v43 = vrot.slane %v6098_v7, 1  ;;  %v6194_v63 = vld [vmem:[#allocation4_spill] sm:$0xff] }
 0x231   : > { %v2008_v61 = vadd.f32 %v2007_v19, %v5409_v12 }
 0x232   : > { %v2706_v42 = vadd.f32 %v2705_v46, %v2617_v47 }
 0x234   : > { %v2773_v8 = vadd.f32 %v2706_v42, %v2006_v38 }
 0x236   : > { %v2868_v40 = vadd.f32 %v2867_v13, %v2773_v8  ;;  %v2906_v60 = vmul.f32 %v2773_v8, %v2773_v8  ;;  %v6195_v13 = vrot.slane %v6194_v63, 1 }
 0x237   : > { %v2529_v4 = vpop.f32.mrf.mxu2  ;;  %v2618_v57 = vpop.f32.mrf.mxu3 }
 0x238   : > { %v2937_v28 = vadd.f32 %v2936_v15, %v2906_v60  ;;  %v2619_v33 = vadd.f32 %v2618_v57, %v2529_v4  ;;  %v2010_v21 = vpop.f32.mrf.mxu1  ;;  %v2710_v18 = vpop.f32.mrf.mxu0  ;;  %v761_v17 = vsel %vm6196_vm1, %v728_v43, %v6195_v13  ;;  %v6200_v4 = vld [vmem:[#allocation66_spill] sm:$0xff] }
 0x239   : > { %v2011_v46 = vadd.f32 %v2010_v21, %v6190_v49 }
 0x23a   : > { %v2708_v16 = vadd.f32 %v2707_v1, %v2619_v33 }
 0x23b   : > { %3554 = vmatmul.msk.bf16.gmra.mxu1 %vm6185_vm13, %v5430_v31  ;;  %3822 = vmatmul.msk.bf16.gmra.mxu0 %vm5480_vm4, %v5484_v36 }
 0x23c   : > { %v2774_v10 = vadd.f32 %v2708_v16, %v2008_v61  ;;  %3762 = vmatmul.msk.bf16.gmra.mxu2 %vm6189_vm10, %v4866_v32  ;;  %2660 = vmatmul.bf16.gmra.mxu3 %v5428_v55  ;;  %v6191_v55 = vld [vmem:[#allocation63_spill] sm:$0xff] }
 0x23d   : > { %v6192_v53 = vrot.slane %v6191_v55, 1 }
 0x23e   : > { %v3988_v22 = vpack.c.bf16 %v2774_v10, %v2773_v8  ;;  %v2869_v12 = vadd.f32 %v2868_v40, %v2774_v10  ;;  %v2907_v25 = vmul.f32 %v2774_v10, %v2774_v10  ;;  %v6199_v8 = vld [vmem:[#allocation64_spill] sm:$0xff] }
 0x23f   : > { %v2532_v11 = vpop.f32.mrf.mxu2  ;;  %v2621_v37 = vpop.f32.mrf.mxu3  ;;  %v730_v62 = vsel %vm6193_vm7, %v6192_v53, %v728_v43 }
 0x240   : > { %4063 = vst [vmem:[%s5664_s13 + $0x20] sm:$0xff] %v3988_v22   ;;  %v2938_v31 = vadd.f32 %v2937_v28, %v2907_v25  ;;  %v2622_v23 = vadd.f32 %v2621_v37, %v2532_v11  ;;  %v2012_v6 = vpop.f32.mrf.mxu1  ;;  %v2712_v9 = vpop.f32.mrf.mxu0  ;;  %v3561_v47 = vpack.c.bf16 %v761_v17, %v730_v62  ;;  %v6202_v28 = vld [vmem:[#allocation7_spill] sm:$0xff] }
 0x241   : > { %v2013_v40 = vadd.f32 %v2012_v6, %v6199_v8 }
 0x242   : > { %v2711_v32 = vadd.f32 %v2710_v18, %v2622_v23 }
 0x244   : > { %v2775_v27 = vadd.f32 %v2711_v32, %v2011_v46  ;;  %v6204_v32 = vmov 0.0|0.0  }
 0x246   : > { %v2870_v20 = vadd.f32 %v2869_v12, %v2775_v27  ;;  %v2908_v51 = vmul.f32 %v2775_v27, %v2775_v27 }
 0x247   : > { %v2534_v15 = vpop.f32.mrf.mxu2  ;;  %v2623_v7 = vpop.f32.mrf.mxu3 }
 0x248   : > { %v2939_v19 = vadd.f32 %v2938_v31, %v2908_v51  ;;  %v2624_v1 = vadd.f32 %v2623_v7, %v2534_v15  ;;  %v2015_v58 = vpop.f32.mrf.mxu1  ;;  %v2715_v38 = vpop.f32.mrf.mxu0 }
 0x249   : > { %v2016_v22 = vadd.f32 %v2015_v58, %v6203_v50 }
 0x24a   : > { %v2713_v3 = vadd.f32 %v2712_v9, %v2624_v1 }
 0x24b   : > { %3558 = vmatmul.msk.bf16.gmra.mxu1 %vm5480_vm4, %v5484_v36  ;;  %3826 = vmatmul.msk.bf16.gmra.mxu0 %vm5731_vm3, %v3561_v47 }
 0x24c   : > { %v2776_v60 = vadd.f32 %v2713_v3, %v2013_v40  ;;  %3766 = vmatmul.msk.bf16.gmra.mxu2 %vm5489_vm12, %v6200_v4  ;;  %2665 = vmatmul.bf16.gmra.mxu3 %v6202_v28 }
 0x24e   : > { %v3993_v33 = vpack.c.bf16 %v2776_v60, %v2775_v27  ;;  %v2871_v21 = vadd.f32 %v2870_v20, %v2776_v60  ;;  %v2909_v18 = vmul.f32 %v2776_v60, %v2776_v60 }
 0x24f   : > { %v2537_v61 = vpop.f32.mrf.mxu2  ;;  %v2626_v16 = vpop.f32.mrf.mxu3 }
 0x250   : > { %4064 = vst [vmem:[%s5664_s13 + $0x28] sm:$0xff] %v3993_v33   ;;  %v2940_v10 = vadd.f32 %v2939_v19, %v2909_v18  ;;  %v2627_v0 = vadd.f32 %v2626_v16, %v2537_v61  ;;  %v2017_v54 = vpop.f32.mrf.mxu1  ;;  %v2717_v36 = vpop.f32.mrf.mxu0 }
 0x251   : > { %v2018_v49 = vadd.f32 %v2017_v54, %v5501_v34 }
 0x252   : > { %v2716_v12 = vadd.f32 %v2715_v38, %v2627_v0 }
 0x254   : > { %v2777_v25 = vadd.f32 %v2716_v12, %v2016_v22 }
 0x256   : > { %v2872_v11 = vadd.f32 %v2871_v21, %v2777_v25  ;;  %v2910_v37 = vmul.f32 %v2777_v25, %v2777_v25 }
 0x257   : > { %v2539_v31 = vpop.f32.mrf.mxu2  ;;  %v2628_v23 = vpop.f32.mrf.mxu3 }
 0x258   : > { %v2941_v6 = vadd.f32 %v2940_v10, %v2910_v37  ;;  %v2629_v9 = vadd.f32 %v2628_v23, %v2539_v31  ;;  %v2020_v43 = vpop.f32.mrf.mxu1  ;;  %v2720_v45 = vpop.f32.mrf.mxu0 }
 0x259   : > { %v2021_v15 = vadd.f32 %v2020_v43, %v5504_v52 }
 0x25a   : > { %v2718_v46 = vadd.f32 %v2717_v36, %v2629_v9 }
 0x25b   : > { %3562 = vmatmul.msk.bf16.gmra.mxu1 %vm5731_vm3, %v3561_v47  ;;  %2759 = vmatmul.bf16.gmra.mxu0 %v6204_v32 }
 0x25c   : > { %v2778_v27 = vadd.f32 %v2718_v46, %v2018_v49  ;;  %2581 = vmatmul.bf16.gmra.mxu2 %v6204_v32  ;;  %2670 = vmatmul.bf16.gmra.mxu3 %v6204_v32 }
 0x25e   : > { %v3998_v55 = vpack.c.bf16 %v2778_v27, %v2777_v25  ;;  %v2873_v53 = vadd.f32 %v2872_v11, %v2778_v27  ;;  %v2911_v62 = vmul.f32 %v2778_v27, %v2778_v27 }
 0x25f   : > { %v2542_v63 = vpop.f32.mrf.mxu2  ;;  %v2631_v13 = vpop.f32.mrf.mxu3 }
 0x260   : > { %4065 = vst [vmem:[%s5664_s13 + $0x30] sm:$0xff] %v3998_v55   ;;  %v2942_v17 = vadd.f32 %v2941_v6, %v2911_v62  ;;  %v2632_v20 = vadd.f32 %v2631_v13, %v2542_v63  ;;  %v2022_v34 = vpop.f32.mrf.mxu1  ;;  %v2722_v51 = vpop.f32.mrf.mxu0 }
 0x261   : > { %v2023_v60 = vadd.f32 %v2022_v34, %v5517_v39 }
 0x262   : > { %v2721_v7 = vadd.f32 %v2720_v45, %v2632_v20 }
 0x264   : > { %v2779_v47 = vadd.f32 %v2721_v7, %v2021_v15 }
 0x266   : > { %v2874_v19 = vadd.f32 %v2873_v53, %v2779_v47  ;;  %v2912_v1 = vmul.f32 %v2779_v47, %v2779_v47 }
 0x267   : > { %v2544_v58 = vpop.f32.mrf.mxu2  ;;  %v2633_v38 = vpop.f32.mrf.mxu3 }
 0x268   : > { %v2943_v42 = vadd.f32 %v2942_v17, %v2912_v1  ;;  %v2634_v8 = vadd.f32 %v2633_v38, %v2544_v58  ;;  %v2025_v40 = vpop.f32.mrf.mxu1  ;;  %v2725_v3 = vpop.f32.mrf.mxu0 }
 0x269   : > { %v2026_v54 = vadd.f32 %v2025_v40, %v5520_v26 }
 0x26a   : > { %v2723_v4 = vadd.f32 %v2722_v51, %v2634_v8 }
 0x26c   : > { %v2780_v57 = vadd.f32 %v2723_v4, %v2023_v60 }
 0x26e   : > { %v4003_v28 = vpack.c.bf16 %v2780_v57, %v2779_v47  ;;  %v2875_v33 = vadd.f32 %v2874_v19, %v2780_v57  ;;  %v2913_v21 = vmul.f32 %v2780_v57, %v2780_v57 }
 0x26f   : > { %v2547_v18 = vpop.f32.mrf.mxu2  ;;  %v2636_v52 = vpop.f32.mrf.mxu3 }
 0x270   : > { %4066 = vst [vmem:[%s5664_s13 + $0x38] sm:$0xff] %v4003_v28   ;;  %v2944_v61 = vadd.f32 %v2943_v42, %v2913_v21  ;;  %v2637_v16 = vadd.f32 %v2636_v52, %v2547_v18  ;;  %v2027_v10 = vpop.f32.mrf.mxu1  ;;  %v2727_v0 = vpop.f32.mrf.mxu0 }
 0x271   : > { %v2028_v6 = vadd.f32 %v2027_v10, %v5533_v56 }
 0x272   : > { %v2726_v36 = vadd.f32 %v2725_v3, %v2637_v16 }
 0x274   : > { %v2781_v50 = vadd.f32 %v2726_v36, %v2026_v54 }
 0x276   : > { %v2876_v22 = vadd.f32 %v2875_v33, %v2781_v50  ;;  %v2914_v12 = vmul.f32 %v2781_v50, %v2781_v50 }
 0x277   : > { %v2549_v39 = vpop.f32.mrf.mxu2  ;;  %v2638_v25 = vpop.f32.mrf.mxu3 }
 0x278   : > { %v2945_v11 = vadd.f32 %v2944_v61, %v2914_v12  ;;  %v2639_v37 = vadd.f32 %v2638_v25, %v2549_v39  ;;  %v2030_v31 = vpop.f32.mrf.mxu1  ;;  %v2730_v23 = vpop.f32.mrf.mxu0 }
 0x279   : > { %v2031_v63 = vadd.f32 %v2030_v31, %v5536_v59 }
 0x27a   : > { %v2728_v9 = vadd.f32 %v2727_v0, %v2639_v37 }
 0x27c   : > { %v2782_v43 = vadd.f32 %v2728_v9, %v2028_v6 }
 0x27e   : > { %v4008_v45 = vpack.c.bf16 %v2782_v43, %v2781_v50  ;;  %v2877_v49 = vadd.f32 %v2876_v22, %v2782_v43  ;;  %v2915_v46 = vmul.f32 %v2782_v43, %v2782_v43 }
 0x27f   : > { %v2552_v32 = vpop.f32.mrf.mxu2  ;;  %v2641_v26 = vpop.f32.mrf.mxu3 }
 0x280   : > { %4067 = vst [vmem:[%s5664_s13 + $0x40] sm:$0xff] %v4008_v45   ;;  %v2946_v27 = vadd.f32 %v2945_v11, %v2915_v46  ;;  %v2642_v55 = vadd.f32 %v2641_v26, %v2552_v32  ;;  %v2032_v53 = vpop.f32.mrf.mxu1  ;;  %v2732_v62 = vpop.f32.mrf.mxu0 }
 0x281   : > { %v2033_v1 = vadd.f32 %v2032_v53, %v5549_v44 }
 0x282   : > { %v2731_v13 = vadd.f32 %v2730_v23, %v2642_v55 }
 0x284   : > { %v2783_v17 = vadd.f32 %v2731_v13, %v2031_v63 }
 0x286   : > { %v2878_v20 = vadd.f32 %v2877_v49, %v2783_v17  ;;  %v2916_v34 = vmul.f32 %v2783_v17, %v2783_v17 }
 0x287   : > { %v2554_v56 = vpop.f32.mrf.mxu2  ;;  %v2643_v51 = vpop.f32.mrf.mxu3 }
 0x288   : > { %v2947_v15 = vadd.f32 %v2946_v27, %v2916_v34  ;;  %v2644_v7 = vadd.f32 %v2643_v51, %v2554_v56  ;;  %v2035_v47 = vpop.f32.mrf.mxu1  ;;  %v2735_v19 = vpop.f32.mrf.mxu0 }
 0x289   : > { %v2036_v33 = vadd.f32 %v2035_v47, %v5552_v24 }
 0x28a   : > { %v2733_v58 = vadd.f32 %v2732_v62, %v2644_v7 }
 0x28c   : > { %v2784_v38 = vadd.f32 %v2733_v58, %v2033_v1  ;;  %v6205_v1 = vld [vmem:[#allocation22_spill] sm:$0xff] }
 0x28e   : > { %v4013_v42 = vpack.c.bf16 %v2784_v38, %v2783_v17  ;;  %v2879_v8 = vadd.f32 %v2878_v20, %v2784_v38  ;;  %v2917_v40 = vmul.f32 %v2784_v38, %v2784_v38 }
 0x28f   : > { %v2557_v3 = vpop.f32.mrf.mxu2  ;;  %v2646_v59 = vpop.f32.mrf.mxu3 }
 0x290   : > { %4068 = vst [vmem:[%s5664_s13 + $0x48] sm:$0xff] %v4013_v42   ;;  %v2948_v60 = vadd.f32 %v2947_v15, %v2917_v40  ;;  %v2647_v4 = vadd.f32 %v2646_v59, %v2557_v3  ;;  %v2037_v57 = vpop.f32.mrf.mxu1  ;;  %v2737_v28 = vpop.f32.mrf.mxu0 }
 0x291   : > { %v2038_v50 = vadd.f32 %v2037_v57, %v5565_v29 }
 0x292   : > { %v2736_v21 = vadd.f32 %v2735_v19, %v2647_v4 }
 0x294   : > { %v2785_v18 = vadd.f32 %v2736_v21, %v2036_v33 }
 0x296   : > { %v2880_v52 = vadd.f32 %v2879_v8, %v2785_v18  ;;  %v2918_v61 = vmul.f32 %v2785_v18, %v2785_v18 }
 0x297   : > { %v2559_v44 = vpop.f32.mrf.mxu2  ;;  %v2648_v16 = vpop.f32.mrf.mxu3 }
 0x298   : > { %v2949_v10 = vadd.f32 %v2948_v60, %v2918_v61  ;;  %v2649_v0 = vadd.f32 %v2648_v16, %v2559_v44  ;;  %v2040_v54 = vpop.f32.mrf.mxu1  ;;  %v2740_v36 = vpop.f32.mrf.mxu0 }
 0x299   : > { %v2041_v43 = vadd.f32 %v2040_v54, %v5568_v5 }
 0x29a   : > { %v2738_v22 = vadd.f32 %v2737_v28, %v2649_v0  ;;  %v6206_v28 = vld [vmem:[#allocation28_spill] sm:$0xff] }
 0x29c   : > { %v2786_v12 = vadd.f32 %v2738_v22, %v2038_v50  ;;  %v6207_v22 = vld [vmem:[#allocation38_spill] sm:$0xff] }
 0x29e   : > { %v4018_v39 = vpack.c.bf16 %v2786_v12, %v2785_v18  ;;  %v2881_v25 = vadd.f32 %v2880_v52, %v2786_v12  ;;  %v2919_v11 = vmul.f32 %v2786_v12, %v2786_v12 }
 0x29f   : > { %v2562_v37 = vpop.f32.mrf.mxu2  ;;  %v2651_v24 = vpop.f32.mrf.mxu3 }
 0x2a0   : > { %4069 = vst [vmem:[%s5664_s13 + $0x50] sm:$0xff] %v4018_v39   ;;  %v2950_v31 = vadd.f32 %v2949_v10, %v2919_v11  ;;  %v2652_v23 = vadd.f32 %v2651_v24, %v2562_v37  ;;  %v2042_v6 = vpop.f32.mrf.mxu1  ;;  %v2742_v9 = vpop.f32.mrf.mxu0 }
 0x2a1   : > { %v2043_v63 = vadd.f32 %v2042_v6, %v5581_v2 }
 0x2a2   : > { %v2741_v45 = vadd.f32 %v2740_v36, %v2652_v23 }
 0x2a4   : > { %v2787_v49 = vadd.f32 %v2741_v45, %v2041_v43 }
 0x2a6   : > { %v2882_v46 = vadd.f32 %v2881_v25, %v2787_v49  ;;  %v2920_v32 = vmul.f32 %v2787_v49, %v2787_v49 }
 0x2a7   : > { %v2564_v29 = vpop.f32.mrf.mxu2  ;;  %v2653_v26 = vpop.f32.mrf.mxu3 }
 0x2a8   : > { %v2951_v27 = vadd.f32 %v2950_v31, %v2920_v32  ;;  %v2654_v55 = vadd.f32 %v2653_v26, %v2564_v29  ;;  %v2045_v53 = vpop.f32.mrf.mxu1  ;;  %v2745_v62 = vpop.f32.mrf.mxu0 }
 0x2a9   : > { %v2046_v58 = vadd.f32 %v2045_v53, %v6205_v1 }
 0x2aa   : > { %v2743_v13 = vadd.f32 %v2742_v9, %v2654_v55 }
 0x2ac   : > { %v2788_v17 = vadd.f32 %v2743_v13, %v2043_v63 }
 0x2ae   : > { %v4023_v20 = vpack.c.bf16 %v2788_v17, %v2787_v49  ;;  %v2883_v34 = vadd.f32 %v2882_v46, %v2788_v17  ;;  %v2921_v56 = vmul.f32 %v2788_v17, %v2788_v17 }
 0x2af   : > { %v2567_v51 = vpop.f32.mrf.mxu2  ;;  %v2656_v5 = vpop.f32.mrf.mxu3 }
 0x2b0   : > { %4070 = vst [vmem:[%s5664_s13 + $0x58] sm:$0xff] %v4023_v20   ;;  %v2952_v15 = vadd.f32 %v2951_v27, %v2921_v56  ;;  %v2657_v7 = vadd.f32 %v2656_v5, %v2567_v51  ;;  %v2047_v47 = vpop.f32.mrf.mxu1  ;;  %v2747_v19 = vpop.f32.mrf.mxu0 }
 0x2b1   : > { %v2048_v33 = vadd.f32 %v2047_v47, %v6206_v28 }
 0x2b2   : > { %v2746_v38 = vadd.f32 %v2745_v62, %v2657_v7 }
 0x2b4   : > { %v2789_v42 = vadd.f32 %v2746_v38, %v2046_v58 }
 0x2b6   : > { %v2884_v8 = vadd.f32 %v2883_v34, %v2789_v42  ;;  %v2922_v40 = vmul.f32 %v2789_v42, %v2789_v42 }
 0x2b7   : > { %v2569_v2 = vpop.f32.mrf.mxu2  ;;  %v2658_v3 = vpop.f32.mrf.mxu3 }
 0x2b8   : > { %v2953_v59 = vadd.f32 %v2952_v15, %v2922_v40  ;;  %v2659_v60 = vadd.f32 %v2658_v3, %v2569_v2  ;;  %v2050_v4 = vpop.f32.mrf.mxu1  ;;  %v2750_v57 = vpop.f32.mrf.mxu0 }
 0x2b9   : > { %v2051_v12 = vadd.f32 %v2050_v4, %v6207_v22 }
 0x2ba   : > { %v2748_v21 = vadd.f32 %v2747_v19, %v2659_v60 }
 0x2bc   : > { %v2790_v18 = vadd.f32 %v2748_v21, %v2048_v33 }
 0x2be   : > { %v4028_v52 = vpack.c.bf16 %v2790_v18, %v2789_v42  ;;  %v2885_v61 = vadd.f32 %v2884_v8, %v2790_v18  ;;  %v2923_v44 = vmul.f32 %v2790_v18, %v2790_v18 }
 0x2bf   : > { %v2572_v16 = vpop.f32.mrf.mxu2  ;;  %v2661_v10 = vpop.f32.mrf.mxu3 }
 0x2c0   : > { %4071 = vst [vmem:[%s5664_s13 + $0x60] sm:$0xff] %v4028_v52   ;;  %v2954_v0 = vadd.f32 %v2953_v59, %v2923_v44  ;;  %v2662_v54 = vadd.f32 %v2661_v10, %v2572_v16  ;;  %v2052_v36 = vpop.f32.mrf.mxu1  ;;  %v2752_v50 = vpop.f32.mrf.mxu0 }
 0x2c1   : > { %v2053_v43 = vadd.f32 %v2052_v36, %v5613_v35 }
 0x2c2   : > { %v2751_v39 = vadd.f32 %v2750_v57, %v2662_v54 }
 0x2c4   : > { %v2791_v25 = vadd.f32 %v2751_v39, %v2051_v12 }
 0x2c6   : > { %v2886_v11 = vadd.f32 %v2885_v61, %v2791_v25  ;;  %v2924_v37 = vmul.f32 %v2791_v25, %v2791_v25 }
 0x2c7   : > { %v2574_v24 = vpop.f32.mrf.mxu2  ;;  %v2663_v31 = vpop.f32.mrf.mxu3 }
 0x2c8   : > { %v2955_v23 = vadd.f32 %v2954_v0, %v2924_v37  ;;  %v2664_v6 = vadd.f32 %v2663_v31, %v2574_v24  ;;  %v2055_v9 = vpop.f32.mrf.mxu1  ;;  %v2755_v49 = vpop.f32.mrf.mxu0 }
 0x2c9   : > { %v2056_v63 = vadd.f32 %v2055_v9, %v5616_v30 }
 0x2ca   : > { %v2753_v45 = vadd.f32 %v2752_v50, %v2664_v6 }
 0x2cc   : > { %v2792_v46 = vadd.f32 %v2753_v45, %v2053_v43  ;;  %v6208_v45 = vlaneseq }
 0x2ce   : > { %v4033_v32 = vpack.c.bf16 %v2792_v46, %v2791_v25  ;;  %v2887_v29 = vadd.f32 %v2886_v11, %v2792_v46  ;;  %v2925_v26 = vmul.f32 %v2792_v46, %v2792_v46  ;;  %vm2975_vm4 = vcmp.lt.s32.totalorder %v6208_v45, 256 }
 0x2cf   : > { %v2577_v27 = vpop.f32.mrf.mxu2  ;;  %v2666_v55 = vpop.f32.mrf.mxu3 }
 0x2d0   : > { %4072 = vst [vmem:[%s5664_s13 + $0x68] sm:$0xff] %v4033_v32   ;;  %v2956_v53 = vadd.f32 %v2955_v23, %v2925_v26  ;;  %v2667_v62 = vadd.f32 %v2666_v55, %v2577_v27  ;;  %v2057_v17 = vpop.f32.mrf.mxu1  ;;  %v2757_v34 = vpop.f32.mrf.mxu0 }
 0x2d1   : > { %v2058_v47 = vadd.f32 %v2057_v17, %v5629_v14 }
 0x2d2   : > { %v2756_v13 = vadd.f32 %v2755_v49, %v2667_v62 }
 0x2d4   : > { %v2793_v20 = vadd.f32 %v2756_v13, %v2056_v63 }
 0x2d6   : > { %v2888_v56 = vadd.f32 %v2887_v29, %v2793_v20  ;;  %v2926_v35 = vmul.f32 %v2793_v20, %v2793_v20 }
 0x2d7   : > { %v2579_v51 = vpop.f32.mrf.mxu2  ;;  %v2668_v5 = vpop.f32.mrf.mxu3 }
 0x2d8   : > { %v2957_v15 = vadd.f32 %v2956_v53, %v2926_v35  ;;  %v2669_v7 = vadd.f32 %v2668_v5, %v2579_v51  ;;  %v2060_v58 = vpop.f32.mrf.mxu1  ;;  %v2760_v30 = vpop.f32.mrf.mxu0 }
 0x2d9   : > { %v2061_v60 = vadd.f32 %v2060_v58, %v5632_v41 }
 0x2da   : > { %v2758_v19 = vadd.f32 %v2757_v34, %v2669_v7 }
 0x2dc   : > { %v2794_v1 = vadd.f32 %v2758_v19, %v2058_v47 }
 0x2de   : > { %v4038_v38 = vpack.c.bf16 %v2794_v1, %v2793_v20  ;;  %v2889_v42 = vadd.f32 %v2888_v56, %v2794_v1  ;;  %v2927_v8 = vmul.f32 %v2794_v1, %v2794_v1 }
 0x2df   : > { %v2582_v40 = vpop.f32.mrf.mxu2  ;;  %v2671_v2 = vpop.f32.mrf.mxu3 }
 0x2e0   : > { %4073 = vst [vmem:[%s5664_s13 + $0x70] sm:$0xff] %v4038_v38   ;;  %v2958_v3 = vadd.f32 %v2957_v15, %v2927_v8  ;;  %v2672_v59 = vadd.f32 %v2671_v2, %v2582_v40  ;;  %v2062_v14 = vpop.f32.mrf.mxu1  ;;  %v2762_v44 = vpop.f32.mrf.mxu0 }
 0x2e1   : > { %v2063_v16 = vadd.f32 %v2062_v14, %v5645_v48 }
 0x2e2   : > { %v2761_v4 = vadd.f32 %v2760_v30, %v2672_v59 }
 0x2e4   : > { %v2795_v57 = vadd.f32 %v2761_v4, %v2061_v60 }
 0x2e6   : > { %v2890_v28 = vadd.f32 %v2889_v42, %v2795_v57  ;;  %v2928_v33 = vmul.f32 %v2795_v57, %v2795_v57 }
 0x2e7   : > { %v2584_v21 = vpop.f32.mrf.mxu2  ;;  %v2673_v18 = vpop.f32.mrf.mxu3 }
 0x2e8   : > { %v2959_v52 = vadd.f32 %v2958_v3, %v2928_v33  ;;  %v2674_v61 = vadd.f32 %v2673_v18, %v2584_v21 }
 0x2ea   : > { %v2763_v10 = vadd.f32 %v2762_v44, %v2674_v61 }
 0x2ec   : > { %v2796_v0 = vadd.f32 %v2763_v10, %v2063_v16 }
 0x2ee   : > { %v4043_v54 = vpack.c.bf16 %v2796_v0, %v2795_v57  ;;  %v2891_v36 = vadd.f32 %v2890_v28, %v2796_v0  ;;  %v2929_v41 = vmul.f32 %v2796_v0, %v2796_v0 }
 0x2f0   : > { %4074 = vst [vmem:[%s5664_s13 + $0x78] sm:$0xff] %v4043_v54   ;;  %v2892_v50 = vrot.slane %v2891_v36, 4  ;;  %v2960_v22 = vadd.f32 %v2959_v52, %v2929_v41 }
 0x2f2   : > { %v2893_v12 = vadd.f32 %v2892_v50, %v2891_v36  ;;  %v2961_v39 = vrot.slane %v2960_v22, 4 }
 0x2f4   : > { %v2894_v25 = vrot.slane %v2893_v12, 2  ;;  %v2962_v11 = vadd.f32 %v2961_v39, %v2960_v22 }
 0x2f6   : > { %v2895_v37 = vadd.f32 %v2894_v25, %v2893_v12  ;;  %v2963_v24 = vrot.slane %v2962_v11, 2 }
 0x2f8   : > { %v2964_v31 = vadd.f32 %v2963_v24, %v2962_v11  ;;  %v2896_v23 = vrot.slane %v2895_v37, 1 }
 0x2fa   : > { %v2965_v48 = vrot.slane %v2964_v31, 1  ;;  %v2897_v9 = vadd.f32 %v2896_v23, %v2895_v37 }
 0x2fc   : > { %v2966_v6 = vadd.f32 %v2965_v48, %v2964_v31 }
 0x2fe   : > { %v2969_v43 = vrot.slane %v2966_v6, 7 }
 0x300   : > { %v2971_v49 = vsel %vm2970_vm14, %v2897_v9, %v2969_v43 }
 0x301   : > { %2977 = vst.msk [vmem:[%s238_s15] sm:$0x3] %vm2975_vm4, %v2971_v49 }
 0x302 PF: > { %s16_s18 = sadd.s32 1, %s4152_s18  }
 0x303   : > { %p13_p5 = scmp.ge.s32.totalorder %s16_s18, 4  }
 0x305   :  { %15 = sbr.rel (!%p13_p5) target bundleno = 1 (0x1), region = 80 }

</bundles_post_ra>
